<compile_context>
chip_gen: v7x
topology: tpu7x:2x2x1
jax: 0.10.0
libtpu: 0.0.40
codegen_flags: <defaults>
</compile_context>

<pallas_src>
import math
import numpy as np
import jax
import jax.numpy as jnp
from jax import lax
from jax.experimental import pallas as pl
from jax.experimental.pallas import tpu as pltpu

# ------------------------- hyper parameters (args) -------------------------
BATCH = 8
SEQ_LEN = 16
PRED_LEN = 8
TOT_LEN = SEQ_LEN + PRED_LEN          # 24
EMB = 32
HID = 16
CONV_DIM = 4
KSIZE = 3
LP = SEQ_LEN - KSIZE + 1              # 14
FC_DIM = CONV_DIM * LP                # 56
CW = 2 * CONV_DIM * LP                # 112 (mean+var conv branches fused)
NUM_SAMPLES = 3
NUM_CLUSTER = 2
SUPPORT_RATE = 0.5
LOW_F = 3
HIGH_F = 2
FREQ_DIM = 4                          # freq='h'
N_SUP = int(round(BATCH * SUPPORT_RATE))   # 4 support series
N_QRY = BATCH - N_SUP                      # 4 query series


# ------------------------------ Pallas kernels ------------------------------
def _grl_kernel(x_ref, wt_ref, proj_ref, wfm_ref, bfm_ref, wfv_ref, bfv_ref,
                wr_ref, br_ref, eps_ref,
                fea_ref, mean_ref, logv_ref, rec_ref):
    # One GRL Encoder path (grid step 0 = trend, 1 = season).
    # conv1d(1->2C, k) for the fused {mean,var} branches expressed as a single
    # Toeplitz matmul; conv bias is omitted because BatchNorm removes the
    # per-channel mean (it cancels exactly).
    x = x_ref[0]                                                   # (B, SEQ_LEN)
    conv = jnp.dot(x, wt_ref[0], preferred_element_type=jnp.float32)   # (B, CW)
    # training-mode BatchNorm1d: per-channel stats over (batch, length).
    m1 = jnp.mean(conv, axis=0, keepdims=True)                     # (1, CW)
    m2 = jnp.mean(conv * conv, axis=0, keepdims=True)
    mu = jnp.dot(m1, proj_ref[...], preferred_element_type=jnp.float32)
    ex2 = jnp.dot(m2, proj_ref[...], preferred_element_type=jnp.float32)
    bn = (conv - mu) * lax.rsqrt(ex2 - mu * mu + 1e-5)
    # fc_mean / fc_var (flatten permutation pre-folded into the weights).
    mean_ = jnp.dot(bn, wfm_ref[0], preferred_element_type=jnp.float32) + bfm_ref[0]
    raw = jnp.dot(bn, wfv_ref[0], preferred_element_type=jnp.float32) + bfv_ref[0]
    # numerically safe softplus  log(1 + exp(raw))
    logv = jnp.maximum(raw, 0.0) + jnp.log1p(jnp.exp(-jnp.abs(raw)))
    # mean over NUM_SAMPLES reparameterized samples == mean + eps_mean * std
    fea = mean_ + eps_ref[0] * jnp.sqrt(jnp.exp(logv))
    rec = jnp.dot(fea, wr_ref[0], preferred_element_type=jnp.float32) + br_ref[0]
    fea_ref[0] = fea
    mean_ref[0] = mean_
    logv_ref[0] = logv
    rec_ref[0] = rec


def _critic_kernel(y_ref, z_ref, wy_ref, by_ref, w1a_ref, w1b_ref, b1_ref,
                   w2_ref, b2_ref, o_ref):
    # CriticFunc: sigmoid(W2 @ relu(W1 @ cat[fc_y(y), fea] + b1) + b2)
    # All 4 evaluations (trend/season x {z_q, z_shuffle}) are batched in M=4B.
    hy = (jnp.dot(y_ref[...], wy_ref[...], preferred_element_type=jnp.float32)
          + by_ref[...])
    h = (jnp.dot(hy, w1a_ref[...], preferred_element_type=jnp.float32)
         + jnp.dot(z_ref[...], w1b_ref[...], preferred_element_type=jnp.float32)
         + b1_ref[...])
    h = jnp.maximum(h, 0.0)
    o_ref[...] = jax.nn.sigmoid(
        jnp.dot(h, w2_ref[...], preferred_element_type=jnp.float32) + b2_ref[...])


def _embed_hid_kernel(f_ref, waug_ref, whid_ref, bhid_ref, o_ref):
    # DataEmbedding (circular token conv + temporal + positional, one matmul)
    # fused with fc_hid.  Grid step 0 = trend, 1 = season.
    emb = jnp.dot(f_ref[0], waug_ref[0], preferred_element_type=jnp.float32)
    # TODO(synk): dropout(p=0.1) treated as identity (no RNG-matching possible).
    o_ref[0] = (jnp.dot(emb, whid_ref[0], preferred_element_type=jnp.float32)
                + bhid_ref[0])


def _mate_head_kernel(hid_ref, ysup_ref, wlab_ref, blab_ref,
                      wmt_ref, wmb_ref, wvt_ref, wvb_ref, bm_ref, bv_ref,
                      eps_ref, m_ref, g_ref, s_ref,
                      w1h_ref, w1a_ref, b1_ref, w2t_ref, b2_ref, o_ref):
    # Both mate_inference passes (trend + season) + fc_output_1 + fc_output_2
    # in a single launch.  Cluster averaging / gather use static 0-1 matrices.
    hq_sum = jnp.zeros((N_QRY * TOT_LEN, HID), jnp.float32)
    aq_sum = jnp.zeros((N_QRY * TOT_LEN, EMB), jnp.float32)
    for p in range(2):                                   # 0 = trend, 1 = season
        hid = hid_ref[p]                                 # (B*L, H)
        hs = hid[:N_SUP * TOT_LEN]                       # support rows
        hq = hid[N_SUP * TOT_LEN:]                       # query rows
        lab = ysup_ref[p] * wlab_ref[p] + blab_ref[p]    # label FC  (n_s*L, H)
        cm_h = jnp.dot(m_ref[...], hs, preferred_element_type=jnp.float32)   # (NC*L, H)
        cm_l = jnp.dot(m_ref[...], lab, preferred_element_type=jnp.float32)  # (NC*L, H)
        mu = (jnp.dot(cm_h, wmt_ref[p], preferred_element_type=jnp.float32)
              + jnp.dot(cm_l, wmb_ref[p], preferred_element_type=jnp.float32)
              + bm_ref[p])                                                    # (NC*L, E)
        lv = (jnp.dot(cm_h, wvt_ref[p], preferred_element_type=jnp.float32)
              + jnp.dot(cm_l, wvb_ref[p], preferred_element_type=jnp.float32)
              + bv_ref[p])
        adapt = mu + eps_ref[p] * jnp.sqrt(jnp.exp(lv))                       # (NC*L, E)
        hq_sum = hq_sum + hq
        aq_sum = aq_sum + jnp.dot(g_ref[...], adapt,
                                  preferred_element_type=jnp.float32)         # (nq*L, E)
    # fc_output_1 on query_fea = [hid | adapt] (split weights -> no concat)
    o1 = (jnp.dot(hq_sum, w1h_ref[...], preferred_element_type=jnp.float32)
          + jnp.dot(aq_sum, w1a_ref[...], preferred_element_type=jnp.float32)
          + b1_ref[...])                                                       # (nq*L, 1)
    # fc_output_2 over the length axis via tiled weight + summation matrix.
    o_ref[...] = (jnp.dot(s_ref[...], o1 * w2t_ref[...],
                          preferred_element_type=jnp.float32) + b2_ref[...])   # (nq, PRED)


# --------------------------- pallas_call wrappers ---------------------------
def _pcall(kernel, out_shape, *args):
    args = tuple(jnp.asarray(a, jnp.float32) for a in args)
    return pl.pallas_call(
        kernel,
        out_shape=jax.ShapeDtypeStruct(out_shape, jnp.float32),
        in_specs=[pl.BlockSpec(memory_space=pltpu.MemorySpace.VMEM)] * len(args),
        out_specs=pl.BlockSpec(memory_space=pltpu.MemorySpace.VMEM),
    )(*args)


def grl_encode_call(x2, KP, eps2):
    B = x2.shape[1]
    path = lambda i: (i, 0, 0)
    shared = lambda i: (0, 0)
    out_shape = (jax.ShapeDtypeStruct((2, B, EMB), jnp.float32),
                 jax.ShapeDtypeStruct((2, B, EMB), jnp.float32),
                 jax.ShapeDtypeStruct((2, B, EMB), jnp.float32),
                 jax.ShapeDtypeStruct((2, B, TOT_LEN), jnp.float32))
    out_specs = (pl.BlockSpec((1, B, EMB), path),
                 pl.BlockSpec((1, B, EMB), path),
                 pl.BlockSpec((1, B, EMB), path),
                 pl.BlockSpec((1, B, TOT_LEN), path))
    return pl.pallas_call(
        _grl_kernel,
        out_shape=out_shape,
        grid=(2,),
        in_specs=[
            pl.BlockSpec((1, B, SEQ_LEN), path),
            pl.BlockSpec((1, SEQ_LEN, CW), path),
            pl.BlockSpec((CW, CW), shared),
            pl.BlockSpec((1, CW, EMB), path),
            pl.BlockSpec((1, 1, EMB), path),
            pl.BlockSpec((1, CW, EMB), path),
            pl.BlockSpec((1, 1, EMB), path),
            pl.BlockSpec((1, EMB, TOT_LEN), path),
            pl.BlockSpec((1, 1, TOT_LEN), path),
            pl.BlockSpec((1, B, EMB), path),
        ],
        out_specs=out_specs,
        compiler_params=pltpu.CompilerParams(dimension_semantics=("parallel",)),
    )(x2, KP["grl_wtall"], KP["grl_proj"], KP["grl_wfm"], KP["grl_bfm"],
      KP["grl_wfv"], KP["grl_bfv"], KP["grl_wrec"], KP["grl_brec"], eps2)


def embed_hid_call(feats, KP):
    BL, FW = feats.shape[1], feats.shape[2]
    path = lambda i: (i, 0, 0)
    return pl.pallas_call(
        _embed_hid_kernel,
        out_shape=jax.ShapeDtypeStruct((2, BL, HID), jnp.float32),
        grid=(2,),
        in_specs=[pl.BlockSpec((1, BL, FW), path),
                  pl.BlockSpec((1, FW, EMB), path),
                  pl.BlockSpec((1, EMB, HID), path),
                  pl.BlockSpec((1, 1, HID), path)],
        out_specs=pl.BlockSpec((1, BL, HID), path),
        compiler_params=pltpu.CompilerParams(dimension_semantics=("parallel",)),
    )(feats, KP["emb_waug"], KP["emb_whid"], KP["emb_bhid"])


def critic_call(Y, Z, cp):
    return _pcall(_critic_kernel, (Y.shape[0], 1), Y, Z,
                  cp["wy"], cp["by"], cp["w1a"], cp["w1b"], cp["b1"],
                  cp["w2"], cp["b2"])


def mate_head_call(hid, ysup, eps, KP):
    return _pcall(_mate_head_kernel, (N_QRY, PRED_LEN),
                  hid, ysup, KP["lab_w"], KP["lab_b"],
                  KP["mate_wmt"], KP["mate_wmb"], KP["mate_wvt"], KP["mate_wvb"],
                  KP["mate_bm"], KP["mate_bv"], eps,
                  KP["mate_M"], KP["mate_G"], KP["mate_S"],
                  KP["out_w1h"], KP["out_w1a"], KP["out_b1"],
                  KP["out_w2t"], KP["out_b2"])


# ------------------------------ building blocks ------------------------------
def positional_embedding(L, d_model):
    position = jnp.arange(L, dtype=jnp.float32)[:, None]
    div_term = jnp.exp(jnp.arange(0, d_model, 2, dtype=jnp.float32)
                       * -(math.log(10000.0) / d_model))
    pe = jnp.zeros((L, d_model), jnp.float32)
    pe = pe.at[:, 0::2].set(jnp.sin(position * div_term))
    pe = pe.at[:, 1::2].set(jnp.cos(position * div_term))
    return pe


def series_decomp(x, low_f_num, high_f_num, is_label):
    # TODO(synk): FFT has no Pallas TPU primitive; rfft/irfft/top_k stay in jnp glue.
    x = jnp.transpose(x, (0, 2, 1))     # (B, N, L)
    B, N, L = x.shape
    t_fft = jnp.fft.rfft(x, axis=-1)
    F = t_fft.shape[-1]
    mask_low = jnp.ones_like(t_fft).at[:, :, low_f_num:].set(0)
    mask_high = jnp.ones_like(t_fft).at[:, :, :low_f_num].set(0)
    t_low = mask_low * t_fft
    t_high = mask_high * t_fft
    if not is_label:
        t_q = jnp.abs(t_high)
        _, idx = lax.top_k(t_q, high_f_num)
        flag = (jax.nn.one_hot(idx, F).sum(axis=-2) > 0).astype(jnp.float32)
        t_high = t_high * flag
    trend = jnp.transpose(jnp.fft.irfft(t_low, n=L, axis=-1), (0, 2, 1))
    seasonal = jnp.transpose(jnp.fft.irfft(t_high, n=L, axis=-1), (0, 2, 1))
    return trend, seasonal


def compute_KL(z, mean, log_var):
    # TODO(synk): log_Normal_standard/diag helpers not in source; standard VAE forms.
    log_p = jnp.sum(-0.5 * z ** 2, axis=1)
    log_q = jnp.sum(-0.5 * (log_var + (z - mean) ** 2 / jnp.exp(log_var)), axis=1)
    return jnp.mean(-(log_p - log_q))


def build_embed_feats(series, factor, onehot_l):
    # series: (B, TOT_LEN); circular conv1d(k=3) features + time marks + one-hot
    # position columns (the positional embedding is folded into the matmul).
    B, L = series.shape
    prev = jnp.roll(series, 1, axis=1)
    nxt = jnp.roll(series, -1, axis=1)
    cols = jnp.stack([prev, series, nxt], axis=-1).reshape(B * L, 3)
    return jnp.concatenate(
        [cols, factor.reshape(B * L, FREQ_DIM), onehot_l], axis=-1)   # (B*L, 3+4+L)


# ------------------------------- full forward -------------------------------
def model_forward(x, factor, y, KP, key):
    B = x.shape[0]
    kg_t, kg_s, kp_t, kp_s, km_t, km_s = jax.random.split(key, 6)
    mean_rep = jnp.repeat(jnp.mean(x, axis=1, keepdims=True), PRED_LEN, axis=1)
    zeros = jnp.zeros((B, PRED_LEN, x.shape[2]), jnp.float32)
    trend_x, seasonal_x = series_decomp(x, LOW_F, HIGH_F, is_label=False)
    trend_y, seasonal_y = series_decomp(y[..., None], LOW_F, HIGH_F, is_label=True)
    trend_y2 = trend_y[..., 0]            # (B, TOT_LEN)
    season_y2 = seasonal_y[..., 0]

    # -------- fused GRL encoder: 1 launch, grid over {trend, season} --------
    x2 = jnp.stack([trend_x[..., 0], seasonal_x[..., 0]])          # (2, B, SEQ_LEN)
    eps_grl = jnp.stack([
        jax.random.uniform(kg_t, (NUM_SAMPLES, B, EMB)).mean(0),
        jax.random.uniform(kg_s, (NUM_SAMPLES, B, EMB)).mean(0)])
    fea, mean_, logv, rec = grl_encode_call(x2, KP, eps_grl)
    t_fea, s_fea = fea[0], fea[1]
    # TODO(synk): fft_sim / trend_sim helpers not provided in source; omitted (0.0).
    elbo = (-jnp.mean((rec[0] - trend_y2) ** 2)
            - jnp.mean((rec[1] - season_y2) ** 2)
            - compute_KL(t_fea, mean_[0], logv[0])
            - compute_KL(s_fea, mean_[1], logv[1]))

    # -------- fused critic: all 4 evaluations in one launch --------
    perm_t = jax.random.permutation(kp_t, B)
    perm_s = jax.random.permutation(kp_s, B)
    Ystack = jnp.concatenate([trend_y2, trend_y2, season_y2, season_y2], axis=0)
    Zstack = jnp.concatenate([t_fea, t_fea[perm_t], s_fea, s_fea[perm_s]], axis=0)
    c = critic_call(Ystack, Zstack, KP["critic"])[:, 0]            # (4B,)
    ct_q, ct_s = c[:B], c[B:2 * B]
    cs_q, cs_s = c[2 * B:3 * B], c[3 * B:]
    point_t = lax.stop_gradient(1.0 / jnp.mean(jnp.exp(ct_s)))
    point_s = lax.stop_gradient(1.0 / jnp.mean(jnp.exp(cs_s)))
    mlbo = (jnp.mean(ct_q - point_t * jnp.exp(ct_s))
            + jnp.mean(cs_q - point_s * jnp.exp(cs_s)))
    loss_GRL = elbo + mlbo

    # -------- fused embedding + fc_hid: 1 launch, grid over {trend, season} --------
    # TODO(synk): Season_Encoder / Trend_Encoder classes not in source; identity.
    trend_full = jnp.concatenate([trend_x, mean_rep], axis=1)[..., 0]     # (B, TOT_LEN)
    season_full = jnp.concatenate([seasonal_x, zeros], axis=1)[..., 0]
    feats = jnp.stack([build_embed_feats(trend_full, factor, KP["onehot_l"]),
                       build_embed_feats(season_full, factor, KP["onehot_l"])])
    hid = embed_hid_call(feats, KP)                                 # (2, B*L, HID)

    # -------- fused mate-inference + output head: 1 launch --------
    # TODO(synk): get_clustering / divide_data helpers not provided; deterministic
    #             support/query split + round-robin clusters baked into mate_M/G.
    ysup = jnp.stack([trend_y2[:N_SUP].reshape(N_SUP * TOT_LEN, 1),
                      season_y2[:N_SUP].reshape(N_SUP * TOT_LEN, 1)])
    eps_mate = jnp.stack([
        jax.random.uniform(km_t, (NUM_SAMPLES, NUM_CLUSTER * TOT_LEN, EMB)).mean(0),
        jax.random.uniform(km_s, (NUM_SAMPLES, NUM_CLUSTER * TOT_LEN, EMB)).mean(0)])
    output = mate_head_call(hid, ysup, eps_mate, KP)                # (nq, PRED_LEN)

    query_y = trend_y2[N_SUP:] + season_y2[N_SUP:]
    label = query_y[:, SEQ_LEN:]
    return output, label, loss_GRL


# ---------------------------------- params ----------------------------------
def init_params(key):
    keys = iter(jax.random.split(key, 64))

    def lin(i, o, bias=True):
        k1, k2 = jax.random.split(next(keys))
        bnd = 1.0 / math.sqrt(i)
        w = jax.random.uniform(k1, (i, o), jnp.float32, -bnd, bnd)
        b = (jax.random.uniform(k2, (1, o), jnp.float32, -bnd, bnd)
             if bias else jnp.zeros((1, o), jnp.float32))
        return (w, b)

    def conv1d(k_size, out_c):   # in_channels = 1, stored as (k, C)
        k1, k2 = jax.random.split(next(keys))
        bnd = 1.0 / math.sqrt(k_size)
        return (jax.random.uniform(k1, (k_size, out_c), jnp.float32, -bnd, bnd),
                jax.random.uniform(k2, (1, out_c), jnp.float32, -bnd, bnd))

    def critic():
        wy, by = lin(TOT_LEN, EMB)
        e4 = EMB // 4
        k1, k2 = jax.random.split(next(keys))
        bnd = 1.0 / math.sqrt(2 * EMB)
        w1 = jax.random.uniform(k1, (2 * EMB, e4), jnp.float32, -bnd, bnd)
        b1 = jax.random.uniform(k2, (1, e4), jnp.float32, -bnd, bnd)
        w2, b2 = lin(e4, 1)
        return {"wy": wy, "by": by, "w1a": w1[:EMB], "w1b": w1[EMB:],
                "b1": b1, "w2": w2, "b2": b2}

    def embedding():
        conv_w = (jax.random.normal(next(keys), (3, EMB), jnp.float32)
                  * math.sqrt(2.0 / 3.0))
        temp_w, _ = lin(FREQ_DIM, EMB, bias=False)
        return {"conv_w": conv_w, "temp_w": temp_w,
                "pe": positional_embedding(TOT_LEN, EMB)}

    grl = {
        "t_conv_mean": conv1d(KSIZE, CONV_DIM), "t_conv_var": conv1d(KSIZE, CONV_DIM),
        "s_conv_mean": conv1d(KSIZE, CONV_DIM), "s_conv_var": conv1d(KSIZE, CONV_DIM),
        "t_fc_mean": lin(FC_DIM, EMB), "t_fc_var": lin(FC_DIM, EMB),
        "s_fc_mean": lin(FC_DIM, EMB), "s_fc_var": lin(FC_DIM, EMB),
        "t_fc_rec": lin(EMB, TOT_LEN), "s_fc_rec": lin(EMB, TOT_LEN),
        "critic": critic(),
    }
    return {
        "GRL": grl,
        "season_emb": embedding(),
        "trend_emb": embedding(),
        "fc_hid_season": lin(EMB, HID),
        "fc_hid_trend": lin(EMB, HID),
        "fc_season_mean": lin(2 * HID, EMB),
        "fc_season_var": lin(2 * HID, EMB),
        "fc_trend_mean": lin(2 * HID, EMB),
        "fc_trend_var": lin(2 * HID, EMB),
        "s_label_fc": lin(1, HID),
        "t_label_fc": lin(1, HID),
        "fc_output_1": lin(EMB + HID, 1),
        "fc_output_2": lin(TOT_LEN, PRED_LEN),
    }


def pack_params(P):
    """Precompute kernel-ready (fused / permuted / structural) matrices once."""
    KP = {}
    # ---- GRL encoder packing ----
    T = np.zeros((KSIZE, SEQ_LEN, LP), np.float32)         # Toeplitz placement
    for l in range(LP):
        for j in range(KSIZE):
            T[j, l + j, l] = 1.0
    Tj = jnp.asarray(T)
    # per-channel averaging projector for BatchNorm stats in (l*2C + c) layout
    proj = np.kron(np.ones((LP, LP), np.float32) / LP,
                   np.eye(2 * CONV_DIM, dtype=np.float32))
    KP["grl_proj"] = jnp.asarray(proj)

    def fc_perm(wfc, is_var):
        # torch flatten order (c*Lp + l)  ->  kernel conv layout (l*2C + c)
        w3 = wfc.reshape(CONV_DIM, LP, EMB).transpose(1, 0, 2)   # (LP, C, E)
        z = jnp.zeros_like(w3)
        stacked = jnp.concatenate([z, w3] if is_var else [w3, z], axis=1)
        return stacked.reshape(CW, EMB)

    def enc_pack(cm, cv, fm, fv):
        # conv biases omitted: BatchNorm removes the per-channel mean (they cancel).
        wstack = jnp.concatenate([cm[0], cv[0]], axis=1)          # (k, 2C)
        wtall = jnp.einsum("jil,jc->ilc", Tj, wstack).reshape(SEQ_LEN, CW)
        return wtall, fc_perm(fm[0], False), fm[1], fc_perm(fv[0], True), fv[1]

    g = P["GRL"]
    twt, twfm, tbfm, twfv, tbfv = enc_pack(g["t_conv_mean"], g["t_conv_var"],
                                           g["t_fc_mean"], g["t_fc_var"])
    swt, swfm, sbfm, swfv, sbfv = enc_pack(g["s_conv_mean"], g["s_conv_var"],
                                           g["s_fc_mean"], g["s_fc_var"])
    KP["grl_wtall"] = jnp.stack([twt, swt])
    KP["grl_wfm"] = jnp.stack([twfm, swfm])
    KP["grl_bfm"] = jnp.stack([tbfm, sbfm])
    KP["grl_wfv"] = jnp.stack([twfv, swfv])
    KP["grl_bfv"] = jnp.stack([tbfv, sbfv])
    KP["grl_wrec"] = jnp.stack([g["t_fc_rec"][0], g["s_fc_rec"][0]])
    KP["grl_brec"] = jnp.stack([g["t_fc_rec"][1], g["s_fc_rec"][1]])
    KP["critic"] = g["critic"]

    # ---- embedding packing (positional embedding folded via one-hot columns) ----
    def emb_pack(e):
        return jnp.concatenate([e["conv_w"], e["temp_w"], e["pe"]], axis=0)  # (3+4+L, E)
    KP["emb_waug"] = jnp.stack([emb_pack(P["trend_emb"]), emb_pack(P["season_emb"])])
    KP["emb_whid"] = jnp.stack([P["fc_hid_trend"][0], P["fc_hid_season"][0]])
    KP["emb_bhid"] = jnp.stack([P["fc_hid_trend"][1], P["fc_hid_season"][1]])
    KP["onehot_l"] = jnp.asarray(
        np.tile(np.eye(TOT_LEN, dtype=np.float32), (BATCH, 1)))              # (B*L, L)

    # ---- mate-inference packing ----
    KP["lab_w"] = jnp.stack([P["t_label_fc"][0], P["s_label_fc"][0]])        # (2,1,H)
    KP["lab_b"] = jnp.stack([P["t_label_fc"][1], P["s_label_fc"][1]])
    KP["mate_wmt"] = jnp.stack([P["fc_trend_mean"][0][:HID], P["fc_season_mean"][0][:HID]])
    KP["mate_wmb"] = jnp.stack([P["fc_trend_mean"][0][HID:], P["fc_season_mean"][0][HID:]])
    KP["mate_bm"] = jnp.stack([P["fc_trend_mean"][1], P["fc_season_mean"][1]])
    KP["mate_wvt"] = jnp.stack([P["fc_trend_var"][0][:HID], P["fc_season_var"][0][:HID]])
    KP["mate_wvb"] = jnp.stack([P["fc_trend_var"][0][HID:], P["fc_season_var"][0][HID:]])
    KP["mate_bv"] = jnp.stack([P["fc_trend_var"][1], P["fc_season_var"][1]])

    # static round-robin clusters (stand-in for external k-means get_clustering)
    s_cluster = np.arange(BATCH)[:N_SUP] % NUM_CLUSTER
    q_cluster = np.arange(BATCH)[N_SUP:] % NUM_CLUSTER
    A = np.zeros((NUM_CLUSTER, N_SUP), np.float32)
    for c in range(NUM_CLUSTER):
        idx = np.where(s_cluster == c)[0]
        A[c, idx] = 1.0 / max(len(idx), 1)
    Q = np.zeros((N_QRY, NUM_CLUSTER), np.float32)
    Q[np.arange(N_QRY), q_cluster] = 1.0
    eyeL = np.eye(TOT_LEN, dtype=np.float32)
    KP["mate_M"] = jnp.asarray(np.kron(A, eyeL))                  # (NC*L, n_s*L)
    KP["mate_G"] = jnp.asarray(np.kron(Q, eyeL))                  # (nq*L, NC*L)
    KP["mate_S"] = jnp.asarray(np.kron(np.eye(N_QRY, dtype=np.float32),
                                       np.ones((1, TOT_LEN), np.float32)))

    # ---- output head packing ----
    KP["out_w1h"] = P["fc_output_1"][0][:HID]                     # (H, 1)
    KP["out_w1a"] = P["fc_output_1"][0][HID:]                     # (E, 1)
    KP["out_b1"] = P["fc_output_1"][1]                            # (1, 1)
    KP["out_w2t"] = jnp.tile(P["fc_output_2"][0], (N_QRY, 1))     # (nq*L, PRED)
    KP["out_b2"] = P["fc_output_2"][1]                            # (1, PRED)
    return KP


# ----------------------------------- main -----------------------------------
if __name__ == "__main__":
    root = jax.random.PRNGKey(0)
    kp, kx, kf, ky, kfwd = jax.random.split(root, 5)
    params = init_params(kp)
    KP = pack_params(params)

    x = jax.random.normal(kx, (BATCH, SEQ_LEN, 1), jnp.float32)
    factor = jax.random.normal(kf, (BATCH, TOT_LEN, FREQ_DIM), jnp.float32)
    y = jax.random.normal(ky, (BATCH, TOT_LEN), jnp.float32)

    forward = jax.jit(model_forward)
    output, label, loss_grl = forward(x, factor, y, KP, kfwd)
    jax.block_until_ready((output, label, loss_grl))
    assert output.shape == (N_QRY, PRED_LEN)
    assert label.shape == output.shape
    assert bool(jnp.isfinite(loss_grl))
    print("KERNEL_OK")
</pallas_src>

<mosaic_0001>
module attributes {stable_mosaic.version = 11 : i64} {
  func.func @_embed_hid_kernel(%arg0: i32, %arg1: memref<1x192x31xf32, #tpu.memory_space<vmem>>, %arg2: memref<1x31x32xf32, #tpu.memory_space<vmem>>, %arg3: memref<1x32x16xf32, #tpu.memory_space<vmem>>, %arg4: memref<1x1x16xf32, #tpu.memory_space<vmem>>, %arg5: memref<1x192x16xf32, #tpu.memory_space<vmem>>) attributes {dimension_semantics = [#tpu.dimension_semantics<parallel>], iteration_bounds = array<i64: 2>, scalar_prefetch = 0 : i64, scratch_operands = 0 : i64, tpu.core_type = #tpu.core_type<tc>, window_params = [{transform_indices = @transform_0, window_bounds = array<i64: 1, 192, 31>}, {transform_indices = @transform_1, window_bounds = array<i64: 1, 31, 32>}, {transform_indices = @transform_2, window_bounds = array<i64: 1, 32, 16>}, {transform_indices = @transform_3, window_bounds = array<i64: 1, 1, 16>}, {transform_indices = @transform_4, window_bounds = array<i64: 1, 192, 16>}]} {
    %c0 = arith.constant 0 : index
    %c0_0 = arith.constant 0 : index
    %c0_1 = arith.constant 0 : index
    %0 = vector.load %arg1[%c0, %c0_0, %c0_1] : memref<1x192x31xf32, #tpu.memory_space<vmem>>, vector<1x192x31xf32>
    %1 = vector.shape_cast %0 : vector<1x192x31xf32> to vector<192x31xf32>
    %c0_2 = arith.constant 0 : index
    %c0_3 = arith.constant 0 : index
    %c0_4 = arith.constant 0 : index
    %2 = vector.load %arg2[%c0_2, %c0_3, %c0_4] : memref<1x31x32xf32, #tpu.memory_space<vmem>>, vector<1x31x32xf32>
    %3 = vector.shape_cast %2 : vector<1x31x32xf32> to vector<31x32xf32>
    %cst = arith.constant dense<0.000000e+00> : vector<192x32xf32>
    %4 = tpu.matmul %1, %3, %cst {dimension_numbers = #tpu.dot_dimension_numbers<[1], [0], [0], [1], [0, 0, 1, 1], [], []>} : vector<192x31xf32>, vector<31x32xf32>, vector<192x32xf32> -> vector<192x32xf32>
    %c0_5 = arith.constant 0 : index
    %c0_6 = arith.constant 0 : index
    %c0_7 = arith.constant 0 : index
    %5 = vector.load %arg3[%c0_5, %c0_6, %c0_7] : memref<1x32x16xf32, #tpu.memory_space<vmem>>, vector<1x32x16xf32>
    %6 = vector.shape_cast %5 : vector<1x32x16xf32> to vector<32x16xf32>
    %cst_8 = arith.constant dense<0.000000e+00> : vector<192x16xf32>
    %7 = tpu.matmul %4, %6, %cst_8 {dimension_numbers = #tpu.dot_dimension_numbers<[1], [0], [0], [1], [0, 0, 1, 1], [], []>} : vector<192x32xf32>, vector<32x16xf32>, vector<192x16xf32> -> vector<192x16xf32>
    %c0_9 = arith.constant 0 : index
    %c0_10 = arith.constant 0 : index
    %c0_11 = arith.constant 0 : index
    %8 = vector.load %arg4[%c0_9, %c0_10, %c0_11] : memref<1x1x16xf32, #tpu.memory_space<vmem>>, vector<1x1x16xf32>
    %9 = vector.shape_cast %8 : vector<1x1x16xf32> to vector<1x16xf32>
    %10 = vector.broadcast %9 : vector<1x16xf32> to vector<192x16xf32>
    %11 = arith.addf %7, %10 : vector<192x16xf32>
    %c0_12 = arith.constant 0 : index
    %c0_13 = arith.constant 0 : index
    %c0_14 = arith.constant 0 : index
    %12 = vector.load %arg5[%c0_12, %c0_13, %c0_14] : memref<1x192x16xf32, #tpu.memory_space<vmem>>, vector<1x192x16xf32>
    %13 = vector.shape_cast %12 : vector<1x192x16xf32> to vector<192x16xf32>
    %14 = vector.shape_cast %11 : vector<192x16xf32> to vector<1x192x16xf32>
    tpu.vector_store %arg5[%c0_12, %c0_13, %c0_14], %14 {strides = array<i32>} : memref<1x192x16xf32, #tpu.memory_space<vmem>>, vector<1x192x16xf32>,
    return
  }
  func.func @transform_0(%arg0: i32) -> (i32, i32, i32) {
    %c0_i32 = arith.constant 0 : i32
    %c0_i32_0 = arith.constant 0 : i32
    %c0_i32_1 = arith.constant 0 : i32
    return %arg0, %c0_i32, %c0_i32_0 : i32, i32, i32
  }
  func.func @transform_1(%arg0: i32) -> (i32, i32, i32) {
    %c0_i32 = arith.constant 0 : i32
    %c0_i32_0 = arith.constant 0 : i32
    %c0_i32_1 = arith.constant 0 : i32
    return %arg0, %c0_i32, %c0_i32_0 : i32, i32, i32
  }
  func.func @transform_2(%arg0: i32) -> (i32, i32, i32) {
    %c0_i32 = arith.constant 0 : i32
    %c0_i32_0 = arith.constant 0 : i32
    %c0_i32_1 = arith.constant 0 : i32
    return %arg0, %c0_i32, %c0_i32_0 : i32, i32, i32
  }
  func.func @transform_3(%arg0: i32) -> (i32, i32, i32) {
    %c0_i32 = arith.constant 0 : i32
    %c0_i32_0 = arith.constant 0 : i32
    %c0_i32_1 = arith.constant 0 : i32
    return %arg0, %c0_i32, %c0_i32_0 : i32, i32, i32
  }
  func.func @transform_4(%arg0: i32) -> (i32, i32, i32) {
    %c0_i32 = arith.constant 0 : i32
    %c0_i32_0 = arith.constant 0 : i32
    %c0_i32_1 = arith.constant 0 : i32
    return %arg0, %c0_i32, %c0_i32_0 : i32, i32, i32
  }
}

module attributes {stable_mosaic.version = 11 : i64} {
  func.func @_grl_kernel(%arg0: i32, %arg1: memref<1x8x16xf32, #tpu.memory_space<vmem>>, %arg2: memref<1x16x112xf32, #tpu.memory_space<vmem>>, %arg3: memref<112x112xf32, #tpu.memory_space<vmem>>, %arg4: memref<1x112x32xf32, #tpu.memory_space<vmem>>, %arg5: memref<1x1x32xf32, #tpu.memory_space<vmem>>, %arg6: memref<1x112x32xf32, #tpu.memory_space<vmem>>, %arg7: memref<1x1x32xf32, #tpu.memory_space<vmem>>, %arg8: memref<1x32x24xf32, #tpu.memory_space<vmem>>, %arg9: memref<1x1x24xf32, #tpu.memory_space<vmem>>, %arg10: memref<1x8x32xf32, #tpu.memory_space<vmem>>, %arg11: memref<1x8x32xf32, #tpu.memory_space<vmem>>, %arg12: memref<1x8x32xf32, #tpu.memory_space<vmem>>, %arg13: memref<1x8x32xf32, #tpu.memory_space<vmem>>, %arg14: memref<1x8x24xf32, #tpu.memory_space<vmem>>) attributes {dimension_semantics = [#tpu.dimension_semantics<parallel>], iteration_bounds = array<i64: 2>, scalar_prefetch = 0 : i64, scratch_operands = 0 : i64, tpu.core_type = #tpu.core_type<tc>, window_params = [{transform_indices = @transform_0, window_bounds = array<i64: 1, 8, 16>}, {transform_indices = @transform_1, window_bounds = array<i64: 1, 16, 112>}, {pipeline_mode = #tpu.pipeline_mode<synchronous>, transform_indices = @transform_2, window_bounds = array<i64: 112, 112>}, {transform_indices = @transform_3, window_bounds = array<i64: 1, 112, 32>}, {transform_indices = @transform_4, window_bounds = array<i64: 1, 1, 32>}, {transform_indices = @transform_5, window_bounds = array<i64: 1, 112, 32>}, {transform_indices = @transform_6, window_bounds = array<i64: 1, 1, 32>}, {transform_indices = @transform_7, window_bounds = array<i64: 1, 32, 24>}, {transform_indices = @transform_8, window_bounds = array<i64: 1, 1, 24>}, {transform_indices = @transform_9, window_bounds = array<i64: 1, 8, 32>}, {transform_indices = @transform_10, window_bounds = array<i64: 1, 8, 32>}, {transform_indices = @transform_11, window_bounds = array<i64: 1, 8, 32>}, {transform_indices = @transform_12, window_bounds = array<i64: 1, 8, 32>}, {transform_indices = @transform_13, window_bounds = array<i64: 1, 8, 24>}]} {
    %c0 = arith.constant 0 : index
    %c0_0 = arith.constant 0 : index
    %c0_1 = arith.constant 0 : index
    %0 = vector.load %arg1[%c0, %c0_0, %c0_1] : memref<1x8x16xf32, #tpu.memory_space<vmem>>, vector<1x8x16xf32>
    %1 = vector.shape_cast %0 : vector<1x8x16xf32> to vector<8x16xf32>
    %c0_2 = arith.constant 0 : index
    %c0_3 = arith.constant 0 : index
    %c0_4 = arith.constant 0 : index
    %2 = vector.load %arg2[%c0_2, %c0_3, %c0_4] : memref<1x16x112xf32, #tpu.memory_space<vmem>>, vector<1x16x112xf32>
    %3 = vector.shape_cast %2 : vector<1x16x112xf32> to vector<16x112xf32>
    %cst = arith.constant dense<0.000000e+00> : vector<8x112xf32>
    %4 = tpu.matmul %1, %3, %cst {dimension_numbers = #tpu.dot_dimension_numbers<[1], [0], [0], [1], [0, 0, 1, 1], [], []>} : vector<8x16xf32>, vector<16x112xf32>, vector<8x112xf32> -> vector<8x112xf32>
    %cst_5 = arith.constant dense<0.000000e+00> : vector<112xf32>
    %5 = vector.multi_reduction <add>, %4, %cst_5 [0] : vector<8x112xf32> to vector<112xf32>
    %6 = vector.shape_cast %5 : vector<112xf32> to vector<1x112xf32>
    %cst_6 = arith.constant 8.000000e+00 : f32
    %7 = vector.broadcast %cst_6 : f32 to vector<1x112xf32>
    %8 = arith.divf %6, %7 : vector<1x112xf32>
    %9 = arith.mulf %4, %4 : vector<8x112xf32>
    %cst_7 = arith.constant dense<0.000000e+00> : vector<112xf32>
    %10 = vector.multi_reduction <add>, %9, %cst_7 [0] : vector<8x112xf32> to vector<112xf32>
    %11 = vector.shape_cast %10 : vector<112xf32> to vector<1x112xf32>
    %cst_8 = arith.constant 8.000000e+00 : f32
    %12 = vector.broadcast %cst_8 : f32 to vector<1x112xf32>
    %13 = arith.divf %11, %12 : vector<1x112xf32>
    %c0_9 = arith.constant 0 : index
    %c0_10 = arith.constant 0 : index
    %14 = vector.load %arg3[%c0_9, %c0_10] : memref<112x112xf32, #tpu.memory_space<vmem>>, vector<112x112xf32>
    %cst_11 = arith.constant dense<0.000000e+00> : vector<1x112xf32>
    %15 = tpu.matmul %8, %14, %cst_11 {dimension_numbers = #tpu.dot_dimension_numbers<[1], [0], [0], [1], [0, 0, 1, 1], [], []>} : vector<1x112xf32>, vector<112x112xf32>, vector<1x112xf32> -> vector<1x112xf32>
    %c0_12 = arith.constant 0 : index
    %c0_13 = arith.constant 0 : index
    %16 = vector.load %arg3[%c0_12, %c0_13] : memref<112x112xf32, #tpu.memory_space<vmem>>, vector<112x112xf32>
    %cst_14 = arith.constant dense<0.000000e+00> : vector<1x112xf32>
    %17 = tpu.matmul %13, %16, %cst_14 {dimension_numbers = #tpu.dot_dimension_numbers<[1], [0], [0], [1], [0, 0, 1, 1], [], []>} : vector<1x112xf32>, vector<112x112xf32>, vector<1x112xf32> -> vector<1x112xf32>
    %18 = vector.broadcast %15 : vector<1x112xf32> to vector<8x112xf32>
    %19 = arith.subf %4, %18 : vector<8x112xf32>
    %20 = arith.mulf %15, %15 : vector<1x112xf32>
    %21 = arith.subf %17, %20 : vector<1x112xf32>
    %cst_15 = arith.constant 9.99999974E-6 : f32
    %22 = vector.broadcast %cst_15 : f32 to vector<1x112xf32>
    %23 = arith.addf %21, %22 : vector<1x112xf32>
    %24 = math.rsqrt %23 : vector<1x112xf32>
    %25 = vector.broadcast %24 : vector<1x112xf32> to vector<8x112xf32>
    %26 = arith.mulf %19, %25 : vector<8x112xf32>
    %c0_16 = arith.constant 0 : index
    %c0_17 = arith.constant 0 : index
    %c0_18 = arith.constant 0 : index
    %27 = vector.load %arg4[%c0_16, %c0_17, %c0_18] : memref<1x112x32xf32, #tpu.memory_space<vmem>>, vector<1x112x32xf32>
    %28 = vector.shape_cast %27 : vector<1x112x32xf32> to vector<112x32xf32>
    %cst_19 = arith.constant dense<0.000000e+00> : vector<8x32xf32>
    %29 = tpu.matmul %26, %28, %cst_19 {dimension_numbers = #tpu.dot_dimension_numbers<[1], [0], [0], [1], [0, 0, 1, 1], [], []>} : vector<8x112xf32>, vector<112x32xf32>, vector<8x32xf32> -> vector<8x32xf32>
    %c0_20 = arith.constant 0 : index
    %c0_21 = arith.constant 0 : index
    %c0_22 = arith.constant 0 : index
    %30 = vector.load %arg5[%c0_20, %c0_21, %c0_22] : memref<1x1x32xf32, #tpu.memory_space<vmem>>, vector<1x1x32xf32>
    %31 = vector.shape_cast %30 : vector<1x1x32xf32> to vector<1x32xf32>
    %32 = vector.broadcast %31 : vector<1x32xf32> to vector<8x32xf32>
    %33 = arith.addf %29, %32 : vector<8x32xf32>
    %c0_23 = arith.constant 0 : index
    %c0_24 = arith.constant 0 : index
    %c0_25 = arith.constant 0 : index
    %34 = vector.load %arg6[%c0_23, %c0_24, %c0_25] : memref<1x112x32xf32, #tpu.memory_space<vmem>>, vector<1x112x32xf32>
    %35 = vector.shape_cast %34 : vector<1x112x32xf32> to vector<112x32xf32>
    %cst_26 = arith.constant dense<0.000000e+00> : vector<8x32xf32>
    %36 = tpu.matmul %26, %35, %cst_26 {dimension_numbers = #tpu.dot_dimension_numbers<[1], [0], [0], [1], [0, 0, 1, 1], [], []>} : vector<8x112xf32>, vector<112x32xf32>, vector<8x32xf32> -> vector<8x32xf32>
    %c0_27 = arith.constant 0 : index
    %c0_28 = arith.constant 0 : index
    %c0_29 = arith.constant 0 : index
    %37 = vector.load %arg7[%c0_27, %c0_28, %c0_29] : memref<1x1x32xf32, #tpu.memory_space<vmem>>, vector<1x1x32xf32>
    %38 = vector.shape_cast %37 : vector<1x1x32xf32> to vector<1x32xf32>
    %39 = vector.broadcast %38 : vector<1x32xf32> to vector<8x32xf32>
    %40 = arith.addf %36, %39 : vector<8x32xf32>
    %cst_30 = arith.constant 0.000000e+00 : f32
    %41 = vector.broadcast %cst_30 : f32 to vector<8x32xf32>
    %42 = arith.maximumf %40, %41 : vector<8x32xf32>
    %43 = math.absf %40 : vector<8x32xf32>
    %cst_31 = arith.constant 0.000000e+00 : f32
    %44 = vector.broadcast %cst_31 : f32 to vector<8x32xf32>
    %45 = arith.subf %44, %43 : vector<8x32xf32>
    %46 = math.exp %45 : vector<8x32xf32>
    %47 = math.log1p %46 : vector<8x32xf32>
    %48 = arith.addf %42, %47 : vector<8x32xf32>
    %c0_32 = arith.constant 0 : index
    %c0_33 = arith.constant 0 : index
    %c0_34 = arith.constant 0 : index
    %49 = vector.load %arg10[%c0_32, %c0_33, %c0_34] : memref<1x8x32xf32, #tpu.memory_space<vmem>>, vector<1x8x32xf32>
    %50 = vector.shape_cast %49 : vector<1x8x32xf32> to vector<8x32xf32>
    %51 = math.exp %48 : vector<8x32xf32>
    %52 = math.sqrt %51 : vector<8x32xf32>
    %53 = arith.mulf %50, %52 : vector<8x32xf32>
    %54 = arith.addf %33, %53 : vector<8x32xf32>
    %c0_35 = arith.constant 0 : index
    %c0_36 = arith.constant 0 : index
    %c0_37 = arith.constant 0 : index
    %55 = vector.load %arg8[%c0_35, %c0_36, %c0_37] : memref<1x32x24xf32, #tpu.memory_space<vmem>>, vector<1x32x24xf32>
    %56 = vector.shape_cast %55 : vector<1x32x24xf32> to vector<32x24xf32>
    %cst_38 = arith.constant dense<0.000000e+00> : vector<8x24xf32>
    %57 = tpu.matmul %54, %56, %cst_38 {dimension_numbers = #tpu.dot_dimension_numbers<[1], [0], [0], [1], [0, 0, 1, 1], [], []>} : vector<8x32xf32>, vector<32x24xf32>, vector<8x24xf32> -> vector<8x24xf32>
    %c0_39 = arith.constant 0 : index
    %c0_40 = arith.constant 0 : index
    %c0_41 = arith.constant 0 : index
    %58 = vector.load %arg9[%c0_39, %c0_40, %c0_41] : memref<1x1x24xf32, #tpu.memory_space<vmem>>, vector<1x1x24xf32>
    %59 = vector.shape_cast %58 : vector<1x1x24xf32> to vector<1x24xf32>
    %60 = vector.broadcast %59 : vector<1x24xf32> to vector<8x24xf32>
    %61 = arith.addf %57, %60 : vector<8x24xf32>
    %c0_42 = arith.constant 0 : index
    %c0_43 = arith.constant 0 : index
    %c0_44 = arith.constant 0 : index
    %62 = vector.load %arg11[%c0_42, %c0_43, %c0_44] : memref<1x8x32xf32, #tpu.memory_space<vmem>>, vector<1x8x32xf32>
    %63 = vector.shape_cast %62 : vector<1x8x32xf32> to vector<8x32xf32>
    %64 = vector.shape_cast %54 : vector<8x32xf32> to vector<1x8x32xf32>
    tpu.vector_store %arg11[%c0_42, %c0_43, %c0_44], %64 {strides = array<i32>} : memref<1x8x32xf32, #tpu.memory_space<vmem>>, vector<1x8x32xf32>,
    %c0_45 = arith.constant 0 : index
    %c0_46 = arith.constant 0 : index
    %c0_47 = arith.constant 0 : index
    %65 = vector.load %arg12[%c0_45, %c0_46, %c0_47] : memref<1x8x32xf32, #tpu.memory_space<vmem>>, vector<1x8x32xf32>
    %66 = vector.shape_cast %65 : vector<1x8x32xf32> to vector<8x32xf32>
    %67 = vector.shape_cast %33 : vector<8x32xf32> to vector<1x8x32xf32>
    tpu.vector_store %arg12[%c0_45, %c0_46, %c0_47], %67 {strides = array<i32>} : memref<1x8x32xf32, #tpu.memory_space<vmem>>, vector<1x8x32xf32>,
    %c0_48 = arith.constant 0 : index
    %c0_49 = arith.constant 0 : index
    %c0_50 = arith.constant 0 : index
    %68 = vector.load %arg13[%c0_48, %c0_49, %c0_50] : memref<1x8x32xf32, #tpu.memory_space<vmem>>, vector<1x8x32xf32>
    %69 = vector.shape_cast %68 : vector<1x8x32xf32> to vector<8x32xf32>
    %70 = vector.shape_cast %48 : vector<8x32xf32> to vector<1x8x32xf32>
    tpu.vector_store %arg13[%c0_48, %c0_49, %c0_50], %70 {strides = array<i32>} : memref<1x8x32xf32, #tpu.memory_space<vmem>>, vector<1x8x32xf32>,
    %c0_51 = arith.constant 0 : index
    %c0_52 = arith.constant 0 : index
    %c0_53 = arith.constant 0 : index
    %71 = vector.load %arg14[%c0_51, %c0_52, %c0_53] : memref<1x8x24xf32, #tpu.memory_space<vmem>>, vector<1x8x24xf32>
    %72 = vector.shape_cast %71 : vector<1x8x24xf32> to vector<8x24xf32>
    %73 = vector.shape_cast %61 : vector<8x24xf32> to vector<1x8x24xf32>
    tpu.vector_store %arg14[%c0_51, %c0_52, %c0_53], %73 {strides = array<i32>} : memref<1x8x24xf32, #tpu.memory_space<vmem>>, vector<1x8x24xf32>,
    return
  }
  func.func @transform_0(%arg0: i32) -> (i32, i32, i32) {
    %c0_i32 = arith.constant 0 : i32
    %c0_i32_0 = arith.constant 0 : i32
    %c0_i32_1 = arith.constant 0 : i32
    return %arg0, %c0_i32, %c0_i32_0 : i32, i32, i32
  }
  func.func @transform_1(%arg0: i32) -> (i32, i32, i32) {
    %c0_i32 = arith.constant 0 : i32
    %c0_i32_0 = arith.constant 0 : i32
    %c0_i32_1 = arith.constant 0 : i32
    return %arg0, %c0_i32, %c0_i32_0 : i32, i32, i32
  }
  func.func @transform_2(%arg0: i32) -> (i32, i32) {
    %c0_i32 = arith.constant 0 : i32
    %c0_i32_0 = arith.constant 0 : i32
    %c0_i32_1 = arith.constant 0 : i32
    return %c0_i32, %c0_i32_0 : i32, i32
  }
  func.func @transform_3(%arg0: i32) -> (i32, i32, i32) {
    %c0_i32 = arith.constant 0 : i32
    %c0_i32_0 = arith.constant 0 : i32
    %c0_i32_1 = arith.constant 0 : i32
    return %arg0, %c0_i32, %c0_i32_0 : i32, i32, i32
  }
  func.func @transform_4(%arg0: i32) -> (i32, i32, i32) {
    %c0_i32 = arith.constant 0 : i32
    %c0_i32_0 = arith.constant 0 : i32
    %c0_i32_1 = arith.constant 0 : i32
    return %arg0, %c0_i32, %c0_i32_0 : i32, i32, i32
  }
  func.func @transform_5(%arg0: i32) -> (i32, i32, i32) {
    %c0_i32 = arith.constant 0 : i32
    %c0_i32_0 = arith.constant 0 : i32
    %c0_i32_1 = arith.constant 0 : i32
    return %arg0, %c0_i32, %c0_i32_0 : i32, i32, i32
  }
  func.func @transform_6(%arg0: i32) -> (i32, i32, i32) {
    %c0_i32 = arith.constant 0 : i32
    %c0_i32_0 = arith.constant 0 : i32
    %c0_i32_1 = arith.constant 0 : i32
    return %arg0, %c0_i32, %c0_i32_0 : i32, i32, i32
  }
  func.func @transform_7(%arg0: i32) -> (i32, i32, i32) {
    %c0_i32 = arith.constant 0 : i32
    %c0_i32_0 = arith.constant 0 : i32
    %c0_i32_1 = arith.constant 0 : i32
    return %arg0, %c0_i32, %c0_i32_0 : i32, i32, i32
  }
  func.func @transform_8(%arg0: i32) -> (i32, i32, i32) {
    %c0_i32 = arith.constant 0 : i32
    %c0_i32_0 = arith.constant 0 : i32
    %c0_i32_1 = arith.constant 0 : i32
    return %arg0, %c0_i32, %c0_i32_0 : i32, i32, i32
  }
  func.func @transform_9(%arg0: i32) -> (i32, i32, i32) {
    %c0_i32 = arith.constant 0 : i32
    %c0_i32_0 = arith.constant 0 : i32
    %c0_i32_1 = arith.constant 0 : i32
    return %arg0, %c0_i32, %c0_i32_0 : i32, i32, i32
  }
  func.func @transform_10(%arg0: i32) -> (i32, i32, i32) {
    %c0_i32 = arith.constant 0 : i32
    %c0_i32_0 = arith.constant 0 : i32
    %c0_i32_1 = arith.constant 0 : i32
    return %arg0, %c0_i32, %c0_i32_0 : i32, i32, i32
  }
  func.func @transform_11(%arg0: i32) -> (i32, i32, i32) {
    %c0_i32 = arith.constant 0 : i32
    %c0_i32_0 = arith.constant 0 : i32
    %c0_i32_1 = arith.constant 0 : i32
    return %arg0, %c0_i32, %c0_i32_0 : i32, i32, i32
  }
  func.func @transform_12(%arg0: i32) -> (i32, i32, i32) {
    %c0_i32 = arith.constant 0 : i32
    %c0_i32_0 = arith.constant 0 : i32
    %c0_i32_1 = arith.constant 0 : i32
    return %arg0, %c0_i32, %c0_i32_0 : i32, i32, i32
  }
  func.func @transform_13(%arg0: i32) -> (i32, i32, i32) {
    %c0_i32 = arith.constant 0 : i32
    %c0_i32_0 = arith.constant 0 : i32
    %c0_i32_1 = arith.constant 0 : i32
    return %arg0, %c0_i32, %c0_i32_0 : i32, i32, i32
  }
}

module attributes {stable_mosaic.version = 11 : i64} {
  func.func @_mate_head_kernel(%arg0: memref<2x192x16xf32, #tpu.memory_space<vmem>>, %arg1: memref<2x96x1xf32, #tpu.memory_space<vmem>>, %arg2: memref<2x1x16xf32, #tpu.memory_space<vmem>>, %arg3: memref<2x1x16xf32, #tpu.memory_space<vmem>>, %arg4: memref<2x16x32xf32, #tpu.memory_space<vmem>>, %arg5: memref<2x16x32xf32, #tpu.memory_space<vmem>>, %arg6: memref<2x16x32xf32, #tpu.memory_space<vmem>>, %arg7: memref<2x16x32xf32, #tpu.memory_space<vmem>>, %arg8: memref<2x1x32xf32, #tpu.memory_space<vmem>>, %arg9: memref<2x1x32xf32, #tpu.memory_space<vmem>>, %arg10: memref<2x48x32xf32, #tpu.memory_space<vmem>>, %arg11: memref<48x96xf32, #tpu.memory_space<vmem>>, %arg12: memref<96x48xf32, #tpu.memory_space<vmem>>, %arg13: memref<4x96xf32, #tpu.memory_space<vmem>>, %arg14: memref<16x1xf32, #tpu.memory_space<vmem>>, %arg15: memref<32x1xf32, #tpu.memory_space<vmem>>, %arg16: memref<1x1xf32, #tpu.memory_space<vmem>>, %arg17: memref<96x8xf32, #tpu.memory_space<vmem>>, %arg18: memref<1x8xf32, #tpu.memory_space<vmem>>, %arg19: memref<4x8xf32, #tpu.memory_space<vmem>>) attributes {dimension_semantics = [], scalar_prefetch = 0 : i64, scratch_operands = 0 : i64, tpu.core_type = #tpu.core_type<tc>} {
    %cst = arith.constant 0.000000e+00 : f32
    %0 = vector.broadcast %cst : f32 to vector<96x16xf32>
    %cst_0 = arith.constant 0.000000e+00 : f32
    %1 = vector.broadcast %cst_0 : f32 to vector<96x32xf32>
    %c0 = arith.constant 0 : index
    %c0_1 = arith.constant 0 : index
    %c0_2 = arith.constant 0 : index
    %2 = vector.load %arg0[%c0, %c0_1, %c0_2] : memref<2x192x16xf32, #tpu.memory_space<vmem>>, vector<1x192x16xf32>
    %3 = vector.shape_cast %2 : vector<1x192x16xf32> to vector<192x16xf32>
    %4 = vector.extract_strided_slice %3 {offsets = [0, 0], sizes = [96, 16], strides = [1, 1]} : vector<192x16xf32> to vector<96x16xf32>
    %5 = vector.extract_strided_slice %3 {offsets = [96, 0], sizes = [96, 16], strides = [1, 1]} : vector<192x16xf32> to vector<96x16xf32>
    %c0_3 = arith.constant 0 : index
    %c0_4 = arith.constant 0 : index
    %c0_5 = arith.constant 0 : index
    %6 = vector.load %arg1[%c0_3, %c0_4, %c0_5] : memref<2x96x1xf32, #tpu.memory_space<vmem>>, vector<1x96x1xf32>
    %7 = vector.shape_cast %6 : vector<1x96x1xf32> to vector<96x1xf32>
    %c0_6 = arith.constant 0 : index
    %c0_7 = arith.constant 0 : index
    %c0_8 = arith.constant 0 : index
    %8 = vector.load %arg2[%c0_6, %c0_7, %c0_8] : memref<2x1x16xf32, #tpu.memory_space<vmem>>, vector<1x1x16xf32>
    %9 = vector.shape_cast %8 : vector<1x1x16xf32> to vector<1x16xf32>
    %10 = vector.broadcast %7 : vector<96x1xf32> to vector<96x16xf32>
    %11 = vector.broadcast %9 : vector<1x16xf32> to vector<96x16xf32>
    %12 = arith.mulf %10, %11 : vector<96x16xf32>
    %c0_9 = arith.constant 0 : index
    %c0_10 = arith.constant 0 : index
    %c0_11 = arith.constant 0 : index
    %13 = vector.load %arg3[%c0_9, %c0_10, %c0_11] : memref<2x1x16xf32, #tpu.memory_space<vmem>>, vector<1x1x16xf32>
    %14 = vector.shape_cast %13 : vector<1x1x16xf32> to vector<1x16xf32>
    %15 = vector.broadcast %14 : vector<1x16xf32> to vector<96x16xf32>
    %16 = arith.addf %12, %15 : vector<96x16xf32>
    %c0_12 = arith.constant 0 : index
    %c0_13 = arith.constant 0 : index
    %17 = vector.load %arg11[%c0_12, %c0_13] : memref<48x96xf32, #tpu.memory_space<vmem>>, vector<48x96xf32>
    %cst_14 = arith.constant dense<0.000000e+00> : vector<48x16xf32>
    %18 = tpu.matmul %17, %4, %cst_14 {dimension_numbers = #tpu.dot_dimension_numbers<[1], [0], [0], [1], [0, 0, 1, 1], [], []>} : vector<48x96xf32>, vector<96x16xf32>, vector<48x16xf32> -> vector<48x16xf32>
    %c0_15 = arith.constant 0 : index
    %c0_16 = arith.constant 0 : index
    %19 = vector.load %arg11[%c0_15, %c0_16] : memref<48x96xf32, #tpu.memory_space<vmem>>, vector<48x96xf32>
    %cst_17 = arith.constant dense<0.000000e+00> : vector<48x16xf32>
    %20 = tpu.matmul %19, %16, %cst_17 {dimension_numbers = #tpu.dot_dimension_numbers<[1], [0], [0], [1], [0, 0, 1, 1], [], []>} : vector<48x96xf32>, vector<96x16xf32>, vector<48x16xf32> -> vector<48x16xf32>
    %c0_18 = arith.constant 0 : index
    %c0_19 = arith.constant 0 : index
    %c0_20 = arith.constant 0 : index
    %21 = vector.load %arg4[%c0_18, %c0_19, %c0_20] : memref<2x16x32xf32, #tpu.memory_space<vmem>>, vector<1x16x32xf32>
    %22 = vector.shape_cast %21 : vector<1x16x32xf32> to vector<16x32xf32>
    %cst_21 = arith.constant dense<0.000000e+00> : vector<48x32xf32>
    %23 = tpu.matmul %18, %22, %cst_21 {dimension_numbers = #tpu.dot_dimension_numbers<[1], [0], [0], [1], [0, 0, 1, 1], [], []>} : vector<48x16xf32>, vector<16x32xf32>, vector<48x32xf32> -> vector<48x32xf32>
    %c0_22 = arith.constant 0 : index
    %c0_23 = arith.constant 0 : index
    %c0_24 = arith.constant 0 : index
    %24 = vector.load %arg5[%c0_22, %c0_23, %c0_24] : memref<2x16x32xf32, #tpu.memory_space<vmem>>, vector<1x16x32xf32>
    %25 = vector.shape_cast %24 : vector<1x16x32xf32> to vector<16x32xf32>
    %cst_25 = arith.constant dense<0.000000e+00> : vector<48x32xf32>
    %26 = tpu.matmul %20, %25, %cst_25 {dimension_numbers = #tpu.dot_dimension_numbers<[1], [0], [0], [1], [0, 0, 1, 1], [], []>} : vector<48x16xf32>, vector<16x32xf32>, vector<48x32xf32> -> vector<48x32xf32>
    %27 = arith.addf %23, %26 : vector<48x32xf32>
    %c0_26 = arith.constant 0 : index
    %c0_27 = arith.constant 0 : index
    %c0_28 = arith.constant 0 : index
    %28 = vector.load %arg8[%c0_26, %c0_27, %c0_28] : memref<2x1x32xf32, #tpu.memory_space<vmem>>, vector<1x1x32xf32>
    %29 = vector.shape_cast %28 : vector<1x1x32xf32> to vector<1x32xf32>
    %30 = vector.broadcast %29 : vector<1x32xf32> to vector<48x32xf32>
    %31 = arith.addf %27, %30 : vector<48x32xf32>
    %c0_29 = arith.constant 0 : index
    %c0_30 = arith.constant 0 : index
    %c0_31 = arith.constant 0 : index
    %32 = vector.load %arg6[%c0_29, %c0_30, %c0_31] : memref<2x16x32xf32, #tpu.memory_space<vmem>>, vector<1x16x32xf32>
    %33 = vector.shape_cast %32 : vector<1x16x32xf32> to vector<16x32xf32>
    %cst_32 = arith.constant dense<0.000000e+00> : vector<48x32xf32>
    %34 = tpu.matmul %18, %33, %cst_32 {dimension_numbers = #tpu.dot_dimension_numbers<[1], [0], [0], [1], [0, 0, 1, 1], [], []>} : vector<48x16xf32>, vector<16x32xf32>, vector<48x32xf32> -> vector<48x32xf32>
    %c0_33 = arith.constant 0 : index
    %c0_34 = arith.constant 0 : index
    %c0_35 = arith.constant 0 : index
    %35 = vector.load %arg7[%c0_33, %c0_34, %c0_35] : memref<2x16x32xf32, #tpu.memory_space<vmem>>, vector<1x16x32xf32>
    %36 = vector.shape_cast %35 : vector<1x16x32xf32> to vector<16x32xf32>
    %cst_36 = arith.constant dense<0.000000e+00> : vector<48x32xf32>
    %37 = tpu.matmul %20, %36, %cst_36 {dimension_numbers = #tpu.dot_dimension_numbers<[1], [0], [0], [1], [0, 0, 1, 1], [], []>} : vector<48x16xf32>, vector<16x32xf32>, vector<48x32xf32> -> vector<48x32xf32>
    %38 = arith.addf %34, %37 : vector<48x32xf32>
    %c0_37 = arith.constant 0 : index
    %c0_38 = arith.constant 0 : index
    %c0_39 = arith.constant 0 : index
    %39 = vector.load %arg9[%c0_37, %c0_38, %c0_39] : memref<2x1x32xf32, #tpu.memory_space<vmem>>, vector<1x1x32xf32>
    %40 = vector.shape_cast %39 : vector<1x1x32xf32> to vector<1x32xf32>
    %41 = vector.broadcast %40 : vector<1x32xf32> to vector<48x32xf32>
    %42 = arith.addf %38, %41 : vector<48x32xf32>
    %c0_40 = arith.constant 0 : index
    %c0_41 = arith.constant 0 : index
    %c0_42 = arith.constant 0 : index
    %43 = vector.load %arg10[%c0_40, %c0_41, %c0_42] : memref<2x48x32xf32, #tpu.memory_space<vmem>>, vector<1x48x32xf32>
    %44 = vector.shape_cast %43 : vector<1x48x32xf32> to vector<48x32xf32>
    %45 = math.exp %42 : vector<48x32xf32>
    %46 = math.sqrt %45 : vector<48x32xf32>
    %47 = arith.mulf %44, %46 : vector<48x32xf32>
    %48 = arith.addf %31, %47 : vector<48x32xf32>
    %49 = arith.addf %0, %5 : vector<96x16xf32>
    %c0_43 = arith.constant 0 : index
    %c0_44 = arith.constant 0 : index
    %50 = vector.load %arg12[%c0_43, %c0_44] : memref<96x48xf32, #tpu.memory_space<vmem>>, vector<96x48xf32>
    %cst_45 = arith.constant dense<0.000000e+00> : vector<96x32xf32>
    %51 = tpu.matmul %50, %48, %cst_45 {dimension_numbers = #tpu.dot_dimension_numbers<[1], [0], [0], [1], [0, 0, 1, 1], [], []>} : vector<96x48xf32>, vector<48x32xf32>, vector<96x32xf32> -> vector<96x32xf32>
    %52 = arith.addf %1, %51 : vector<96x32xf32>
    %c1 = arith.constant 1 : index
    %c0_46 = arith.constant 0 : index
    %c0_47 = arith.constant 0 : index
    %53 = vector.load %arg0[%c1, %c0_46, %c0_47] : memref<2x192x16xf32, #tpu.memory_space<vmem>>, vector<1x192x16xf32>
    %54 = vector.shape_cast %53 : vector<1x192x16xf32> to vector<192x16xf32>
    %55 = vector.extract_strided_slice %54 {offsets = [0, 0], sizes = [96, 16], strides = [1, 1]} : vector<192x16xf32> to vector<96x16xf32>
    %56 = vector.extract_strided_slice %54 {offsets = [96, 0], sizes = [96, 16], strides = [1, 1]} : vector<192x16xf32> to vector<96x16xf32>
    %c1_48 = arith.constant 1 : index
    %c0_49 = arith.constant 0 : index
    %c0_50 = arith.constant 0 : index
    %57 = vector.load %arg1[%c1_48, %c0_49, %c0_50] : memref<2x96x1xf32, #tpu.memory_space<vmem>>, vector<1x96x1xf32>
    %58 = vector.shape_cast %57 : vector<1x96x1xf32> to vector<96x1xf32>
    %c1_51 = arith.constant 1 : index
    %c0_52 = arith.constant 0 : index
    %c0_53 = arith.constant 0 : index
    %59 = vector.load %arg2[%c1_51, %c0_52, %c0_53] : memref<2x1x16xf32, #tpu.memory_space<vmem>>, vector<1x1x16xf32>
    %60 = vector.shape_cast %59 : vector<1x1x16xf32> to vector<1x16xf32>
    %61 = vector.broadcast %58 : vector<96x1xf32> to vector<96x16xf32>
    %62 = vector.broadcast %60 : vector<1x16xf32> to vector<96x16xf32>
    %63 = arith.mulf %61, %62 : vector<96x16xf32>
    %c1_54 = arith.constant 1 : index
    %c0_55 = arith.constant 0 : index
    %c0_56 = arith.constant 0 : index
    %64 = vector.load %arg3[%c1_54, %c0_55, %c0_56] : memref<2x1x16xf32, #tpu.memory_space<vmem>>, vector<1x1x16xf32>
    %65 = vector.shape_cast %64 : vector<1x1x16xf32> to vector<1x16xf32>
    %66 = vector.broadcast %65 : vector<1x16xf32> to vector<96x16xf32>
    %67 = arith.addf %63, %66 : vector<96x16xf32>
    %c0_57 = arith.constant 0 : index
    %c0_58 = arith.constant 0 : index
    %68 = vector.load %arg11[%c0_57, %c0_58] : memref<48x96xf32, #tpu.memory_space<vmem>>, vector<48x96xf32>
    %cst_59 = arith.constant dense<0.000000e+00> : vector<48x16xf32>
    %69 = tpu.matmul %68, %55, %cst_59 {dimension_numbers = #tpu.dot_dimension_numbers<[1], [0], [0], [1], [0, 0, 1, 1], [], []>} : vector<48x96xf32>, vector<96x16xf32>, vector<48x16xf32> -> vector<48x16xf32>
    %c0_60 = arith.constant 0 : index
    %c0_61 = arith.constant 0 : index
    %70 = vector.load %arg11[%c0_60, %c0_61] : memref<48x96xf32, #tpu.memory_space<vmem>>, vector<48x96xf32>
    %cst_62 = arith.constant dense<0.000000e+00> : vector<48x16xf32>
    %71 = tpu.matmul %70, %67, %cst_62 {dimension_numbers = #tpu.dot_dimension_numbers<[1], [0], [0], [1], [0, 0, 1, 1], [], []>} : vector<48x96xf32>, vector<96x16xf32>, vector<48x16xf32> -> vector<48x16xf32>
    %c1_63 = arith.constant 1 : index
    %c0_64 = arith.constant 0 : index
    %c0_65 = arith.constant 0 : index
    %72 = vector.load %arg4[%c1_63, %c0_64, %c0_65] : memref<2x16x32xf32, #tpu.memory_space<vmem>>, vector<1x16x32xf32>
    %73 = vector.shape_cast %72 : vector<1x16x32xf32> to vector<16x32xf32>
    %cst_66 = arith.constant dense<0.000000e+00> : vector<48x32xf32>
    %74 = tpu.matmul %69, %73, %cst_66 {dimension_numbers = #tpu.dot_dimension_numbers<[1], [0], [0], [1], [0, 0, 1, 1], [], []>} : vector<48x16xf32>, vector<16x32xf32>, vector<48x32xf32> -> vector<48x32xf32>
    %c1_67 = arith.constant 1 : index
    %c0_68 = arith.constant 0 : index
    %c0_69 = arith.constant 0 : index
    %75 = vector.load %arg5[%c1_67, %c0_68, %c0_69] : memref<2x16x32xf32, #tpu.memory_space<vmem>>, vector<1x16x32xf32>
    %76 = vector.shape_cast %75 : vector<1x16x32xf32> to vector<16x32xf32>
    %cst_70 = arith.constant dense<0.000000e+00> : vector<48x32xf32>
    %77 = tpu.matmul %71, %76, %cst_70 {dimension_numbers = #tpu.dot_dimension_numbers<[1], [0], [0], [1], [0, 0, 1, 1], [], []>} : vector<48x16xf32>, vector<16x32xf32>, vector<48x32xf32> -> vector<48x32xf32>
    %78 = arith.addf %74, %77 : vector<48x32xf32>
    %c1_71 = arith.constant 1 : index
    %c0_72 = arith.constant 0 : index
    %c0_73 = arith.constant 0 : index
    %79 = vector.load %arg8[%c1_71, %c0_72, %c0_73] : memref<2x1x32xf32, #tpu.memory_space<vmem>>, vector<1x1x32xf32>
    %80 = vector.shape_cast %79 : vector<1x1x32xf32> to vector<1x32xf32>
    %81 = vector.broadcast %80 : vector<1x32xf32> to vector<48x32xf32>
    %82 = arith.addf %78, %81 : vector<48x32xf32>
    %c1_74 = arith.constant 1 : index
    %c0_75 = arith.constant 0 : index
    %c0_76 = arith.constant 0 : index
    %83 = vector.load %arg6[%c1_74, %c0_75, %c0_76] : memref<2x16x32xf32, #tpu.memory_space<vmem>>, vector<1x16x32xf32>
    %84 = vector.shape_cast %83 : vector<1x16x32xf32> to vector<16x32xf32>
    %cst_77 = arith.constant dense<0.000000e+00> : vector<48x32xf32>
    %85 = tpu.matmul %69, %84, %cst_77 {dimension_numbers = #tpu.dot_dimension_numbers<[1], [0], [0], [1], [0, 0, 1, 1], [], []>} : vector<48x16xf32>, vector<16x32xf32>, vector<48x32xf32> -> vector<48x32xf32>
    %c1_78 = arith.constant 1 : index
    %c0_79 = arith.constant 0 : index
    %c0_80 = arith.constant 0 : index
    %86 = vector.load %arg7[%c1_78, %c0_79, %c0_80] : memref<2x16x32xf32, #tpu.memory_space<vmem>>, vector<1x16x32xf32>
    %87 = vector.shape_cast %86 : vector<1x16x32xf32> to vector<16x32xf32>
    %cst_81 = arith.constant dense<0.000000e+00> : vector<48x32xf32>
    %88 = tpu.matmul %71, %87, %cst_81 {dimension_numbers = #tpu.dot_dimension_numbers<[1], [0], [0], [1], [0, 0, 1, 1], [], []>} : vector<48x16xf32>, vector<16x32xf32>, vector<48x32xf32> -> vector<48x32xf32>
    %89 = arith.addf %85, %88 : vector<48x32xf32>
    %c1_82 = arith.constant 1 : index
    %c0_83 = arith.constant 0 : index
    %c0_84 = arith.constant 0 : index
    %90 = vector.load %arg9[%c1_82, %c0_83, %c0_84] : memref<2x1x32xf32, #tpu.memory_space<vmem>>, vector<1x1x32xf32>
    %91 = vector.shape_cast %90 : vector<1x1x32xf32> to vector<1x32xf32>
    %92 = vector.broadcast %91 : vector<1x32xf32> to vector<48x32xf32>
    %93 = arith.addf %89, %92 : vector<48x32xf32>
    %c1_85 = arith.constant 1 : index
    %c0_86 = arith.constant 0 : index
    %c0_87 = arith.constant 0 : index
    %94 = vector.load %arg10[%c1_85, %c0_86, %c0_87] : memref<2x48x32xf32, #tpu.memory_space<vmem>>, vector<1x48x32xf32>
    %95 = vector.shape_cast %94 : vector<1x48x32xf32> to vector<48x32xf32>
    %96 = math.exp %93 : vector<48x32xf32>
    %97 = math.sqrt %96 : vector<48x32xf32>
    %98 = arith.mulf %95, %97 : vector<48x32xf32>
    %99 = arith.addf %82, %98 : vector<48x32xf32>
    %100 = arith.addf %49, %56 : vector<96x16xf32>
    %c0_88 = arith.constant 0 : index
    %c0_89 = arith.constant 0 : index
    %101 = vector.load %arg12[%c0_88, %c0_89] : memref<96x48xf32, #tpu.memory_space<vmem>>, vector<96x48xf32>
    %cst_90 = arith.constant dense<0.000000e+00> : vector<96x32xf32>
    %102 = tpu.matmul %101, %99, %cst_90 {dimension_numbers = #tpu.dot_dimension_numbers<[1], [0], [0], [1], [0, 0, 1, 1], [], []>} : vector<96x48xf32>, vector<48x32xf32>, vector<96x32xf32> -> vector<96x32xf32>
    %103 = arith.addf %52, %102 : vector<96x32xf32>
    %c0_91 = arith.constant 0 : index
    %c0_92 = arith.constant 0 : index
    %104 = vector.load %arg14[%c0_91, %c0_92] : memref<16x1xf32, #tpu.memory_space<vmem>>, vector<16x1xf32>
    %cst_93 = arith.constant dense<0.000000e+00> : vector<96x1xf32>
    %105 = tpu.matmul %100, %104, %cst_93 {dimension_numbers = #tpu.dot_dimension_numbers<[1], [0], [0], [1], [0, 0, 1, 1], [], []>} : vector<96x16xf32>, vector<16x1xf32>, vector<96x1xf32> -> vector<96x1xf32>
    %c0_94 = arith.constant 0 : index
    %c0_95 = arith.constant 0 : index
    %106 = vector.load %arg15[%c0_94, %c0_95] : memref<32x1xf32, #tpu.memory_space<vmem>>, vector<32x1xf32>
    %cst_96 = arith.constant dense<0.000000e+00> : vector<96x1xf32>
    %107 = tpu.matmul %103, %106, %cst_96 {dimension_numbers = #tpu.dot_dimension_numbers<[1], [0], [0], [1], [0, 0, 1, 1], [], []>} : vector<96x32xf32>, vector<32x1xf32>, vector<96x1xf32> -> vector<96x1xf32>
    %108 = arith.addf %105, %107 : vector<96x1xf32>
    %c0_97 = arith.constant 0 : index
    %c0_98 = arith.constant 0 : index
    %109 = vector.load %arg16[%c0_97, %c0_98] : memref<1x1xf32, #tpu.memory_space<vmem>>, vector<1x1xf32>
    %110 = vector.broadcast %109 : vector<1x1xf32> to vector<96x1xf32>
    %111 = arith.addf %108, %110 : vector<96x1xf32>
    %c0_99 = arith.constant 0 : index
    %c0_100 = arith.constant 0 : index
    %112 = vector.load %arg13[%c0_99, %c0_100] : memref<4x96xf32, #tpu.memory_space<vmem>>, vector<4x96xf32>
    %c0_101 = arith.constant 0 : index
    %c0_102 = arith.constant 0 : index
    %113 = vector.load %arg17[%c0_101, %c0_102] : memref<96x8xf32, #tpu.memory_space<vmem>>, vector<96x8xf32>
    %114 = vector.broadcast %111 : vector<96x1xf32> to vector<96x8xf32>
    %115 = arith.mulf %114, %113 : vector<96x8xf32>
    %cst_103 = arith.constant dense<0.000000e+00> : vector<4x8xf32>
    %116 = tpu.matmul %112, %115, %cst_103 {dimension_numbers = #tpu.dot_dimension_numbers<[1], [0], [0], [1], [0, 0, 1, 1], [], []>} : vector<4x96xf32>, vector<96x8xf32>, vector<4x8xf32> -> vector<4x8xf32>
    %c0_104 = arith.constant 0 : index
    %c0_105 = arith.constant 0 : index
    %117 = vector.load %arg18[%c0_104, %c0_105] : memref<1x8xf32, #tpu.memory_space<vmem>>, vector<1x8xf32>
    %118 = vector.broadcast %117 : vector<1x8xf32> to vector<4x8xf32>
    %119 = arith.addf %116, %118 : vector<4x8xf32>
    %c0_106 = arith.constant 0 : index
    %c0_107 = arith.constant 0 : index
    %120 = vector.load %arg19[%c0_106, %c0_107] : memref<4x8xf32, #tpu.memory_space<vmem>>, vector<4x8xf32>
    tpu.vector_store %arg19[%c0_106, %c0_107], %119 {strides = array<i32>} : memref<4x8xf32, #tpu.memory_space<vmem>>, vector<4x8xf32>,
    return
  }
}

module attributes {stable_mosaic.version = 11 : i64} {
  func.func @_critic_kernel(%arg0: memref<32x24xf32, #tpu.memory_space<vmem>>, %arg1: memref<32x32xf32, #tpu.memory_space<vmem>>, %arg2: memref<24x32xf32, #tpu.memory_space<vmem>>, %arg3: memref<1x32xf32, #tpu.memory_space<vmem>>, %arg4: memref<32x8xf32, #tpu.memory_space<vmem>>, %arg5: memref<32x8xf32, #tpu.memory_space<vmem>>, %arg6: memref<1x8xf32, #tpu.memory_space<vmem>>, %arg7: memref<8x1xf32, #tpu.memory_space<vmem>>, %arg8: memref<1x1xf32, #tpu.memory_space<vmem>>, %arg9: memref<32x1xf32, #tpu.memory_space<vmem>>) attributes {dimension_semantics = [], scalar_prefetch = 0 : i64, scratch_operands = 0 : i64, tpu.core_type = #tpu.core_type<tc>} {
    %c0 = arith.constant 0 : index
    %c0_0 = arith.constant 0 : index
    %0 = vector.load %arg0[%c0, %c0_0] : memref<32x24xf32, #tpu.memory_space<vmem>>, vector<32x24xf32>
    %c0_1 = arith.constant 0 : index
    %c0_2 = arith.constant 0 : index
    %1 = vector.load %arg2[%c0_1, %c0_2] : memref<24x32xf32, #tpu.memory_space<vmem>>, vector<24x32xf32>
    %cst = arith.constant dense<0.000000e+00> : vector<32x32xf32>
    %2 = tpu.matmul %0, %1, %cst {dimension_numbers = #tpu.dot_dimension_numbers<[1], [0], [0], [1], [0, 0, 1, 1], [], []>} : vector<32x24xf32>, vector<24x32xf32>, vector<32x32xf32> -> vector<32x32xf32>
    %c0_3 = arith.constant 0 : index
    %c0_4 = arith.constant 0 : index
    %3 = vector.load %arg3[%c0_3, %c0_4] : memref<1x32xf32, #tpu.memory_space<vmem>>, vector<1x32xf32>
    %4 = vector.broadcast %3 : vector<1x32xf32> to vector<32x32xf32>
    %5 = arith.addf %2, %4 : vector<32x32xf32>
    %c0_5 = arith.constant 0 : index
    %c0_6 = arith.constant 0 : index
    %6 = vector.load %arg4[%c0_5, %c0_6] : memref<32x8xf32, #tpu.memory_space<vmem>>, vector<32x8xf32>
    %cst_7 = arith.constant dense<0.000000e+00> : vector<32x8xf32>
    %7 = tpu.matmul %5, %6, %cst_7 {dimension_numbers = #tpu.dot_dimension_numbers<[1], [0], [0], [1], [0, 0, 1, 1], [], []>} : vector<32x32xf32>, vector<32x8xf32>, vector<32x8xf32> -> vector<32x8xf32>
    %c0_8 = arith.constant 0 : index
    %c0_9 = arith.constant 0 : index
    %8 = vector.load %arg1[%c0_8, %c0_9] : memref<32x32xf32, #tpu.memory_space<vmem>>, vector<32x32xf32>
    %c0_10 = arith.constant 0 : index
    %c0_11 = arith.constant 0 : index
    %9 = vector.load %arg5[%c0_10, %c0_11] : memref<32x8xf32, #tpu.memory_space<vmem>>, vector<32x8xf32>
    %cst_12 = arith.constant dense<0.000000e+00> : vector<32x8xf32>
    %10 = tpu.matmul %8, %9, %cst_12 {dimension_numbers = #tpu.dot_dimension_numbers<[1], [0], [0], [1], [0, 0, 1, 1], [], []>} : vector<32x32xf32>, vector<32x8xf32>, vector<32x8xf32> -> vector<32x8xf32>
    %11 = arith.addf %7, %10 : vector<32x8xf32>
    %c0_13 = arith.constant 0 : index
    %c0_14 = arith.constant 0 : index
    %12 = vector.load %arg6[%c0_13, %c0_14] : memref<1x8xf32, #tpu.memory_space<vmem>>, vector<1x8xf32>
    %13 = vector.broadcast %12 : vector<1x8xf32> to vector<32x8xf32>
    %14 = arith.addf %11, %13 : vector<32x8xf32>
    %cst_15 = arith.constant 0.000000e+00 : f32
    %15 = vector.broadcast %cst_15 : f32 to vector<32x8xf32>
    %16 = arith.maximumf %14, %15 : vector<32x8xf32>
    %c0_16 = arith.constant 0 : index
    %c0_17 = arith.constant 0 : index
    %17 = vector.load %arg7[%c0_16, %c0_17] : memref<8x1xf32, #tpu.memory_space<vmem>>, vector<8x1xf32>
    %cst_18 = arith.constant dense<0.000000e+00> : vector<32x1xf32>
    %18 = tpu.matmul %16, %17, %cst_18 {dimension_numbers = #tpu.dot_dimension_numbers<[1], [0], [0], [1], [0, 0, 1, 1], [], []>} : vector<32x8xf32>, vector<8x1xf32>, vector<32x1xf32> -> vector<32x1xf32>
    %c0_19 = arith.constant 0 : index
    %c0_20 = arith.constant 0 : index
    %19 = vector.load %arg8[%c0_19, %c0_20] : memref<1x1xf32, #tpu.memory_space<vmem>>, vector<1x1xf32>
    %20 = vector.broadcast %19 : vector<1x1xf32> to vector<32x1xf32>
    %21 = arith.addf %18, %20 : vector<32x1xf32>
    %22 = arith.negf %21 : vector<32x1xf32>
    %23 = math.exp %22 : vector<32x1xf32>
    %cst_21 = arith.constant 1.000000e+00 : f32
    %24 = vector.broadcast %cst_21 : f32 to vector<32x1xf32>
    %25 = arith.addf %24, %23 : vector<32x1xf32>
    %26 = arith.divf %24, %25 : vector<32x1xf32>
    %c0_22 = arith.constant 0 : index
    %c0_23 = arith.constant 0 : index
    %27 = vector.load %arg9[%c0_22, %c0_23] : memref<32x1xf32, #tpu.memory_space<vmem>>, vector<32x1xf32>
    tpu.vector_store %arg9[%c0_22, %c0_23], %26 {strides = array<i32>} : memref<32x1xf32, #tpu.memory_space<vmem>>, vector<32x1xf32>,
    return
  }
}

</mosaic_0001>

<bundles_post_ra>
// kernel: reverse.10
= control target key start
LH: loop header
LB: loop body
LE: loop exit
PB: predicated region body
PF: predicated region fallthrough
CT: control target
= control target key end

     0   :  { %v36_v1 = vld [vmem:[#allocation0 + $0x7] ss:$-1 sm:$0xff]  ;;  %v43_v2 = vlaneseq  ;;  %s104_s0 = inlined_call_operand.vmem [shape: f32[8,1,7], index: 0, kind: input, shape index: {}]   ;;  %s105_s1 = inlined_call_operand.vmem [shape: f32[8,1,7], index: 1, kind: output, shape index: {}]  }
   0x1   :  { %v30_v0 = vld [vmem:[%s104_s0] sm:$0xff]  ;;  %v37_v3 = vrot.slane %v36_v1, 1 }
   0x2   :  { %31 = vst [vmem:[#allocation0 + $0x8] sm:$0xff] %v30_v0  ;;  %v44_v4 = vshrl.u32 %v43_v2, 7 }
   0x3   :  { %38 = vst [vmem:[#allocation1] sm:$0xff] %v37_v3 }
   0x4   :  { %vm45_vm0 = vcmp.lt.s32.totalorder %v44_v4, 7 }
   0x9   :  { %v41_v5 = vld [vmem:[#allocation0 + $0xf] ss:$-1 sm:$0xff] }
   0xa   :  { %v42_v6 = vrot.slane %v41_v5, 1 }
   0xc   :  { %46 = vst.msk [vmem:[#allocation1] sm:$0xff] %vm45_vm0, %v42_v6 }
  0x13   :  { %v74_v7 = vld [vmem:[#allocation1] sm:$0xff] }
  0x14   :  { %75 = vst [vmem:[%s105_s1] sm:$0xff] %v74_v7 }

// kernel: reverse.12
= control target key start
LH: loop header
LB: loop body
LE: loop exit
PB: predicated region body
PF: predicated region fallthrough
CT: control target
= control target key end

     0   :  { %v2_v0 = vlaneseq  ;;  %s97_s0 = inlined_call_operand.vmem [shape: f32[8,1,11], index: 0, kind: input, shape index: {}]   ;;  %s98_s1 = inlined_call_operand.vmem [shape: f32[8,1,11], index: 1, kind: output, shape index: {}]  }
   0x1   :  { %v32_v2 = vld [vmem:[%s97_s0] sm:$0xff] }
   0x2   :  { %v3_v1 = vsub.s32 10, %v2_v0 }
   0x4   :  { %4 = vset.pattern.permute.xlu0 %v3_v1 }
   0x5   :  { %38 = vperm.xlu0 %4, %v32_v2  }
  0x84   :  { %v39_v3 = vpop.permute.xlu0 %38 }
  0x85   :  { %69 = vst [vmem:[%s98_s1] sm:$0xff] %v39_v3 }

// kernel: model_forward.6
= control target key start
LH: loop header
LB: loop body
LE: loop exit
PB: predicated region body
PF: predicated region fallthrough
CT: control target
= control target key end

     0   :  { %s1195_s15 = smov 0   ;;  %s1380_s0 = inlined_call_operand.vmem [shape: f32[2,192,31], index: 0, kind: input, shape index: {}]   ;;  %s1381_s1 = inlined_call_operand.vmem [shape: f32[2,31,32], index: 1, kind: input, shape index: {}]   ;;  %s1382_s2 = inlined_call_operand.vmem [shape: f32[2,32,16], index: 2, kind: input, shape index: {}]   ;;  %s1383_s3 = inlined_call_operand.vmem [shape: f32[2,1,16], index: 3, kind: input, shape index: {}]   ;;  %s1384_s4 = inlined_call_operand.vmem [shape: f32[2,192,16], index: 4, kind: output, shape index: {}]  }
   0x1 LB: > { %s924_s16 = sadd.s32 4294967295, %s1167_s15   ;;  %p928_p0 = scmp.ge.s32.totalorder %s1167_s15, 1  ;;  %s1167_s15 = sphi %s1195_s15, %s14_s15  }
   0x2   : > { %p190_p1 = scmp.lt.s32.totalorder %s1167_s15, 3 }
   0x4   : > { %p191_p2 = pnand %p928_p0, %p190_p1 }
   0x5   : > { %p229_p3 = scmp.lt.s32.totalorder (!%p191_p2), %s924_s16, 1  ;;  %vm353_vm0 = vcmask (!%p191_p2), 1046528   ;;  %vm280_vm1 = vcmask (!%p191_p2), 252928   ;;  %vm1169_vm2 = vmmov (!%p191_p2), 1   ;;  %vm553_vm4 = vcmask (!%p191_p2), 261120  }
   0x6   : > { %194 = sbr.rel (%p191_p2) target bundleno = 501 (0x1f5), region = 36  ;;  %vm1138_vm3 = vmpackc.low (!%p191_p2), %vm353_vm0, %vm1169_vm2  ;;  %vm811_vm5 = vcmask (!%p191_p2), 130048  }
   0xd   : > { %s1386_s16 = smov (!%p229_p3, %s924_s16), 1 }
   0xe   : > { %s1151_s17 = smul.u32 192, %s1386_s16  ;;  %s987_s18 = sshll.u32 %s1386_s16, 5 }
   0xf   : > { %s238_s21 = scalar_lea.vmem %s1381_s1, %s987_s18  ;;  %s243_s27 = scalar_lea.vmem %s1382_s2, %s987_s18 }
  0x10   : > { %s1215_s24 = scalar_lea.vmem %s1380_s0, %s1151_s17  ;;  %v276_v0 = vld [vmem:[%s238_s21] sm:$0xff]  ;;  %v277_v1 = vld [vmem:[%s238_s21 + $0x8] sm:$0xff]  ;;  %v278_v3 = vld [vmem:[%s238_s21 + $0x10] sm:$0xff]  ;;  %s246_s30 = scalar_lea.vmem %s1383_s3, %s1386_s16 }
  0x11   : > { %v1133_v2 = vpack.c.bf16 %v277_v1, %v276_v0  ;;  %v279_v4 = vld [vmem:[%s238_s21 + $0x18] sm:$0x7f]  ;;  %v252_v5 = vld [vmem:[%s1215_s24] sm:$0xff]  ;;  %v253_v7 = vld [vmem:[%s1215_s24 + $0x8] sm:$0xff]  ;;  %s1303_s7 = scalar_lea.vmem %s1384_s4, %s1151_s17 }
  0x12   : > { %v1137_v6 = vpack.c.bf16 %v279_v4, %v278_v3  ;;  %1053 = vmatprep.mubr.msk.f32.mxu0 %vm280_vm1, %v252_v5  ;;  %v254_v8 = vld [vmem:[%s1215_s24 + $0x10] sm:$0xff]  ;;  %v542_v9 = vld [vmem:[%s243_s27] sm:$0xff]  ;;  %v543_v10 = vld [vmem:[%s243_s27 + $0x8] sm:$0xff] }
  0x13   : > { %1134 = vmatprep.subr.bf16.mxu0 %v1133_v2  ;;  %v544_v11 = vld [vmem:[%s243_s27 + $0x10] sm:$0xff]  ;;  %v545_v12 = vld [vmem:[%s243_s27 + $0x18] sm:$0xff]  ;;  %v1143_v13 = vpack.c.bf16 %v543_v10, %v542_v9  ;;  %v256_v16 = vld [vmem:[%s1215_s24 + $0x20] sm:$0xff] }
  0x14   : > { %1136 = vmatpush3.bf16.msra.mxu0 %v1133_v2  ;;  %v1147_v14 = vpack.c.bf16 %v545_v12, %v544_v11  ;;  %v255_v15 = vld [vmem:[%s1215_s24 + $0x18] sm:$0xff]  ;;  %v257_v17 = vld [vmem:[%s1215_s24 + $0x28] sm:$0xff]  ;;  %v258_v18 = vld [vmem:[%s1215_s24 + $0x30] sm:$0xff] }
  0x15   : > { %1139 = vmatprep.subr.msk.bf16.mxu0 %vm1138_vm3, %v1137_v6  ;;  %1144 = vmatprep.subr.bf16.mxu1 %v1143_v13  ;;  %v259_v19 = vld [vmem:[%s1215_s24 + $0x38] sm:$0xff]  ;;  %v260_v20 = vld [vmem:[%s1215_s24 + $0x40] sm:$0xff]  ;;  %v261_v21 = vld [vmem:[%s1215_s24 + $0x48] sm:$0xff] }
  0x16   : > { %1146 = vmatpush3.bf16.msra.mxu1 %v1143_v13  ;;  %v262_v22 = vld [vmem:[%s1215_s24 + $0x50] sm:$0xff]  ;;  %v263_v23 = vld [vmem:[%s1215_s24 + $0x58] sm:$0xff]  ;;  %v264_v24 = vld [vmem:[%s1215_s24 + $0x60] sm:$0xff] }
  0x17   : > { %1148 = vmatprep.subr.bf16.mxu1 %v1147_v14  ;;  %v265_v25 = vld [vmem:[%s1215_s24 + $0x68] sm:$0xff]  ;;  %v266_v26 = vld [vmem:[%s1215_s24 + $0x70] sm:$0xff]  ;;  %v267_v27 = vld [vmem:[%s1215_s24 + $0x78] sm:$0xff] }
  0x18   : > { %1142 = vmatpush3.bf16.msk.msra.mxu0 %vm1138_vm3, %v1137_v6  ;;  %v268_v28 = vld [vmem:[%s1215_s24 + $0x80] sm:$0xff]  ;;  %v269_v29 = vld [vmem:[%s1215_s24 + $0x88] sm:$0xff]  ;;  %v270_v30 = vld [vmem:[%s1215_s24 + $0x90] sm:$0xff] }
  0x19   : > { %v271_v31 = vld [vmem:[%s1215_s24 + $0x98] sm:$0xff]  ;;  %v272_v32 = vld [vmem:[%s1215_s24 + $0xa0] sm:$0xff]  ;;  %v273_v33 = vld [vmem:[%s1215_s24 + $0xa8] sm:$0xff] }
  0x1a   : > { %1150 = vmatpush3.bf16.msra.mxu1 %v1147_v14  ;;  %v274_v34 = vld [vmem:[%s1215_s24 + $0xb0] sm:$0xff]  ;;  %v275_v35 = vld [vmem:[%s1215_s24 + $0xb8] sm:$0xff]  ;;  %v1296_v60 = vld [vmem:[%s246_s30] ss:$0 sm:$0xff] }
  0x1b   : > { %1054 = vmatmul.mubr.msk.f32.vlgmr.msra.gmra.mrb[0].mxu0 %vm280_vm1, %v253_v7 }
  0x1c   : > { %1056 = vmatprep.mubr.msk.f32.mxu0 %vm280_vm1, %v254_v8 }
  0x1f   : > { %1057 = vmatmul.mubr.msk.f32.gmra.mrb[2].mxu0 %vm280_vm1, %v255_v15 }
  0x20   : > { %1059 = vmatprep.mubr.msk.f32.mxu0 %vm280_vm1, %v256_v16 }
  0x23   : > { %1060 = vmatmul.mubr.msk.f32.gmra.mrb[4].mxu0 %vm280_vm1, %v257_v17 }
  0x24   : > { %1062 = vmatprep.mubr.msk.f32.mxu0 %vm280_vm1, %v258_v18 }
  0x27   : > { %1063 = vmatmul.mubr.msk.f32.gmra.mrb[6].mxu0 %vm280_vm1, %v259_v19 }
  0x28   : > { %1065 = vmatprep.mubr.msk.f32.mxu0 %vm280_vm1, %v260_v20 }
  0x2b   : > { %1066 = vmatmul.mubr.msk.f32.gmra.mrb[8].mxu0 %vm280_vm1, %v261_v21 }
  0x2c   : > { %1068 = vmatprep.mubr.msk.f32.mxu0 %vm280_vm1, %v262_v22 }
  0x2f   : > { %1069 = vmatmul.mubr.msk.f32.gmra.mrb[10].mxu0 %vm280_vm1, %v263_v23 }
  0x30   : > { %1071 = vmatprep.mubr.msk.f32.mxu0 %vm280_vm1, %v264_v24 }
  0x33   : > { %1072 = vmatmul.mubr.msk.f32.gmra.mrb[12].mxu0 %vm280_vm1, %v265_v25 }
  0x34   : > { %1074 = vmatprep.mubr.msk.f32.mxu0 %vm280_vm1, %v266_v26 }
  0x37   : > { %1075 = vmatmul.mubr.msk.f32.gmra.mrb[14].mxu0 %vm280_vm1, %v267_v27 }
  0x38   : > { %1077 = vmatprep.mubr.msk.f32.mxu0 %vm280_vm1, %v268_v28 }
  0x3b   : > { %1078 = vmatmul.mubr.msk.f32.gmra.mrb[16].mxu0 %vm280_vm1, %v269_v29 }
  0x3c   : > { %1080 = vmatprep.mubr.msk.f32.mxu0 %vm280_vm1, %v270_v30 }
  0x3f   : > { %1081 = vmatmul.mubr.msk.f32.gmra.mrb[18].mxu0 %vm280_vm1, %v271_v31 }
  0x40   : > { %1083 = vmatprep.mubr.msk.f32.mxu0 %vm280_vm1, %v272_v32 }
  0x43   : > { %1084 = vmatmul.mubr.msk.f32.gmra.mrb[20].mxu0 %vm280_vm1, %v273_v33 }
  0x44   : > { %1086 = vmatprep.mubr.msk.f32.mxu0 %vm280_vm1, %v274_v34 }
  0x47   : > { %1087 = vmatmul.mubr.msk.f32.gmra.mrb[22].mxu0 %vm280_vm1, %v275_v35 }
  0xee   : > { %v1055_v36 = vpop.f32.mrb[0].mxu0 }
  0xef   : > { %v423_v37 = vpop.f32.mrb[1].mxu0 }
  0xf0   : > { %1097 = vmatprep.mubr.msk.f32.mxu1 %vm553_vm4, %v423_v37 }
  0xf1   : > { %1098 = vmatmul.mubr.msk.f32.vlgmr.msra.gmra.mrb[0].mxu1 %vm553_vm4, %v1055_v36 }
  0xf2   : > { %v1058_v38 = vpop.f32.mrb[2].mxu0 }
  0xf3   : > { %v433_v39 = vpop.f32.mrb[3].mxu0 }
  0xf4   : > { %1100 = vmatprep.mubr.msk.f32.mxu1 %vm553_vm4, %v433_v39 }
  0xf5   : > { %1101 = vmatmul.mubr.msk.f32.gmra.mrb[2].mxu1 %vm553_vm4, %v1058_v38 }
  0xf6   : > { %v1061_v40 = vpop.f32.mrb[4].mxu0 }
  0xf7   : > { %v443_v41 = vpop.f32.mrb[5].mxu0 }
  0xf8   : > { %1103 = vmatprep.mubr.msk.f32.mxu1 %vm553_vm4, %v443_v41 }
  0xf9   : > { %1104 = vmatmul.mubr.msk.f32.gmra.mrb[4].mxu1 %vm553_vm4, %v1061_v40 }
  0xfa   : > { %v1064_v42 = vpop.f32.mrb[6].mxu0 }
  0xfb   : > { %v453_v43 = vpop.f32.mrb[7].mxu0 }
  0xfc   : > { %1106 = vmatprep.mubr.msk.f32.mxu1 %vm553_vm4, %v453_v43 }
  0xfd   : > { %1107 = vmatmul.mubr.msk.f32.gmra.mrb[6].mxu1 %vm553_vm4, %v1064_v42 }
  0xfe   : > { %v1067_v44 = vpop.f32.mrb[8].mxu0 }
  0xff   : > { %v463_v45 = vpop.f32.mrb[9].mxu0 }
 0x100   : > { %1109 = vmatprep.mubr.msk.f32.mxu1 %vm553_vm4, %v463_v45 }
 0x101   : > { %1110 = vmatmul.mubr.msk.f32.gmra.mrb[8].mxu1 %vm553_vm4, %v1067_v44 }
 0x102   : > { %v1070_v46 = vpop.f32.mrb[10].mxu0 }
 0x103   : > { %v473_v47 = vpop.f32.mrb[11].mxu0 }
 0x104   : > { %1112 = vmatprep.mubr.msk.f32.mxu1 %vm553_vm4, %v473_v47 }
 0x105   : > { %1113 = vmatmul.mubr.msk.f32.gmra.mrb[10].mxu1 %vm553_vm4, %v1070_v46 }
 0x106   : > { %v1073_v48 = vpop.f32.mrb[12].mxu0 }
 0x107   : > { %v483_v49 = vpop.f32.mrb[13].mxu0 }
 0x108   : > { %1115 = vmatprep.mubr.msk.f32.mxu1 %vm553_vm4, %v483_v49 }
 0x109   : > { %1116 = vmatmul.mubr.msk.f32.gmra.mrb[12].mxu1 %vm553_vm4, %v1073_v48 }
 0x10a   : > { %v1076_v50 = vpop.f32.mrb[14].mxu0 }
 0x10b   : > { %v493_v51 = vpop.f32.mrb[15].mxu0 }
 0x10c   : > { %1118 = vmatprep.mubr.msk.f32.mxu1 %vm553_vm4, %v493_v51 }
 0x10d   : > { %1119 = vmatmul.mubr.msk.f32.gmra.mrb[14].mxu1 %vm553_vm4, %v1076_v50 }
 0x10e   : > { %v1079_v52 = vpop.f32.mrb[16].mxu0 }
 0x10f   : > { %v503_v53 = vpop.f32.mrb[17].mxu0 }
 0x110   : > { %1121 = vmatprep.mubr.msk.f32.mxu1 %vm553_vm4, %v503_v53 }
 0x111   : > { %1122 = vmatmul.mubr.msk.f32.gmra.mrb[16].mxu1 %vm553_vm4, %v1079_v52 }
 0x112   : > { %v1082_v54 = vpop.f32.mrb[18].mxu0 }
 0x113   : > { %v513_v55 = vpop.f32.mrb[19].mxu0 }
 0x114   : > { %1124 = vmatprep.mubr.msk.f32.mxu1 %vm553_vm4, %v513_v55 }
 0x115   : > { %1125 = vmatmul.mubr.msk.f32.gmra.mrb[18].mxu1 %vm553_vm4, %v1082_v54 }
 0x116   : > { %v1085_v56 = vpop.f32.mrb[20].mxu0 }
 0x117   : > { %v523_v57 = vpop.f32.mrb[21].mxu0 }
 0x118   : > { %1127 = vmatprep.mubr.msk.f32.mxu1 %vm553_vm4, %v523_v57 }
 0x119   : > { %1128 = vmatmul.mubr.msk.f32.gmra.mrb[20].mxu1 %vm553_vm4, %v1085_v56 }
 0x11a   : > { %v1088_v58 = vpop.f32.mrb[22].mxu0 }
 0x11b   : > { %v533_v59 = vpop.f32.mrb[23].mxu0 }
 0x11c   : > { %1130 = vmatprep.mubr.msk.f32.mxu1 %vm553_vm4, %v533_v59 }
 0x11d   : > { %1131 = vmatmul.mubr.msk.f32.gmra.mrb[22].mxu1 %vm553_vm4, %v1088_v58 }
 0x1c4   : > { %v1099_v61 = vpop.f32.mrb[0].mxu1 }
 0x1c5   : > { %v698_v62 = vadd.f32 %v1099_v61, %v1296_v60  ;;  %v692_v63 = vpop.f32.mrb[1].mxu1 }
 0x1c6   : > { %v693_v0 = vadd.f32 %v1296_v60, %v692_v63 }
 0x1c7   : > { %813 = vst.msk [vmem:[%s1303_s7 + $0x8] sm:$0xff] %vm811_vm5, %v698_v62 }
 0x1c8   : > { %812 = vst.msk [vmem:[%s1303_s7] sm:$0xff] %vm811_vm5, %v693_v0  ;;  %v1102_v1 = vpop.f32.mrb[2].mxu1 }
 0x1c9   : > { %v708_v2 = vadd.f32 %v1102_v1, %v1296_v60  ;;  %v702_v3 = vpop.f32.mrb[3].mxu1 }
 0x1ca   : > { %v703_v4 = vadd.f32 %v1296_v60, %v702_v3 }
 0x1cb   : > { %815 = vst.msk [vmem:[%s1303_s7 + $0x18] sm:$0xff] %vm811_vm5, %v708_v2 }
 0x1cc   : > { %814 = vst.msk [vmem:[%s1303_s7 + $0x10] sm:$0xff] %vm811_vm5, %v703_v4  ;;  %v1105_v5 = vpop.f32.mrb[4].mxu1 }
 0x1cd   : > { %v718_v6 = vadd.f32 %v1105_v5, %v1296_v60  ;;  %v712_v7 = vpop.f32.mrb[5].mxu1 }
 0x1ce   : > { %v713_v8 = vadd.f32 %v1296_v60, %v712_v7 }
 0x1cf   : > { %817 = vst.msk [vmem:[%s1303_s7 + $0x28] sm:$0xff] %vm811_vm5, %v718_v6 }
 0x1d0   : > { %816 = vst.msk [vmem:[%s1303_s7 + $0x20] sm:$0xff] %vm811_vm5, %v713_v8  ;;  %v1108_v9 = vpop.f32.mrb[6].mxu1 }
 0x1d1   : > { %v728_v10 = vadd.f32 %v1108_v9, %v1296_v60  ;;  %v722_v11 = vpop.f32.mrb[7].mxu1 }
 0x1d2   : > { %v723_v12 = vadd.f32 %v1296_v60, %v722_v11 }
 0x1d3   : > { %819 = vst.msk [vmem:[%s1303_s7 + $0x38] sm:$0xff] %vm811_vm5, %v728_v10 }
 0x1d4   : > { %818 = vst.msk [vmem:[%s1303_s7 + $0x30] sm:$0xff] %vm811_vm5, %v723_v12  ;;  %v1111_v13 = vpop.f32.mrb[8].mxu1 }
 0x1d5   : > { %v738_v14 = vadd.f32 %v1111_v13, %v1296_v60  ;;  %v732_v15 = vpop.f32.mrb[9].mxu1 }
 0x1d6   : > { %v733_v16 = vadd.f32 %v1296_v60, %v732_v15 }
 0x1d7   : > { %821 = vst.msk [vmem:[%s1303_s7 + $0x48] sm:$0xff] %vm811_vm5, %v738_v14 }
 0x1d8   : > { %820 = vst.msk [vmem:[%s1303_s7 + $0x40] sm:$0xff] %vm811_vm5, %v733_v16  ;;  %v1114_v17 = vpop.f32.mrb[10].mxu1 }
 0x1d9   : > { %v748_v18 = vadd.f32 %v1114_v17, %v1296_v60  ;;  %v742_v19 = vpop.f32.mrb[11].mxu1 }
 0x1da   : > { %v743_v20 = vadd.f32 %v1296_v60, %v742_v19 }
 0x1db   : > { %823 = vst.msk [vmem:[%s1303_s7 + $0x58] sm:$0xff] %vm811_vm5, %v748_v18 }
 0x1dc   : > { %822 = vst.msk [vmem:[%s1303_s7 + $0x50] sm:$0xff] %vm811_vm5, %v743_v20  ;;  %v1117_v21 = vpop.f32.mrb[12].mxu1 }
 0x1dd   : > { %v758_v22 = vadd.f32 %v1117_v21, %v1296_v60  ;;  %v752_v23 = vpop.f32.mrb[13].mxu1 }
 0x1de   : > { %v753_v24 = vadd.f32 %v1296_v60, %v752_v23 }
 0x1df   : > { %825 = vst.msk [vmem:[%s1303_s7 + $0x68] sm:$0xff] %vm811_vm5, %v758_v22 }
 0x1e0   : > { %824 = vst.msk [vmem:[%s1303_s7 + $0x60] sm:$0xff] %vm811_vm5, %v753_v24  ;;  %v1120_v25 = vpop.f32.mrb[14].mxu1 }
 0x1e1   : > { %v768_v26 = vadd.f32 %v1120_v25, %v1296_v60  ;;  %v762_v27 = vpop.f32.mrb[15].mxu1 }
 0x1e2   : > { %v763_v28 = vadd.f32 %v1296_v60, %v762_v27 }
 0x1e3   : > { %827 = vst.msk [vmem:[%s1303_s7 + $0x78] sm:$0xff] %vm811_vm5, %v768_v26 }
 0x1e4   : > { %826 = vst.msk [vmem:[%s1303_s7 + $0x70] sm:$0xff] %vm811_vm5, %v763_v28  ;;  %v1123_v29 = vpop.f32.mrb[16].mxu1 }
 0x1e5   : > { %v778_v30 = vadd.f32 %v1123_v29, %v1296_v60  ;;  %v772_v31 = vpop.f32.mrb[17].mxu1 }
 0x1e6   : > { %v773_v32 = vadd.f32 %v1296_v60, %v772_v31 }
 0x1e7   : > { %829 = vst.msk [vmem:[%s1303_s7 + $0x88] sm:$0xff] %vm811_vm5, %v778_v30 }
 0x1e8   : > { %828 = vst.msk [vmem:[%s1303_s7 + $0x80] sm:$0xff] %vm811_vm5, %v773_v32  ;;  %v1126_v33 = vpop.f32.mrb[18].mxu1 }
 0x1e9   : > { %v788_v34 = vadd.f32 %v1126_v33, %v1296_v60  ;;  %v782_v35 = vpop.f32.mrb[19].mxu1 }
 0x1ea   : > { %v783_v36 = vadd.f32 %v1296_v60, %v782_v35 }
 0x1eb   : > { %831 = vst.msk [vmem:[%s1303_s7 + $0x98] sm:$0xff] %vm811_vm5, %v788_v34 }
 0x1ec   : > { %830 = vst.msk [vmem:[%s1303_s7 + $0x90] sm:$0xff] %vm811_vm5, %v783_v36  ;;  %v1129_v37 = vpop.f32.mrb[20].mxu1 }
 0x1ed   : > { %v798_v38 = vadd.f32 %v1129_v37, %v1296_v60  ;;  %v792_v39 = vpop.f32.mrb[21].mxu1 }
 0x1ee   : > { %v793_v40 = vadd.f32 %v1296_v60, %v792_v39 }
 0x1ef   : > { %833 = vst.msk [vmem:[%s1303_s7 + $0xa8] sm:$0xff] %vm811_vm5, %v798_v38 }
 0x1f0   : > { %832 = vst.msk [vmem:[%s1303_s7 + $0xa0] sm:$0xff] %vm811_vm5, %v793_v40  ;;  %v1132_v41 = vpop.f32.mrb[22].mxu1 }
 0x1f1   : > { %v808_v42 = vadd.f32 %v1132_v41, %v1296_v60  ;;  %v802_v43 = vpop.f32.mrb[23].mxu1 }
 0x1f2   : > { %v803_v44 = vadd.f32 %v1296_v60, %v802_v43 }
 0x1f3   : > { %835 = vst.msk [vmem:[%s1303_s7 + $0xb8] sm:$0xff] %vm811_vm5, %v808_v42 }
 0x1f4   : > { %834 = vst.msk [vmem:[%s1303_s7 + $0xb0] sm:$0xff] %vm811_vm5, %v803_v44 }
 0x1f5 PF: > { %s14_s15 = sadd.s32 1, %s1167_s15  }
 0x1f6   : > { %p11_p4 = scmp.ge.s32.totalorder %s14_s15, 4  }
 0x1f8   :  { %13 = sbr.rel (!%p11_p4) target bundleno = 1 (0x1), region = 75 }

// kernel: model_forward.8
= control target key start
LH: loop header
LB: loop body
LE: loop exit
PB: predicated region body
PF: predicated region fallthrough
CT: control target
= control target key end

     0   :  { %s1847_s25 = smov 0   ;;  %s2047_s0 = inlined_call_operand.vmem [shape: f32[2,8,16], index: 0, kind: input, shape index: {}]   ;;  %s2048_s1 = inlined_call_operand.vmem [shape: f32[2,16,112], index: 1, kind: input, shape index: {}]   ;;  %s2049_s2 = inlined_call_operand.vmem [shape: f32[112,112], index: 2, kind: input, shape index: {}]   ;;  %s2050_s3 = inlined_call_operand.vmem [shape: f32[2,112,32], index: 3, kind: input, shape index: {}]   ;;  %s2051_s4 = inlined_call_operand.vmem [shape: f32[2,1,32], index: 4, kind: input, shape index: {}]   ;;  %s2052_s5 = inlined_call_operand.vmem [shape: f32[2,112,32], index: 5, kind: input, shape index: {}]   ;;  %s2053_s6 = inlined_call_operand.vmem [shape: f32[2,1,32], index: 6, kind: input, shape index: {}]   ;;  %s2054_s7 = inlined_call_operand.vmem [shape: f32[2,32,24], index: 7, kind: input, shape index: {}]   ;;  %s2055_s8 = inlined_call_operand.vmem [shape: f32[2,1,24], index: 8, kind: input, shape index: {}]   ;;  %s2056_s9 = inlined_call_operand.vmem [shape: f32[2,8,32], index: 9, kind: input, shape index: {}]   ;;  %s2057_s10 = inlined_call_operand.vmem [shape: f32[2,8,32], index: 10, kind: output, shape index: {0}]   ;;  %s2058_s11 = inlined_call_operand.vmem [shape: f32[2,8,32], index: 11, kind: output, shape index: {1}]   ;;  %s2059_s12 = inlined_call_operand.vmem [shape: f32[2,8,32], index: 12, kind: output, shape index: {2}]   ;;  %s2060_s13 = inlined_call_operand.vmem [shape: f32[2,8,24], index: 13, kind: output, shape index: {3}]  }
   0x1 LB: > { %s1411_s26 = sadd.s32 4294967295, %s1772_s25   ;;  %p1415_p0 = scmp.ge.s32.totalorder %s1772_s25, 1  ;;  %s1772_s25 = sphi %s1847_s25, %s24_s25  }
   0x2   : > { %p466_p1 = scmp.lt.s32.totalorder %s1772_s25, 3 }
   0x4   : > { %p467_p2 = pnand %p1415_p0, %p466_p1 }
   0x5   : > { %p553_p3 = scmp.lt.s32.totalorder (!%p467_p2), %s1411_s26, 1  ;;  %v702_v0 = vld [vmem:[%s2049_s2] sm:$0xff] (!%p467_p2)  ;;  %v1774_v1 = vmov (!%p467_p2), 0.0|0.0   ;;  %vm1775_vm0 = vmmov (!%p467_p2), 0   ;;  %v1776_v2 = vmov (!%p467_p2), 0.0   ;;  %v703_v3 = vld [vmem:[%s2049_s2 + $0x8] sm:$0xff] (!%p467_p2) }
   0x6   : > { %470 = sbr.rel (%p467_p2) target bundleno = 978 (0x3d2), region = 60  ;;  %1651 = vmatprep.subr.bf16.mxu0 (!%p467_p2), %v1774_v1  ;;  %1513 = vmatprep.mubr.msk.f32.mxu0 (!%p467_p2), %vm1775_vm0, %v1776_v2  ;;  %v704_v4 = vld [vmem:[%s2049_s2 + $0x10] sm:$0xff] (!%p467_p2)  ;;  %v705_v5 = vld [vmem:[%s2049_s2 + $0x18] sm:$0xff] (!%p467_p2)  ;;  %v1655_v6 = vpack.c.bf16 (!%p467_p2), %v703_v3, %v702_v0  ;;  %v706_v8 = vld [vmem:[%s2049_s2 + $0x20] sm:$0xff] (!%p467_p2)  ;;  %vm609_vm1 = vcmask (!%p467_p2), 130048   ;;  %vm683_vm2 = vcmask (!%p467_p2), 916480  }
   0x7   : > { %1654 = vmatprep.subr.bf16.mxu1 (!%p467_p2), %v1774_v1  ;;  %1544 = vmatprep.mubr.msk.f32.mxu1 (!%p467_p2), %vm1775_vm0, %v1776_v2  ;;  %v1658_v7 = vpack.c.bf16 (!%p467_p2), %v705_v5, %v704_v4  ;;  %v707_v9 = vld [vmem:[%s2049_s2 + $0x28] sm:$0xff] (!%p467_p2)  ;;  %v708_v15 = vld [vmem:[%s2049_s2 + $0x30] sm:$0xff] (!%p467_p2)  ;;  %v709_v16 = vld [vmem:[%s2049_s2 + $0x38] sm:$0xff] (!%p467_p2)  ;;  %vm1099_vm3 = vcmask (!%p467_p2), 261120   ;;  %vm1176_vm7 = vcmask (!%p467_p2), 195584  }
   0x8   : > { %1656 = vmatpush3.bf16.msra.mxu1 (!%p467_p2), %v1655_v6  ;;  %v1661_v13 = vpack.c.bf16 (!%p467_p2), %v707_v9, %v706_v8  ;;  %v1664_v17 = vpack.c.bf16 (!%p467_p2), %v709_v16, %v708_v15  ;;  %v710_v18 = vld [vmem:[%s2049_s2 + $0x40] sm:$0xff] (!%p467_p2)  ;;  %v711_v19 = vld [vmem:[%s2049_s2 + $0x48] sm:$0xff] (!%p467_p2)  ;;  %v712_v21 = vld [vmem:[%s2049_s2 + $0x50] sm:$0xff] (!%p467_p2) }
   0x9   : > { %1657 = vmatprep.subr.bf16.mxu1 (!%p467_p2), %v1774_v1  ;;  %v1667_v20 = vpack.c.bf16 (!%p467_p2), %v711_v19, %v710_v18  ;;  %v713_v22 = vld [vmem:[%s2049_s2 + $0x58] sm:$0xff] (!%p467_p2)  ;;  %v714_v24 = vld [vmem:[%s2049_s2 + $0x60] sm:$0xff] (!%p467_p2)  ;;  %v715_v25 = vld [vmem:[%s2049_s2 + $0x68] sm:$0xff] (!%p467_p2) }
   0xa   : > { %v1670_v23 = vpack.c.bf16 (!%p467_p2), %v713_v22, %v712_v21  ;;  %v1673_v26 = vpack.c.bf16 (!%p467_p2), %v715_v25, %v714_v24 }
   0xc   : > { %1659 = vmatpush3.bf16.msra.mxu1 (!%p467_p2), %v1658_v7 }
   0xd   : > { %s2062_s26 = smov (!%p553_p3, %s1411_s26), 1  ;;  %1660 = vmatprep.subr.bf16.mxu1 %v1774_v1 }
   0xe   : > { %s1439_s18 = sshll.u32 %s2062_s26, 4  ;;  %s1880_s22 = sshll.u32 %s2062_s26, 3 }
   0xf   : > { %s561_s21 = scalar_lea.vmem %s2048_s1, %s1439_s18  ;;  %s556_s14 = scalar_lea.vmem %s2047_s0, %s1880_s22 }
  0x10   : > { %v607_v10 = vld [vmem:[%s561_s21] sm:$0xff]  ;;  %v608_v11 = vld [vmem:[%s561_s21 + $0x8] sm:$0xff]  ;;  %1662 = vmatpush3.bf16.msra.mxu1 %v1661_v13  ;;  %s1744_s17 = smul.u32 112, %s2062_s26  ;;  %s1440_s27 = sshll.u32 %s2062_s26, 5 }
  0x11   : > { %v1652_v12 = vpack.c.bf16 %v608_v11, %v607_v10  ;;  %v606_v14 = vld [vmem:[%s556_s14] sm:$0xff]  ;;  %1663 = vmatprep.subr.bf16.mxu1 %v1774_v1  ;;  %s582_s30 = scalar_lea.vmem %s2054_s7, %s1440_s27  ;;  %s569_s16 = scalar_lea.vmem %s2051_s4, %s2062_s26 }
  0x12   : > { %s1944_s20 = scalar_lea.vmem %s2050_s3, %s1744_s17  ;;  %s1949_s24 = scalar_lea.vmem %s2052_s5, %s1744_s17 }
  0x13   : > { %1653 = vmatpush3.bf16.msra.mxu0 %v1652_v12  ;;  %v876_v41 = vld [vmem:[%s1944_s20] sm:$0xff]  ;;  %v877_v42 = vld [vmem:[%s1944_s20 + $0x8] sm:$0xff]  ;;  %v878_v50 = vld [vmem:[%s1944_s20 + $0x10] sm:$0xff]  ;;  %s577_s19 = scalar_lea.vmem %s2053_s6, %s2062_s26  ;;  %s597_s23 = scalar_lea.vmem %s2058_s11, %s1880_s22 }
  0x14   : > { %1675 = vmatprep.subr.bf16.mxu0 %v1774_v1  ;;  %1665 = vmatpush3.bf16.msra.mxu1 %v1664_v17  ;;  %v970_v45 = vld [vmem:[%s1949_s24] sm:$0xff]  ;;  %v971_v46 = vld [vmem:[%s1949_s24 + $0x8] sm:$0xff]  ;;  %v1697_v47 = vpack.c.bf16 %v877_v42, %v876_v41  ;;  %v879_v51 = vld [vmem:[%s1944_s20 + $0x18] sm:$0xff]  ;;  %s601_s28 = scalar_lea.vmem %s2059_s12, %s1880_s22  ;;  %s589_s14 = scalar_lea.vmem %s2056_s9, %s1880_s22 }
  0x15   : > { %1666 = vmatprep.subr.bf16.mxu1 %v1774_v1  ;;  %v1718_v52 = vpack.c.bf16 %v971_v46, %v970_v45  ;;  %v972_v54 = vld [vmem:[%s1949_s24 + $0x10] sm:$0xff]  ;;  %v973_v55 = vld [vmem:[%s1949_s24 + $0x18] sm:$0xff]  ;;  %v1700_v56 = vpack.c.bf16 %v879_v51, %v878_v50  ;;  %v880_v58 = vld [vmem:[%s1944_s20 + $0x20] sm:$0xff]  ;;  %s593_s17 = scalar_lea.vmem %s2057_s10, %s1880_s22 }
  0x16   : > { %1514 = vmatmul.mubr.msk.f32.vlgmr.msra.gmra.mrb[0].mxu0 %vm609_vm1, %v606_v14  ;;  %v1721_v57 = vpack.c.bf16 %v973_v55, %v972_v54  ;;  %v881_v59 = vld [vmem:[%s1944_s20 + $0x28] sm:$0xff]  ;;  %v974_v60 = vld [vmem:[%s1949_s24 + $0x20] sm:$0xff]  ;;  %v882_v0 = vld [vmem:[%s1944_s20 + $0x30] sm:$0xff] }
  0x17   : > { %1677 = vmatpush3.bf16.msra.mxu0 %v1655_v6  ;;  %1575 = vmatprep.mubr.msk.f32.mxu0 %vm1775_vm0, %v1776_v2  ;;  %v1703_v61 = vpack.c.bf16 %v881_v59, %v880_v58  ;;  %v975_v62 = vld [vmem:[%s1949_s24 + $0x28] sm:$0xff]  ;;  %v883_v3 = vld [vmem:[%s1944_s20 + $0x38] sm:$0xff]  ;;  %v976_v4 = vld [vmem:[%s1949_s24 + $0x30] sm:$0xff] }
  0x18   : > { %1678 = vmatprep.subr.bf16.mxu0 %v1774_v1  ;;  %1668 = vmatpush3.bf16.msra.mxu1 %v1667_v20  ;;  %v1724_v63 = vpack.c.bf16 %v975_v62, %v974_v60  ;;  %v1706_v5 = vpack.c.bf16 %v883_v3, %v882_v0  ;;  %v977_v6 = vld [vmem:[%s1949_s24 + $0x38] sm:$0xff]  ;;  %v884_v8 = vld [vmem:[%s1944_s20 + $0x40] sm:$0xff]  ;;  %v885_v9 = vld [vmem:[%s1944_s20 + $0x48] sm:$0xff] }
  0x19   : > { %1669 = vmatprep.subr.bf16.mxu1 %v1774_v1  ;;  %v978_v10 = vld [vmem:[%s1949_s24 + $0x40] sm:$0xff]  ;;  %v1709_v11 = vpack.c.bf16 %v885_v9, %v884_v8  ;;  %v979_v12 = vld [vmem:[%s1949_s24 + $0x48] sm:$0xff]  ;;  %v886_v14 = vld [vmem:[%s1944_s20 + $0x50] sm:$0xff] }
  0x1a   : > { %v887_v15 = vld [vmem:[%s1944_s20 + $0x58] sm:$0xff]  ;;  %v980_v16 = vld [vmem:[%s1949_s24 + $0x50] sm:$0xff]  ;;  %v889_v21 = vld [vmem:[%s1944_s20 + $0x68] sm:$0xff] }
  0x1b   : > { %1680 = vmatpush3.bf16.msra.mxu0 %v1658_v7  ;;  %v1727_v7 = vpack.c.bf16 %v977_v6, %v976_v4  ;;  %v981_v18 = vld [vmem:[%s1949_s24 + $0x58] sm:$0xff]  ;;  %v982_v22 = vld [vmem:[%s1949_s24 + $0x60] sm:$0xff]  ;;  %v983_v24 = vld [vmem:[%s1949_s24 + $0x68] sm:$0xff]  ;;  %s605_s24 = scalar_lea.vmem %s2060_s13, %s1880_s22 }
  0x1c   : > { %1681 = vmatprep.subr.bf16.mxu0 %v1774_v1  ;;  %1671 = vmatpush3.bf16.msra.mxu1 %v1670_v23  ;;  %v1733_v19 = vpack.c.bf16 %v981_v18, %v980_v16  ;;  %v1736_v25 = vpack.c.bf16 %v983_v24, %v982_v22  ;;  %v1089_v42 = vld [vmem:[%s582_s30 + $0x8] sm:$0xff]  ;;  %v1091_v45 = vld [vmem:[%s582_s30 + $0x18] sm:$0xff]  ;;  %v1076_v9 = vld [vmem:[%s589_s14] sm:$0xff] }
  0x1d   : > { %1672 = vmatprep.subr.bf16.mxu1 %v1774_v1 }
  0x1f   : > { %1683 = vmatpush3.bf16.msra.mxu0 %v1661_v13  ;;  %v1730_v13 = vpack.c.bf16 %v979_v12, %v978_v10 }
  0x20   : > { %1684 = vmatprep.subr.bf16.mxu0 %v1774_v1  ;;  %1674 = vmatpush3.bf16.msra.mxu1 %v1673_v26 }
  0x21   : > { %1696 = vmatprep.subr.bf16.mxu1 %v1774_v1 }
  0x23   : > { %1686 = vmatpush3.bf16.msra.mxu0 %v1664_v17  ;;  %v1712_v17 = vpack.c.bf16 %v887_v15, %v886_v14 }
  0x24   : > { %1687 = vmatprep.subr.bf16.mxu0 %v1774_v1 }
  0x27   : > { %1689 = vmatpush3.bf16.msra.mxu0 %v1667_v20  ;;  %v888_v20 = vld [vmem:[%s1944_s20 + $0x60] sm:$0xff]  ;;  %s585_s20 = scalar_lea.vmem %s2055_s8, %s2062_s26 }
  0x28   : > { %1690 = vmatprep.subr.bf16.mxu0 %v1774_v1  ;;  %v1435_v15 = vld [vmem:[%s585_s20] ss:$0 sm:$0xff] }
  0x2b   : > { %1692 = vmatpush3.bf16.msra.mxu0 %v1670_v23  ;;  %v1715_v23 = vpack.c.bf16 %v889_v21, %v888_v20 }
  0x2c   : > { %1693 = vmatprep.subr.bf16.mxu0 %v1774_v1 }
  0x2f   : > { %1695 = vmatpush3.bf16.msra.mxu0 %v1673_v26  ;;  %v862_v26 = vlaneseq }
  0x30   : > { %1717 = vmatprep.subr.bf16.mxu0 %v1774_v1 }
  0xe9   : > { %v1933_v27 = vpop.f32.mrb[0].mxu0 }
  0xea   : > { %v684_v28 = vsel %vm683_vm2, %v1933_v27, 0.0  ;;  %v693_v29 = vmul.f32 %v1933_v27, %v1933_v27  ;;  %v1515_v30 = vpop.f32.mrb[1].mxu0 }
  0xeb   : > { %v685_v31 = vrot.slane %v684_v28, 4 }
  0xec   : > { %v694_v32 = vsel %vm683_vm2, %v693_v29, 0.0 }
  0xed   : > { %v686_v33 = vadd.f32 %v685_v31, %v684_v28  ;;  %v695_v34 = vrot.slane %v694_v32, 4  ;;  %v863_v28 = vshrl.u32 %v862_v26, 7 }
  0xef   : > { %v687_v35 = vrot.slane %v686_v33, 2  ;;  %v696_v36 = vadd.f32 %v695_v34, %v694_v32  ;;  %v864_v29 = vsub.s32 0, %v863_v28 }
  0xf1   : > { %v688_v37 = vadd.f32 %v687_v35, %v686_v33  ;;  %v697_v38 = vrot.slane %v696_v36, 2 }
  0xf3   : > { %v689_v39 = vrot.slane %v688_v37, 1  ;;  %v698_v40 = vadd.f32 %v697_v38, %v696_v36 }
  0xf5   : > { %v699_v43 = vrot.slane %v698_v40, 1  ;;  %v690_v44 = vadd.f32 %v689_v39, %v688_v37 }
  0xf7   : > { %v700_v48 = vadd.f32 %v699_v43, %v698_v40  ;;  %v692_v49 = vmul.f32 0.125, %v690_v44  ;;  %v1090_v43 = vld [vmem:[%s582_s30 + $0x10] sm:$0xff] }
  0xf8   : > { %v1742_v46 = vpack.c.bf16 %v1091_v45, %v1090_v43 }
  0xf9   : > { %v701_v53 = vmul.f32 0.125, %v700_v48  ;;  %1545 = vmatmul.mubr.msk.f32.vlgmr.msra.gmra.mrb[0].mxu1 %vm683_vm2, %v692_v49 }
  0xfa   : > { %1698 = vmatpush3.bf16.msra.mxu1 %v1697_v47  ;;  %1606 = vmatprep.mubr.msk.f32.mxu1 %vm1775_vm0, %v1776_v2  ;;  %v1433_v47 = vld [vmem:[%s577_s19] ss:$0 sm:$0xff] }
  0xfb   : > { %1576 = vmatmul.mubr.msk.f32.vlgmr.msra.gmra.mrb[2].mxu0 %vm683_vm2, %v701_v53  ;;  %1699 = vmatprep.subr.bf16.mxu1 %v1774_v1 }
  0xfc   : > { %1719 = vmatpush3.bf16.msra.mxu0 %v1718_v52  ;;  %1637 = vmatprep.mubr.msk.f32.mxu0 %vm1775_vm0, %v1776_v2 }
  0xfd   : > { %1720 = vmatprep.subr.bf16.mxu0 %v1774_v1 }
  0xfe   : > { %1701 = vmatpush3.bf16.msra.mxu1 %v1700_v56 }
  0xff   : > { %1702 = vmatprep.subr.bf16.mxu1 %v1774_v1 }
 0x100   : > { %1722 = vmatpush3.bf16.msra.mxu0 %v1721_v57 }
 0x101   : > { %1723 = vmatprep.subr.bf16.mxu0 %v1774_v1 }
 0x102   : > { %1704 = vmatpush3.bf16.msra.mxu1 %v1703_v61 }
 0x103   : > { %1705 = vmatprep.subr.bf16.mxu1 %v1774_v1 }
 0x104   : > { %1725 = vmatpush3.bf16.msra.mxu0 %v1724_v63 }
 0x105   : > { %1726 = vmatprep.subr.bf16.mxu0 %v1774_v1 }
 0x106   : > { %1707 = vmatpush3.bf16.msra.mxu1 %v1706_v5 }
 0x107   : > { %1708 = vmatprep.subr.bf16.mxu1 %v1774_v1 }
 0x108   : > { %1728 = vmatpush3.bf16.msra.mxu0 %v1727_v7 }
 0x109   : > { %1729 = vmatprep.subr.bf16.mxu0 %v1774_v1 }
 0x10a   : > { %1710 = vmatpush3.bf16.msra.mxu1 %v1709_v11 }
 0x10b   : > { %1711 = vmatprep.subr.bf16.mxu1 %v1774_v1 }
 0x10c   : > { %1731 = vmatpush3.bf16.msra.mxu0 %v1730_v13 }
 0x10d   : > { %1732 = vmatprep.subr.bf16.mxu0 %v1774_v1 }
 0x10e   : > { %1713 = vmatpush3.bf16.msra.mxu1 %v1712_v17 }
 0x10f   : > { %1714 = vmatprep.subr.bf16.mxu1 %v1774_v1 }
 0x110   : > { %1734 = vmatpush3.bf16.msra.mxu0 %v1733_v19 }
 0x111   : > { %1735 = vmatprep.subr.bf16.mxu0 %v1774_v1 }
 0x112   : > { %1716 = vmatpush3.bf16.msra.mxu1 %v1715_v23 }
 0x113   : > { %1738 = vmatprep.subr.bf16.mxu1 %v1774_v1 }
 0x114   : > { %1737 = vmatpush3.bf16.msra.mxu0 %v1736_v25 }
 0x1cc   : > { %v785_v30 = vpop.f32.mrb[0].mxu1 }
 0x1cd   : > { %v865_v31 = vrot.slane %v785_v30, %v864_v29  ;;  %v867_v32 = vmul.f32 %v785_v30, %v785_v30  ;;  %v1546_v33 = vpop.f32.mrb[1].mxu1 }
 0x1ce   : > { %v858_v34 = vpop.f32.mrb[2].mxu0 }
 0x1cf   : > { %v866_v35 = vsub.f32 %v1933_v27, %v865_v31  ;;  %v868_v36 = vsub.f32 %v858_v34, %v867_v32  ;;  %v1577_v37 = vpop.f32.mrb[3].mxu0  ;;  %v1088_v27 = vld [vmem:[%s582_s30] sm:$0xff] }
 0x1d0   : > { %v1739_v44 = vpack.c.bf16 %v1089_v42, %v1088_v27 }
 0x1d1   : > { %v869_v38 = vadd.f32 1e-05, %v868_v36 }
 0x1d3   : > { %1756 = vrsqrt.f32 %v869_v38 }
 0x1dd   : > { %v1757_v39 = vpop.eup %1756 }
 0x1de   : > { %v874_v40 = vrot.slane %v1757_v39, %v864_v29 }
 0x1e0   : > { %v875_v41 = vmul.f32 %v874_v40, %v866_v35 }
 0x1e2   : > { %1607 = vmatmul.mubr.msk.f32.vlgmr.msra.gmra.mrb[2].mxu1 %vm683_vm2, %v875_v41  ;;  %1638 = vmatmul.mubr.msk.f32.vlgmr.msra.gmra.mrb[4].mxu0 %vm683_vm2, %v875_v41 }
 0x1e3   : > { %1648 = vmatprep.mubr.msk.f32.mxu1 %vm1775_vm0, %v1776_v2  ;;  %1740 = vmatpush3.bf16.msra.mxu1 %v1739_v44  ;;  %v1431_v2 = vld [vmem:[%s569_s16] ss:$0 sm:$0xff] }
 0x1e4   : > { %1741 = vmatprep.subr.bf16.mxu1 %v1774_v1 }
 0x1e7   : > { %1743 = vmatpush3.bf16.msra.mxu1 %v1742_v46 }
 0x2b5   : > { %v966_v48 = vpop.f32.mrb[2].mxu1  ;;  %v1057_v49 = vpop.f32.mrb[4].mxu0 }
 0x2b6   : > { %v967_v50 = vadd.f32 %v1431_v2, %v966_v48  ;;  %v1058_v1 = vadd.f32 %v1433_v47, %v1057_v49  ;;  %v1608_v51 = vpop.f32.mrb[3].mxu1  ;;  %v1639_v52 = vpop.f32.mrb[5].mxu0 }
 0x2b8   : > { %1174 = vst.msk [vmem:[%s597_s23] sm:$0xff] %vm1099_vm3, %v967_v50  ;;  %v1062_v53 = vand.u32 2147483647, %v1058_v1  ;;  %v1061_v0 = vmax.f32 %v1058_v1, 0.0 }
 0x2ba   : > { %v1063_v54 = vsub.f32 0.0, %v1062_v53 }
 0x2bc   : > { %v1064_v55 = vmul.f32 1.442695, %v1063_v54 }
 0x2be   : > { %1758 = vpow2.f32 %v1064_v55 }
 0x2c8   : > { %v1759_v56 = vpop.eup %1758 }
 0x2c9   : > { %v1066_v57 = vadd.f32 1.0, %v1759_v56  ;;  %v1069_v58 = vmul.f32 -0.5, %v1759_v56  ;;  %v1072_v60 = vand.u32 2147483647, %v1759_v56 }
 0x2cb   : > { %1760 = vlog2.f32 %v1066_v57  ;;  %v1070_v59 = vadd.f32 1.0, %v1069_v58  ;;  %vm1073_vm4 = vcmp.lt.f32.partialorder %v1072_v60, 0.0004427343 }
 0x2cd   : > { %v1071_v63 = vmul.f32 %v1759_v56, %v1070_v59 }
 0x2d5   : > { %v1761_v61 = vpop.eup %1760 }
 0x2d6   : > { %v1068_v62 = vmul.f32 0.6931472, %v1761_v61 }
 0x2d8   : > { %v1074_v3 = vsel %vm1073_vm4, %v1071_v63, %v1068_v62 }
 0x2d9   : > { %v1075_v4 = vadd.f32 %v1074_v3, %v1061_v0 }
 0x2db   : > { %v1077_v5 = vmul.f32 1.442695, %v1075_v4  ;;  %1175 = vst.msk [vmem:[%s601_s28] sm:$0xff] %vm1099_vm3, %v1075_v4 }
 0x2dd   : > { %1762 = vpow2.f32 %v1077_v5 }
 0x2e7   : > { %v1763_v6 = vpop.eup %1762 }
 0x2e8   : > { %1764 = vrsqrt.f32 %v1763_v6  ;;  %vm1081_vm5 = vcmp.eq.f32.partialorder %v1763_v6, inf  ;;  %v1084_v10 = vand.u32 2147483648, %v1763_v6  ;;  %vm1083_vm6 = vcmp.eq.f32.partialorder %v1763_v6, 0.0 }
 0x2f2   : > { %v1765_v7 = vpop.eup %1764 }
 0x2f3   : > { %v1080_v8 = vmul.f32 %v1765_v7, %v1763_v6 }
 0x2f5   : > { %v1082_v11 = vsel %vm1081_vm5, %v1763_v6, %v1080_v8 }
 0x2f6   : > { %v1085_v12 = vsel %vm1083_vm6, %v1084_v10, %v1082_v11 }
 0x2f7   : > { %v1086_v13 = vmul.f32 %v1085_v12, %v1076_v9 }
 0x2f9   : > { %v1087_v14 = vadd.f32 %v1086_v13, %v967_v50 }
 0x2fb   : > { %1649 = vmatmul.mubr.msk.f32.vlgmr.msra.gmra.mrb[4].mxu1 %vm1099_vm3, %v1087_v14  ;;  %1173 = vst.msk [vmem:[%s593_s17] sm:$0xff] %vm1099_vm3, %v1087_v14 }
 0x3ce   : > { %v1169_v16 = vpop.f32.mrb[4].mxu1 }
 0x3cf   : > { %v1170_v17 = vadd.f32 %v1435_v15, %v1169_v16  ;;  %v1650_v18 = vpop.f32.mrb[5].mxu1 }
 0x3d1   : > { %1177 = vst.msk [vmem:[%s605_s24] sm:$0xff] %vm1176_vm7, %v1170_v17 }
 0x3d2 PF: > { %s24_s25 = sadd.s32 1, %s1772_s25  }
 0x3d3   : > { %p21_p4 = scmp.ge.s32.totalorder %s24_s25, 4  }
 0x3d5   :  { %23 = sbr.rel (!%p21_p4) target bundleno = 1 (0x1), region = 150 }

// kernel: model_forward.9
= control target key start
LH: loop header
LB: loop body
LE: loop exit
PB: predicated region body
PF: predicated region fallthrough
CT: control target
= control target key end

     0   :  { %vm48_vm0 = vcmask 195584   ;;  %vm158_vm1 = vcmask 261120   ;;  %vm376_vm2 = vcmask 64512   ;;  %vm498_vm3 = vcmask 7168   ;;  %s789_s2 = inlined_call_operand.vmem [shape: f32[24,32], index: 2, kind: input, shape index: {}]   ;;  %s790_s0 = inlined_call_operand.vmem [shape: f32[32,24], index: 0, kind: input, shape index: {}]   ;;  %s791_s5 = inlined_call_operand.vmem [shape: f32[32,8], index: 5, kind: input, shape index: {}]   ;;  %s792_s1 = inlined_call_operand.vmem [shape: f32[32,32], index: 1, kind: input, shape index: {}]   ;;  %s793_s4 = inlined_call_operand.vmem [shape: f32[32,8], index: 4, kind: input, shape index: {}]   ;;  %s794_s7 = inlined_call_operand.vmem [shape: f32[8,1], index: 7, kind: input, shape index: {}]   ;;  %s795_s3 = inlined_call_operand.vmem [shape: f32[1,32], index: 3, kind: input, shape index: {}]   ;;  %s796_s8 = inlined_call_operand.<no memory space> [shape: f32[1,1], index: 8, kind: input, shape index: {}]   ;;  %s797_s6 = inlined_call_operand.vmem [shape: f32[1,8], index: 6, kind: input, shape index: {}]   ;;  %s798_s9 = inlined_call_operand.vmem [shape: f32[32,1], index: 9, kind: output, shape index: {}]  }
   0x1   :  { %v38_v0 = vld [vmem:[%s789_s2] sm:$0xff]  ;;  %v39_v1 = vld [vmem:[%s789_s2 + $0x8] sm:$0xff]  ;;  %v40_v4 = vld [vmem:[%s789_s2 + $0x10] sm:$0xff]  ;;  %v14_v34 = vstv %s796_s8 }
   0x2   :  { %v606_v2 = vpack.c.bf16 %v39_v1, %v38_v0  ;;  %v34_v3 = vld [vmem:[%s790_s0] sm:$0xff]  ;;  %v155_v6 = vld [vmem:[%s791_s5 + $0x8] sm:$0xff]  ;;  %v156_v8 = vld [vmem:[%s791_s5 + $0x10] sm:$0xff]  ;;  %15 = vst [vmem:[#allocation2] sm:$0x1] %v14_v34 }
   0x3   :  { %564 = vmatprep.mubr.msk.f32.mxu0 %vm48_vm0, %v34_v3  ;;  %v154_v5 = vld [vmem:[%s791_s5] sm:$0xff]  ;;  %v157_v9 = vld [vmem:[%s791_s5 + $0x18] sm:$0xff]  ;;  %v147_v13 = vld [vmem:[%s793_s4 + $0x8] sm:$0xff] }
   0x4   :  { %607 = vmatprep.subr.bf16.mxu0 %v606_v2  ;;  %v610_v7 = vpack.c.bf16 %v155_v6, %v154_v5  ;;  %v150_v10 = vld [vmem:[%s792_s1] sm:$0xff]  ;;  %v614_v11 = vpack.c.bf16 %v157_v9, %v156_v8  ;;  %v35_v14 = vld [vmem:[%s790_s0 + $0x8] sm:$0xff]  ;;  %v36_v15 = vld [vmem:[%s790_s0 + $0x10] sm:$0xff] }
   0x5   :  { %609 = vmatpush3.bf16.msra.mxu0 %v606_v2  ;;  %578 = vmatprep.mubr.msk.f32.mxu1 %vm158_vm1, %v150_v10  ;;  %v146_v12 = vld [vmem:[%s793_s4] sm:$0xff]  ;;  %v37_v17 = vld [vmem:[%s790_s0 + $0x18] sm:$0xff]  ;;  %v151_v18 = vld [vmem:[%s792_s1 + $0x8] sm:$0xff] }
   0x6   :  { %562 = vmatprep.subr.mxu0 %v40_v4  ;;  %611 = vmatprep.subr.bf16.mxu1 %v610_v7  ;;  %v618_v16 = vpack.c.bf16 %v147_v13, %v146_v12  ;;  %v148_v19 = vld [vmem:[%s793_s4 + $0x10] sm:$0xff]  ;;  %v149_v20 = vld [vmem:[%s793_s4 + $0x18] sm:$0xff]  ;;  %v368_v24 = vld [vmem:[%s794_s7] sm:$0xff] }
   0x7   :  { %613 = vmatpush3.bf16.msra.mxu1 %v610_v7  ;;  %v152_v21 = vld [vmem:[%s792_s1 + $0x10] sm:$0xff]  ;;  %v622_v22 = vpack.c.bf16 %v149_v20, %v148_v19  ;;  %v153_v23 = vld [vmem:[%s792_s1 + $0x18] sm:$0xff]  ;;  %v507_v25 = vld [vmem:[%s795_s3] ss:$0 sm:$0xff] }
   0x8   :  { %615 = vmatprep.subr.bf16.mxu1 %v614_v11  ;;  %v520_v35 = vld [vmem:[%s797_s6] ss:$0 sm:$0xff] }
   0x9   :  { %563 = vmatpush3.msra.mxu0 %v40_v4  ;;  %v521_v48 = vld [vmem:[#allocation2] ss:$0 sm:$0xff] }
   0xa   :  { %565 = vmatmul.mubr.msk.f32.vlgmr.msra.gmra.mrb[0].mxu0 %vm48_vm0, %v35_v14  ;;  %598 = vmatprep.subr.mxu0 %v368_v24 }
   0xb   :  { %567 = vmatprep.mubr.msk.f32.mxu0 %vm48_vm0, %v36_v15  ;;  %617 = vmatpush3.bf16.msra.mxu1 %v614_v11 }
   0xc   :  { %619 = vmatprep.subr.bf16.mxu1 %v618_v16  ;;  %599 = vmatpush3.msra.mxu0 %v368_v24 }
   0xe   :  { %568 = vmatmul.mubr.msk.f32.gmra.mrb[2].mxu0 %vm48_vm0, %v37_v17  ;;  %579 = vmatmul.mubr.msk.f32.vlgmr.msra.gmra.mrb[0].mxu1 %vm158_vm1, %v151_v18 }
   0xf   :  { %621 = vmatpush3.bf16.msra.mxu1 %v618_v16  ;;  %581 = vmatprep.mubr.msk.f32.mxu1 %vm158_vm1, %v152_v21 }
  0x10   :  { %623 = vmatprep.subr.bf16.mxu1 %v622_v22 }
  0x12   :  { %582 = vmatmul.mubr.msk.f32.gmra.mrb[2].mxu1 %vm158_vm1, %v153_v23 }
  0x13   :  { %625 = vmatpush3.bf16.msra.mxu1 %v622_v22 }
  0xdd   :  { %v566_v26 = vpop.f32.mrb[0].mxu0 }
  0xde   :  { %v127_v27 = vpop.f32.mrb[1].mxu0  ;;  %v133_v29 = vadd.f32 %v566_v26, %v507_v25 }
  0xdf   :  { %v128_v28 = vadd.f32 %v507_v25, %v127_v27 }
  0xe1   :  { %v569_v30 = vpop.f32.mrb[2].mxu0  ;;  %592 = vmatprep.mubr.msk.f32.mxu1 %vm158_vm1, %v128_v28 }
  0xe2   :  { %v137_v31 = vpop.f32.mrb[3].mxu0  ;;  %593 = vmatmul.mubr.msk.f32.vlgmr.msra.gmra.mrb[0].mxu1 %vm158_vm1, %v133_v29  ;;  %v143_v33 = vadd.f32 %v569_v30, %v507_v25 }
  0xe3   :  { %v138_v32 = vadd.f32 %v507_v25, %v137_v31 }
  0xe5   :  { %595 = vmatprep.mubr.msk.f32.mxu1 %vm158_vm1, %v138_v32 }
  0xe6   :  { %596 = vmatmul.mubr.msk.f32.gmra.mrb[2].mxu1 %vm158_vm1, %v143_v33 }
 0x1b5   :  { %v594_v36 = vpop.f32.mrb[0].mxu1 }
 0x1b6   :  { %v361_v37 = vadd.f32 %v594_v36, %v520_v35  ;;  %v334_v38 = vpop.f32.mrb[1].mxu1 }
 0x1b7   :  { %v360_v39 = vadd.f32 %v520_v35, %v334_v38 }
 0x1b8   :  { %v365_v42 = vmax.f32 %v361_v37, 0.0 }
 0x1b9   :  { %v364_v40 = vmax.f32 %v360_v39, 0.0  ;;  %v597_v41 = vpop.f32.mrb[2].mxu1 }
 0x1ba   :  { %v363_v43 = vadd.f32 %v597_v41, %v520_v35  ;;  %v344_v44 = vpop.f32.mrb[3].mxu1 }
 0x1bb   :  { %v362_v45 = vadd.f32 %v520_v35, %v344_v44  ;;  %600 = vmatprep.mubr.msk.f32.mxu0 %vm376_vm2, %v364_v40 }
 0x1bc   :  { %601 = vmatmul.mubr.msk.f32.vlgmr.msra.gmra.mrb[4].mxu0 %vm376_vm2, %v365_v42  ;;  %v367_v47 = vmax.f32 %v363_v43, 0.0 }
 0x1bd   :  { %v366_v46 = vmax.f32 %v362_v45, 0.0 }
 0x1bf   :  { %603 = vmatprep.mubr.msk.f32.mxu0 %vm376_vm2, %v366_v46 }
 0x1c0   :  { %604 = vmatmul.mubr.msk.f32.gmra.mrb[6].mxu0 %vm376_vm2, %v367_v47 }
 0x28f   :  { %v602_v49 = vpop.f32.mrb[4].mxu0 }
 0x290   :  { %v461_v50 = vadd.f32 %v602_v49, %v521_v48  ;;  %v455_v51 = vpop.f32.mrb[5].mxu0 }
 0x291   :  { %v456_v52 = vadd.f32 %v521_v48, %v455_v51 }
 0x292   :  { %v527_v53 = vmul.f32 -1.442695, %v461_v50 }
 0x293   :  { %v526_v54 = vmul.f32 -1.442695, %v456_v52  ;;  %v605_v55 = vpop.f32.mrb[6].mxu0 }
 0x294   :  { %630 = vpow2.f32 %v527_v53  ;;  %v471_v56 = vadd.f32 %v605_v55, %v521_v48  ;;  %v465_v57 = vpop.f32.mrb[7].mxu0 }
 0x295   :  { %632 = vpow2.f32 %v526_v54  ;;  %v466_v58 = vadd.f32 %v521_v48, %v465_v57 }
 0x296   :  { %v529_v59 = vmul.f32 -1.442695, %v471_v56 }
 0x297   :  { %v528_v60 = vmul.f32 -1.442695, %v466_v58 }
 0x298   :  { %634 = vpow2.f32 %v529_v59 }
 0x299   :  { %636 = vpow2.f32 %v528_v60 }
 0x29e   :  { %v631_v61 = vpop.eup %630 }
 0x29f   :  { %v633_v62 = vpop.eup %632  ;;  %v487_v63 = vadd.f32 1.0, %v631_v61 }
 0x2a0   :  { %v486_v0 = vadd.f32 1.0, %v633_v62 }
 0x2a1   :  { %638 = vrcp.f32 %v487_v63 }
 0x2a2   :  { %v635_v1 = vpop.eup %634  ;;  %640 = vrcp.f32 %v486_v0 }
 0x2a3   :  { %v637_v2 = vpop.eup %636  ;;  %v489_v3 = vadd.f32 1.0, %v635_v1 }
 0x2a4   :  { %v488_v4 = vadd.f32 1.0, %v637_v2 }
 0x2a5   :  { %642 = vrcp.f32 %v489_v3 }
 0x2a6   :  { %644 = vrcp.f32 %v488_v4 }
 0x2ab   :  { %v639_v5 = vpop.eup %638 }
 0x2ac   :  { %v641_v6 = vpop.eup %640  ;;  %500 = vst.msk [vmem:[%s798_s9 + $0x8] sm:$0xff] %vm498_vm3, %v639_v5 }
 0x2ad   :  { %499 = vst.msk [vmem:[%s798_s9] sm:$0xff] %vm498_vm3, %v641_v6 }
 0x2af   :  { %v643_v7 = vpop.eup %642 }
 0x2b0   :  { %v645_v8 = vpop.eup %644  ;;  %502 = vst.msk [vmem:[%s798_s9 + $0x18] sm:$0xff] %vm498_vm3, %v643_v7 }
 0x2b1   :  { %501 = vst.msk [vmem:[%s798_s9 + $0x10] sm:$0xff] %vm498_vm3, %v645_v8 }

// kernel: model_forward.7
= control target key start
LH: loop header
LB: loop body
LE: loop exit
PB: predicated region body
PF: predicated region fallthrough
CT: control target
= control target key end

     0   :  { %s4609_s0 = inlined_call_operand.vmem [shape: f32[2,192,16], index: 0, kind: input, shape index: {}]   ;;  %s4610_s1 = inlined_call_operand.vmem [shape: f32[2,96,1], index: 1, kind: input, shape index: {}]   ;;  %s4611_s2 = inlined_call_operand.vmem [shape: f32[2,1,16], index: 2, kind: input, shape index: {}]   ;;  %s4612_s3 = inlined_call_operand.vmem [shape: f32[2,1,16], index: 3, kind: input, shape index: {}]   ;;  %s4613_s4 = inlined_call_operand.vmem [shape: f32[2,16,32], index: 4, kind: input, shape index: {}]   ;;  %s4614_s5 = inlined_call_operand.vmem [shape: f32[2,16,32], index: 5, kind: input, shape index: {}]   ;;  %s4615_s6 = inlined_call_operand.vmem [shape: f32[2,16,32], index: 6, kind: input, shape index: {}]   ;;  %s4616_s7 = inlined_call_operand.vmem [shape: f32[2,16,32], index: 7, kind: input, shape index: {}]   ;;  %s4617_s8 = inlined_call_operand.vmem [shape: f32[2,1,32], index: 8, kind: input, shape index: {}]   ;;  %s4618_s9 = inlined_call_operand.vmem [shape: f32[2,1,32], index: 9, kind: input, shape index: {}]   ;;  %s4619_s10 = inlined_call_operand.vmem [shape: f32[2,48,32], index: 10, kind: input, shape index: {}]   ;;  %s4620_s11 = inlined_call_operand.vmem [shape: f32[48,96], index: 11, kind: input, shape index: {}]   ;;  %s4621_s12 = inlined_call_operand.vmem [shape: f32[96,48], index: 12, kind: input, shape index: {}]   ;;  %s4622_s13 = inlined_call_operand.vmem [shape: f32[4,96], index: 13, kind: input, shape index: {}]   ;;  %s4623_s14 = inlined_call_operand.vmem [shape: f32[16,1], index: 14, kind: input, shape index: {}]   ;;  %s4624_s15 = inlined_call_operand.vmem [shape: f32[32,1], index: 15, kind: input, shape index: {}]   ;;  %s4625_s16 = inlined_call_operand.<no memory space> [shape: f32[1,1], index: 16, kind: input, shape index: {}]   ;;  %s4626_s17 = inlined_call_operand.vmem [shape: f32[96,8], index: 17, kind: input, shape index: {}]   ;;  %s4627_s18 = inlined_call_operand.vmem [shape: f32[1,8], index: 18, kind: input, shape index: {}]   ;;  %s4628_s19 = inlined_call_operand.hbm [shape: f32[4,8], index: 19, kind: output, shape index: {}]  }
   0x1   :  { %4633 = sst [smem:[#allocation6_spill]] %s4609_s0  ;;  %v24_v0 = vstv %s4625_s16 }
   0x2   :  { %4634 = sst [smem:[#allocation7_spill]] %s4610_s1  ;;  %25 = vst [vmem:[#allocation2] sm:$0x1] %v24_v0 }
   0x3   :  { %4635 = sst [smem:[#allocation8_spill]] %s4611_s2 }
   0x4   :  { %4636 = sst [smem:[#allocation9_spill]] %s4612_s3 }
   0x5   :  { %s4637_s1 = sld [smem:[#allocation7_spill]]  ;;  %v3726_v3 = vmov 0  }
   0x6   :  { %3653 = vset.pattern.permute.xlu1 %v3726_v3  ;;  %3652 = vset.pattern.permute.xlu0 %v3726_v3 }
   0xb   :  { %v91_v1 = vld [vmem:[%s4637_s1 + $0x10] sm:$0xff]  ;;  %v89_v2 = vld [vmem:[%s4637_s1] sm:$0xff]  ;;  %v92_v4 = vld [vmem:[%s4637_s1 + $0x18] sm:$0xff] }
   0xc   :  { %114 = vperm.xlu1 %3653, %v91_v1   ;;  %104 = vperm.xlu0 %3652, %v89_v2   ;;  %v90_v5 = vld [vmem:[%s4637_s1 + $0x8] sm:$0xff]  ;;  %v93_v7 = vld [vmem:[%s4637_s1 + $0x20] sm:$0xff] }
   0xd   :  { %v94_v6 = vld [vmem:[%s4637_s1 + $0x28] sm:$0xff] }
  0x10   :  { %119 = vperm.xlu1 %3653, %v92_v4   ;;  %109 = vperm.xlu0 %3652, %v90_v5  }
  0x11   :  { %26 = vsyncpa [#allocation4], 0  ;;  %v96_v8 = vld [vmem:[%s4637_s1 + $0x38] sm:$0xff]  ;;  %v95_v9 = vld [vmem:[%s4637_s1 + $0x30] sm:$0xff]  ;;  %s4638_s28 = sld [smem:[#allocation6_spill]]  ;;  %vm205_vm0 = vcmask 785408  }
  0x12   :  { %v98_v10 = vld [vmem:[%s4637_s1 + $0x48] sm:$0xff]  ;;  %v97_v11 = vld [vmem:[%s4637_s1 + $0x40] sm:$0xff]  ;;  %v100_v12 = vld [vmem:[%s4637_s1 + $0x58] sm:$0xff]  ;;  %s4639_s23 = sld [smem:[#allocation8_spill]]  ;;  %s4640_s16 = sld [smem:[#allocation9_spill]]  ;;  %vm418_vm1 = vcmask 130048  }
  0x13   :  { %v99_v13 = vld [vmem:[%s4637_s1 + $0x50] sm:$0xff]  ;;  %v2711_v17 = vld [vmem:[%s4637_s1 + $0x68] sm:$0xff]  ;;  %v2710_v18 = vld [vmem:[%s4637_s1 + $0x60] sm:$0xff]  ;;  %vm1830_vm14 = vcmask 392192  }
  0x14   :  { %129 = vperm.xlu1 %3653, %v94_v6   ;;  %124 = vperm.xlu0 %3652, %v93_v7   ;;  %v2713_v22 = vld [vmem:[%s4637_s1 + $0x78] sm:$0xff]  ;;  %v2712_v23 = vld [vmem:[%s4637_s1 + $0x70] sm:$0xff]  ;;  %v2715_v27 = vld [vmem:[%s4637_s1 + $0x88] sm:$0xff] }
  0x15   :  { %v2714_v28 = vld [vmem:[%s4637_s1 + $0x80] sm:$0xff]  ;;  %v2717_v33 = vld [vmem:[%s4637_s1 + $0x98] sm:$0xff]  ;;  %v2716_v34 = vld [vmem:[%s4637_s1 + $0x90] sm:$0xff] }
  0x16   :  { %v3915_v32 = vld [vmem:[%s4620_s11] sm:$0xff]  ;;  %v2719_v38 = vld [vmem:[%s4637_s1 + $0xa8] sm:$0xff]  ;;  %v2721_v43 = vld [vmem:[%s4637_s1 + $0xb8] sm:$0xff] }
  0x17   :  { %v65_v14 = vld [vmem:[%s4638_s28] sm:$0xff]  ;;  %v66_v15 = vld [vmem:[%s4638_s28 + $0x8] sm:$0xff]  ;;  %v67_v19 = vld [vmem:[%s4638_s28 + $0x10] sm:$0xff]  ;;  %3103 = vmatprep.mubr.msk.f32.mxu1 %vm205_vm0, %v3915_v32  ;;  %3070 = vmatprep.mubr.msk.f32.mxu0 %vm205_vm0, %v3915_v32 }
  0x18   :  { %139 = vperm.xlu1 %3653, %v96_v8   ;;  %134 = vperm.xlu0 %3652, %v95_v9   ;;  %v3417_v16 = vpack.c.bf16 %v66_v15, %v65_v14  ;;  %v68_v20 = vld [vmem:[%s4638_s28 + $0x18] sm:$0xff]  ;;  %v69_v24 = vld [vmem:[%s4638_s28 + $0x20] sm:$0xff]  ;;  %v70_v25 = vld [vmem:[%s4638_s28 + $0x28] sm:$0xff] }
  0x19   :  { %v3421_v21 = vpack.c.bf16 %v68_v20, %v67_v19  ;;  %v3425_v26 = vpack.c.bf16 %v70_v25, %v69_v24  ;;  %v71_v29 = vld [vmem:[%s4638_s28 + $0x30] sm:$0xff]  ;;  %v72_v30 = vld [vmem:[%s4638_s28 + $0x38] sm:$0xff]  ;;  %v73_v35 = vld [vmem:[%s4638_s28 + $0x40] sm:$0xff] }
  0x1a   :  { %3418 = vmatprep.subr.bf16.mxu0 %v3417_v16  ;;  %v3429_v31 = vpack.c.bf16 %v72_v30, %v71_v29  ;;  %v74_v36 = vld [vmem:[%s4638_s28 + $0x48] sm:$0xff]  ;;  %v2718_v39 = vld [vmem:[%s4637_s1 + $0xa0] sm:$0xff]  ;;  %v75_v40 = vld [vmem:[%s4638_s28 + $0x50] sm:$0xff] }
  0x1b   :  { %3420 = vmatpush3.bf16.msra.mxu0 %v3417_v16  ;;  %v3433_v37 = vpack.c.bf16 %v74_v36, %v73_v35  ;;  %v76_v41 = vld [vmem:[%s4638_s28 + $0x58] sm:$0xff]  ;;  %v2720_v44 = vld [vmem:[%s4637_s1 + $0xb0] sm:$0xff]  ;;  %v3954_v45 = vld [vmem:[%s4620_s11 + $0x8] sm:$0xff] }
  0x1c   :  { %149 = vperm.xlu1 %3653, %v98_v10   ;;  %144 = vperm.xlu0 %3652, %v97_v11   ;;  %v3437_v42 = vpack.c.bf16 %v76_v41, %v75_v40  ;;  %v3959_v46 = vld [vmem:[%s4620_s11 + $0x10] sm:$0xff]  ;;  %v416_v47 = vld [vmem:[%s4614_s5] sm:$0xff]  ;;  %v417_v48 = vld [vmem:[%s4614_s5 + $0x8] sm:$0xff] }
  0x1d   :  { %3422 = vmatprep.subr.bf16.mxu0 %v3421_v21  ;;  %v3465_v49 = vpack.c.bf16 %v417_v48, %v416_v47  ;;  %v3974_v50 = vld [vmem:[%s4620_s11 + $0x18] sm:$0xff]  ;;  %v3979_v51 = vld [vmem:[%s4620_s11 + $0x20] sm:$0xff]  ;;  %v3988_v52 = vld [vmem:[%s4620_s11 + $0x28] sm:$0xff] }
  0x1e   :  { %v2646_v53 = vld [vmem:[%s4639_s23] ss:$0 sm:$0xff]  ;;  %v415_v41 = vld [vmem:[%s4613_s4 + $0x8] sm:$0xff] }
  0x1f   :  { %3424 = vmatpush3.bf16.msra.mxu0 %v3421_v21  ;;  %v2647_v58 = vld [vmem:[%s4640_s16] ss:$0 sm:$0xff] }
  0x20   :  { %159 = vperm.xlu1 %3653, %v100_v12   ;;  %154 = vperm.xlu0 %3652, %v99_v13   ;;  %v414_v40 = vld [vmem:[%s4613_s4] sm:$0xff] }
  0x21   :  { %3426 = vmatprep.subr.bf16.mxu0 %v3425_v26 }
  0x23   :  { %3428 = vmatpush3.bf16.msra.mxu0 %v3425_v26 }
  0x24   :  { %1008 = vperm.xlu1 %3653, %v2711_v17   ;;  %1003 = vperm.xlu0 %3652, %v2710_v18  }
  0x25   :  { %3430 = vmatprep.subr.bf16.mxu0 %v3429_v31 }
  0x27   :  { %3432 = vmatpush3.bf16.msra.mxu0 %v3429_v31 }
  0x28   :  { %1018 = vperm.xlu1 %3653, %v2713_v22   ;;  %1013 = vperm.xlu0 %3652, %v2712_v23  }
  0x29   :  { %3434 = vmatprep.subr.bf16.mxu0 %v3433_v37 }
  0x2b   :  { %3436 = vmatpush3.bf16.msra.mxu0 %v3433_v37  ;;  %v658_v37 = vld [vmem:[%s4615_s6] sm:$0xff] }
  0x2c   :  { %1028 = vperm.xlu1 %3653, %v2715_v27   ;;  %1023 = vperm.xlu0 %3652, %v2714_v28  }
  0x2d   :  { %3438 = vmatprep.subr.bf16.mxu0 %v3437_v42 }
  0x2f   :  { %3440 = vmatpush3.bf16.msra.mxu0 %v3437_v42  ;;  %v3469_v42 = vpack.c.bf16 %v415_v41, %v414_v40 }
  0x30   :  { %1038 = vperm.xlu1 %3653, %v2717_v33   ;;  %1033 = vperm.xlu0 %3652, %v2716_v34   ;;  %v660_v33 = vld [vmem:[%s4616_s7] sm:$0xff]  ;;  %v661_v34 = vld [vmem:[%s4616_s7 + $0x8] sm:$0xff] }
  0x31   :  { %3466 = vmatprep.subr.bf16.mxu0 %v3465_v49  ;;  %v3473_v36 = vpack.c.bf16 %v661_v34, %v660_v33  ;;  %v2690_v34 = vld [vmem:[%s4638_s28 + $0xe0] sm:$0xff] }
  0x32   :  { %3071 = vmatmul.mubr.msk.f32.vlgmr.msra.gmra.mrb[0].mxu0 %vm205_vm0, %v3954_v45 }
  0x33   :  { %3073 = vmatprep.mubr.msk.f32.mxu0 %vm205_vm0, %v3959_v46  ;;  %3468 = vmatpush3.bf16.msra.mxu0 %v3465_v49 }
  0x34   :  { %1048 = vperm.xlu1 %3653, %v2719_v38   ;;  %1043 = vperm.xlu0 %3652, %v2718_v39   ;;  %v659_v38 = vld [vmem:[%s4615_s6 + $0x8] sm:$0xff] }
  0x35   :  { %v3477_v39 = vpack.c.bf16 %v659_v38, %v658_v37  ;;  %3470 = vmatprep.subr.bf16.mxu0 %v3469_v42 }
  0x36   :  { %3074 = vmatmul.mubr.msk.f32.gmra.mrb[2].mxu0 %vm205_vm0, %v3974_v50 }
  0x37   :  { %3076 = vmatprep.mubr.msk.f32.mxu0 %vm205_vm0, %v3979_v51 }
  0x38   :  { %1058 = vperm.xlu1 %3653, %v2721_v43   ;;  %1053 = vperm.xlu0 %3652, %v2720_v44  }
  0x3a   :  { %3077 = vmatmul.mubr.msk.f32.gmra.mrb[4].mxu0 %vm205_vm0, %v3988_v52 }
  0x8b   :  { %v115_v54 = vpop.permute.xlu1 %114  ;;  %v105_v55 = vpop.permute.xlu0 %104 }
  0x8c   :  { %v170_v56 = vmul.f32 %v2646_v53, %v115_v54  ;;  %v168_v57 = vmul.f32 %v2646_v53, %v105_v55 }
  0x8e   :  { %v189_v63 = vadd.f32 %v2647_v58, %v170_v56  ;;  %v187_v0 = vadd.f32 %v2647_v58, %v168_v57  ;;  %v4039_v56 = vld [vmem:[%s4639_s23 + $0x1] ss:$0 sm:$0xff] }
  0x8f   :  { %v120_v59 = vpop.permute.xlu1 %119  ;;  %v110_v60 = vpop.permute.xlu0 %109 }
  0x90   :  { %v171_v61 = vmul.f32 %v2646_v53, %v120_v59  ;;  %v169_v62 = vmul.f32 %v2646_v53, %v110_v60  ;;  %v4046_v60 = vld [vmem:[%s4640_s16 + $0x1] ss:$0 sm:$0xff] }
  0x92   :  { %v190_v1 = vadd.f32 %v2647_v58, %v171_v61  ;;  %v188_v2 = vadd.f32 %v2647_v58, %v169_v62  ;;  %v2686_v62 = vld [vmem:[%s4638_s28 + $0xc0] sm:$0xff] }
  0x93   :  { %v130_v3 = vpop.permute.xlu1 %129  ;;  %v125_v4 = vpop.permute.xlu0 %124 }
  0x94   :  { %v173_v5 = vmul.f32 %v2646_v53, %v130_v3  ;;  %v172_v6 = vmul.f32 %v2646_v53, %v125_v4  ;;  %v3441_v7 = vpack.c.bf16 %v188_v2, %v187_v0  ;;  %v3445_v10 = vpack.c.bf16 %v190_v1, %v189_v63  ;;  %v2687_v63 = vld [vmem:[%s4638_s28 + $0xc8] sm:$0xff] }
  0x96   :  { %v192_v8 = vadd.f32 %v2647_v58, %v173_v5  ;;  %v191_v9 = vadd.f32 %v2647_v58, %v172_v6  ;;  %3442 = vmatprep.subr.bf16.mxu1 %v3441_v7  ;;  %v3481_v5 = vpack.c.bf16 %v2687_v63, %v2686_v62  ;;  %v2697_v62 = vld [vmem:[%s4638_s28 + $0x118] sm:$0xff] }
  0x97   :  { %v140_v11 = vpop.permute.xlu1 %139  ;;  %3444 = vmatpush3.bf16.msra.mxu1 %v3441_v7  ;;  %v135_v12 = vpop.permute.xlu0 %134 }
  0x98   :  { %v175_v13 = vmul.f32 %v2646_v53, %v140_v11  ;;  %v174_v14 = vmul.f32 %v2646_v53, %v135_v12  ;;  %3446 = vmatprep.subr.bf16.mxu1 %v3445_v10  ;;  %v3449_v17 = vpack.c.bf16 %v192_v8, %v191_v9 }
  0x9a   :  { %v194_v15 = vadd.f32 %v2647_v58, %v175_v13  ;;  %v193_v16 = vadd.f32 %v2647_v58, %v174_v14 }
  0x9b   :  { %v150_v18 = vpop.permute.xlu1 %149  ;;  %3448 = vmatpush3.bf16.msra.mxu1 %v3445_v10  ;;  %v145_v19 = vpop.permute.xlu0 %144 }
  0x9c   :  { %v177_v20 = vmul.f32 %v2646_v53, %v150_v18  ;;  %v176_v21 = vmul.f32 %v2646_v53, %v145_v19  ;;  %3450 = vmatprep.subr.bf16.mxu1 %v3449_v17  ;;  %v3453_v24 = vpack.c.bf16 %v194_v15, %v193_v16 }
  0x9e   :  { %v196_v22 = vadd.f32 %v2647_v58, %v177_v20  ;;  %v195_v23 = vadd.f32 %v2647_v58, %v176_v21 }
  0x9f   :  { %v160_v25 = vpop.permute.xlu1 %159  ;;  %3452 = vmatpush3.bf16.msra.mxu1 %v3449_v17  ;;  %v155_v26 = vpop.permute.xlu0 %154 }
  0xa0   :  { %v179_v27 = vmul.f32 %v2646_v53, %v160_v25  ;;  %v178_v28 = vmul.f32 %v2646_v53, %v155_v26  ;;  %3454 = vmatprep.subr.bf16.mxu1 %v3453_v24  ;;  %v3457_v31 = vpack.c.bf16 %v196_v22, %v195_v23 }
  0xa2   :  { %v198_v29 = vadd.f32 %v2647_v58, %v179_v27  ;;  %v197_v30 = vadd.f32 %v2647_v58, %v178_v28  ;;  %v2688_v27 = vld [vmem:[%s4638_s28 + $0xd0] sm:$0xff]  ;;  %v2689_v28 = vld [vmem:[%s4638_s28 + $0xd8] sm:$0xff] }
  0xa3   :  { %3456 = vmatpush3.bf16.msra.mxu1 %v3453_v24  ;;  %v1009_v54 = vpop.permute.xlu1 %1008  ;;  %v1004_v55 = vpop.permute.xlu0 %1003  ;;  %v3485_v33 = vpack.c.bf16 %v2689_v28, %v2688_v27 }
  0xa4   :  { %3458 = vmatprep.subr.bf16.mxu1 %v3457_v31  ;;  %v3461_v35 = vpack.c.bf16 %v198_v29, %v197_v30  ;;  %v1068_v57 = vmul.f32 %v4039_v56, %v1009_v54  ;;  %v1067_v58 = vmul.f32 %v4039_v56, %v1004_v55  ;;  %v2694_v55 = vld [vmem:[%s4638_s28 + $0x100] sm:$0xff] }
  0xa6   :  { %v1088_v0 = vadd.f32 %v4046_v60, %v1068_v57  ;;  %v1087_v1 = vadd.f32 %v4046_v60, %v1067_v58 }
  0xa7   :  { %3460 = vmatpush3.bf16.msra.mxu1 %v3457_v31  ;;  %v1019_v59 = vpop.permute.xlu1 %1018  ;;  %v1014_v61 = vpop.permute.xlu0 %1013 }
  0xa8   :  { %3462 = vmatprep.subr.bf16.mxu1 %v3461_v35  ;;  %v3505_v7 = vpack.c.bf16 %v1088_v0, %v1087_v1  ;;  %v1070_v10 = vmul.f32 %v4039_v56, %v1019_v59  ;;  %v1069_v11 = vmul.f32 %v4039_v56, %v1014_v61  ;;  %v2696_v61 = vld [vmem:[%s4638_s28 + $0x110] sm:$0xff]  ;;  %v2757_v1 = vld [vmem:[%s4615_s6 + $0x18] sm:$0xff] }
  0xaa   :  { %v1090_v16 = vadd.f32 %v4046_v60, %v1070_v10  ;;  %v1089_v17 = vadd.f32 %v4046_v60, %v1069_v11 }
  0xab   :  { %3464 = vmatpush3.bf16.msra.mxu1 %v3461_v35  ;;  %v1029_v3 = vpop.permute.xlu1 %1028  ;;  %v1024_v6 = vpop.permute.xlu0 %1023  ;;  %v2691_v35 = vld [vmem:[%s4638_s28 + $0xe8] sm:$0xff] }
  0xac   :  { %3474 = vmatprep.subr.bf16.mxu1 %v3473_v36  ;;  %v1072_v18 = vmul.f32 %v4039_v56, %v1029_v3  ;;  %v1071_v19 = vmul.f32 %v4039_v56, %v1024_v6  ;;  %v3509_v26 = vpack.c.bf16 %v1090_v16, %v1089_v17  ;;  %v3489_v40 = vpack.c.bf16 %v2691_v35, %v2690_v34  ;;  %v2738_v3 = vld [vmem:[%s4613_s4 + $0x10] sm:$0xff]  ;;  %v2685_v6 = vld [vmem:[%s4618_s9] ss:$0 sm:$0xff] }
  0xae   :  { %3104 = vmatmul.mubr.msk.f32.vlgmr.msra.gmra.mrb[0].mxu1 %vm205_vm0, %v3954_v45  ;;  %v1092_v24 = vadd.f32 %v4046_v60, %v1072_v18  ;;  %v1091_v25 = vadd.f32 %v4046_v60, %v1071_v19 }
  0xaf   :  { %3106 = vmatprep.mubr.msk.f32.mxu1 %vm205_vm0, %v3959_v46  ;;  %3476 = vmatpush3.bf16.msra.mxu1 %v3473_v36  ;;  %v1039_v12 = vpop.permute.xlu1 %1038  ;;  %v1034_v13 = vpop.permute.xlu0 %1033 }
  0xb0   :  { %3478 = vmatprep.subr.bf16.mxu1 %v3477_v39  ;;  %v1074_v20 = vmul.f32 %v4039_v56, %v1039_v12  ;;  %v1073_v21 = vmul.f32 %v4039_v56, %v1034_v13  ;;  %v3513_v37 = vpack.c.bf16 %v1092_v24, %v1091_v25 }
  0xb2   :  { %3107 = vmatmul.mubr.msk.f32.gmra.mrb[2].mxu1 %vm205_vm0, %v3974_v50  ;;  %v1094_v29 = vadd.f32 %v4046_v60, %v1074_v20  ;;  %v1093_v30 = vadd.f32 %v4046_v60, %v1073_v21 }
  0xb3   :  { %3109 = vmatprep.mubr.msk.f32.mxu1 %vm205_vm0, %v3979_v51  ;;  %v1049_v22 = vpop.permute.xlu1 %1048  ;;  %v1044_v23 = vpop.permute.xlu0 %1043 }
  0xb4   :  { %v1076_v31 = vmul.f32 %v4039_v56, %v1049_v22  ;;  %v1075_v36 = vmul.f32 %v4039_v56, %v1044_v23 }
  0xb6   :  { %3110 = vmatmul.mubr.msk.f32.gmra.mrb[4].mxu1 %vm205_vm0, %v3988_v52  ;;  %v1096_v41 = vadd.f32 %v4046_v60, %v1076_v31 }
  0xb7   :  { %v1059_v38 = vpop.permute.xlu1 %1058 }
 0x105   :  { %v4026_v43 = vpop.f32.mrb[0].mxu0 }
 0x106   :  { %v290_v44 = vpop.f32.mrb[1].mxu0 }
 0x109   :  { %v4028_v47 = vpop.f32.mrb[2].mxu0 }
 0x10a   :  { %v4030_v48 = vpop.f32.mrb[3].mxu0 }
 0x10d   :  { %v4032_v49 = vpop.f32.mrb[4].mxu0 }
 0x10e   :  { %v4034_v53 = vpop.f32.mrb[5].mxu0 }
 0x181   :  { %v3105_v2 = vpop.f32.mrb[0].mxu1 }
 0x182   :  { %v385_v4 = vpop.f32.mrb[1].mxu1 }
 0x183   :  { %3116 = vmatprep.mubr.msk.f32.mxu0 %vm418_vm1, %v385_v4  ;;  %3142 = vmatprep.mubr.msk.f32.mxu1 %vm418_vm1, %v385_v4  ;;  %v2739_v4 = vld [vmem:[%s4613_s4 + $0x18] sm:$0xff] }
 0x184   :  { %3117 = vmatmul.mubr.msk.f32.vlgmr.msra.gmra.mrb[6].mxu0 %vm418_vm1, %v3105_v2  ;;  %3143 = vmatmul.mubr.msk.f32.vlgmr.msra.gmra.mrb[6].mxu1 %vm418_vm1, %v3105_v2 }
 0x185   :  { %3480 = vmatpush3.bf16.msra.mxu1 %v3477_v39  ;;  %v3108_v8 = vpop.f32.mrb[2].mxu1  ;;  %3472 = vmatpush3.bf16.msra.mxu0 %v3469_v42  ;;  %v1054_v39 = vpop.permute.xlu0 %1053  ;;  %v3517_v42 = vpack.c.bf16 %v1094_v29, %v1093_v30 }
 0x186   :  { %3506 = vmatprep.subr.bf16.mxu1 %v3505_v7  ;;  %v395_v9 = vpop.f32.mrb[3].mxu1  ;;  %3482 = vmatprep.subr.bf16.mxu0 %v3481_v5  ;;  %v1077_v54 = vmul.f32 %v4039_v56, %v1054_v39 }
 0x187   :  { %3119 = vmatprep.mubr.msk.f32.mxu0 %vm418_vm1, %v395_v9  ;;  %3145 = vmatprep.mubr.msk.f32.mxu1 %vm418_vm1, %v395_v9 }
 0x188   :  { %3120 = vmatmul.mubr.msk.f32.gmra.mrb[8].mxu0 %vm418_vm1, %v3108_v8  ;;  %3146 = vmatmul.mubr.msk.f32.gmra.mrb[8].mxu1 %vm418_vm1, %v3108_v8  ;;  %v1097_v57 = vadd.f32 %v4046_v60, %v1077_v54 }
 0x189   :  { %v3111_v14 = vpop.f32.mrb[4].mxu1 }
 0x18a   :  { %v405_v15 = vpop.f32.mrb[5].mxu1 }
 0x18b   :  { %3122 = vmatprep.mubr.msk.f32.mxu0 %vm418_vm1, %v405_v15  ;;  %3148 = vmatprep.mubr.msk.f32.mxu1 %vm418_vm1, %v405_v15 }
 0x18c   :  { %3123 = vmatmul.mubr.msk.f32.gmra.mrb[10].mxu0 %vm418_vm1, %v3111_v14  ;;  %3149 = vmatmul.mubr.msk.f32.gmra.mrb[10].mxu1 %vm418_vm1, %v3111_v14 }
 0x18d   :  { %3129 = vmatprep.mubr.msk.f32.mxu0 %vm418_vm1, %v290_v44  ;;  %3155 = vmatprep.mubr.msk.f32.mxu1 %vm418_vm1, %v290_v44  ;;  %v2693_v44 = vld [vmem:[%s4638_s28 + $0xf8] sm:$0xff] }
 0x190   :  { %3130 = vmatmul.mubr.msk.f32.vlgmr.msra.gmra.mrb[6].mxu0 %vm418_vm1, %v4026_v43  ;;  %3156 = vmatmul.mubr.msk.f32.vlgmr.msra.gmra.mrb[6].mxu1 %vm418_vm1, %v4026_v43  ;;  %v2692_v43 = vld [vmem:[%s4638_s28 + $0xf0] sm:$0xff] }
 0x191   :  { %3508 = vmatpush3.bf16.msra.mxu1 %v3505_v7  ;;  %3132 = vmatprep.mubr.msk.f32.mxu0 %vm418_vm1, %v4030_v48 }
 0x192   :  { %3510 = vmatprep.subr.bf16.mxu1 %v3509_v26  ;;  %3158 = vmatprep.mubr.msk.f32.mxu1 %vm418_vm1, %v4030_v48  ;;  %v1078_v48 = vmul.f32 %v4039_v56, %v1059_v38  ;;  %v2695_v56 = vld [vmem:[%s4638_s28 + $0x108] sm:$0xff] }
 0x193   :  { %3484 = vmatpush3.bf16.msra.mxu0 %v3481_v5  ;;  %v3497_v59 = vpack.c.bf16 %v2695_v56, %v2694_v55  ;;  %v3533_v5 = vpack.c.bf16 %v2739_v4, %v2738_v3  ;;  %v866_v56 = vld [vmem:[%s4619_s10 + $0x8] sm:$0xff]  ;;  %v868_v3 = vld [vmem:[%s4619_s10 + $0x18] sm:$0xff] }
 0x194   :  { %3133 = vmatmul.mubr.msk.f32.gmra.mrb[8].mxu0 %vm418_vm1, %v4028_v47  ;;  %3159 = vmatmul.mubr.msk.f32.gmra.mrb[8].mxu1 %vm418_vm1, %v4028_v47  ;;  %v1095_v47 = vadd.f32 %v4046_v60, %v1075_v36 }
 0x195   :  { %3512 = vmatpush3.bf16.msra.mxu1 %v3509_v26  ;;  %3135 = vmatprep.mubr.msk.f32.mxu0 %vm418_vm1, %v4034_v53 }
 0x196   :  { %3514 = vmatprep.subr.bf16.mxu1 %v3513_v37  ;;  %3161 = vmatprep.mubr.msk.f32.mxu1 %vm418_vm1, %v4034_v53  ;;  %v3493_v53 = vpack.c.bf16 %v2693_v44, %v2692_v43  ;;  %v3521_v58 = vpack.c.bf16 %v1096_v41, %v1095_v47 }
 0x197   :  { %3486 = vmatprep.subr.bf16.mxu0 %v3485_v33 }
 0x198   :  { %3136 = vmatmul.mubr.msk.f32.gmra.mrb[10].mxu0 %vm418_vm1, %v4032_v49  ;;  %3162 = vmatmul.mubr.msk.f32.gmra.mrb[10].mxu1 %vm418_vm1, %v4032_v49  ;;  %v1098_v49 = vadd.f32 %v4046_v60, %v1078_v48  ;;  %v2740_v60 = vld [vmem:[%s4614_s5 + $0x10] sm:$0xff] }
 0x199   :  { %3516 = vmatpush3.bf16.msra.mxu1 %v3513_v37  ;;  %3488 = vmatpush3.bf16.msra.mxu0 %v3485_v33  ;;  %v4209_v37 = vld [vmem:[%s4617_s8] ss:$0 sm:$0xff] }
 0x19a   :  { %3518 = vmatprep.subr.bf16.mxu1 %v3517_v42  ;;  %3490 = vmatprep.subr.bf16.mxu0 %v3489_v40  ;;  %v3525_v63 = vpack.c.bf16 %v1098_v49, %v1097_v57 }
 0x19b   :  { %3221 = vmatprep.mubr.msk.f32.mxu1 %vm205_vm0, %v3915_v32  ;;  %3188 = vmatprep.mubr.msk.f32.mxu0 %vm205_vm0, %v3915_v32  ;;  %v3501_v32 = vpack.c.bf16 %v2697_v62, %v2696_v61  ;;  %v865_v61 = vld [vmem:[%s4619_s10] sm:$0xff] }
 0x19d   :  { %3520 = vmatpush3.bf16.msra.mxu1 %v3517_v42  ;;  %3492 = vmatpush3.bf16.msra.mxu0 %v3489_v40 }
 0x19e   :  { %3522 = vmatprep.subr.bf16.mxu1 %v3521_v58  ;;  %3494 = vmatprep.subr.bf16.mxu0 %v3493_v53 }
 0x1a1   :  { %3524 = vmatpush3.bf16.msra.mxu1 %v3521_v58  ;;  %3496 = vmatpush3.bf16.msra.mxu0 %v3493_v53 }
 0x1a2   :  { %3526 = vmatprep.subr.bf16.mxu1 %v3525_v63  ;;  %3498 = vmatprep.subr.bf16.mxu0 %v3497_v59 }
 0x1a5   :  { %3528 = vmatpush3.bf16.msra.mxu1 %v3525_v63  ;;  %3500 = vmatpush3.bf16.msra.mxu0 %v3497_v59 }
 0x1a6   :  { %3502 = vmatprep.subr.bf16.mxu0 %v3501_v32 }
 0x1a8   :  { %3222 = vmatmul.mubr.msk.f32.vlgmr.msra.gmra.mrb[12].mxu1 %vm205_vm0, %v3954_v45 }
 0x1a9   :  { %3224 = vmatprep.mubr.msk.f32.mxu1 %vm205_vm0, %v3959_v46  ;;  %3504 = vmatpush3.bf16.msra.mxu0 %v3501_v32 }
 0x1ac   :  { %3225 = vmatmul.mubr.msk.f32.gmra.mrb[14].mxu1 %vm205_vm0, %v3974_v50  ;;  %3189 = vmatmul.mubr.msk.f32.vlgmr.msra.gmra.mrb[12].mxu0 %vm205_vm0, %v3954_v45  ;;  %v2758_v45 = vld [vmem:[%s4616_s7 + $0x10] sm:$0xff] }
 0x1ad   :  { %3227 = vmatprep.mubr.msk.f32.mxu1 %vm205_vm0, %v3979_v51  ;;  %3191 = vmatprep.mubr.msk.f32.mxu0 %vm205_vm0, %v3959_v46  ;;  %v2759_v46 = vld [vmem:[%s4616_s7 + $0x18] sm:$0xff] }
 0x1ae   :  { %v3537_v0 = vpack.c.bf16 %v2759_v46, %v2758_v45 }
 0x1b0   :  { %3228 = vmatmul.mubr.msk.f32.gmra.mrb[16].mxu1 %vm205_vm0, %v3988_v52  ;;  %3192 = vmatmul.mubr.msk.f32.gmra.mrb[14].mxu0 %vm205_vm0, %v3974_v50  ;;  %v2741_v50 = vld [vmem:[%s4614_s5 + $0x18] sm:$0xff] }
 0x1b1   :  { %3194 = vmatprep.mubr.msk.f32.mxu0 %vm205_vm0, %v3979_v51  ;;  %v3529_v51 = vpack.c.bf16 %v2741_v50, %v2740_v60  ;;  %3538 = vmatprep.subr.bf16.mxu1 %v3537_v0 }
 0x1b2   :  { %3540 = vmatpush3.bf16.msra.mxu1 %v3537_v0 }
 0x1b3   :  { %3530 = vmatprep.subr.bf16.mxu0 %v3529_v51 }
 0x1b4   :  { %3195 = vmatmul.mubr.msk.f32.gmra.mrb[16].mxu0 %vm205_vm0, %v3988_v52  ;;  %v2756_v52 = vld [vmem:[%s4615_s6 + $0x10] sm:$0xff] }
 0x1b5   :  { %3532 = vmatpush3.bf16.msra.mxu0 %v3529_v51  ;;  %v4182_v2 = vpack.c.bf16 %v2757_v1, %v2756_v52 }
 0x1b6   :  { %3534 = vmatprep.subr.bf16.mxu0 %v3533_v5 }
 0x1b7   :  { %3542 = vmatprep.subr.bf16.mxu1 %v4182_v2 }
 0x263   :  { %v3131_v7 = vpop.f32.mrb[6].mxu0  ;;  %v3157_v8 = vpop.f32.mrb[6].mxu1 }
 0x264   :  { %v860_v9 = vadd.f32 %v3157_v8, %v2685_v6  ;;  %v616_v10 = vpop.f32.mrb[7].mxu0  ;;  %v823_v11 = vpop.f32.mrb[7].mxu1  ;;  %v653_v42 = vadd.f32 %v3131_v7, %v4209_v37 }
 0x265   :  { %v859_v12 = vadd.f32 %v2685_v6, %v823_v11  ;;  %v652_v44 = vadd.f32 %v4209_v37, %v616_v10 }
 0x266   :  { %v873_v13 = vmul.f32 1.442695, %v860_v9  ;;  %v867_v9 = vld [vmem:[%s4619_s10 + $0x10] sm:$0xff] }
 0x267   :  { %v871_v14 = vmul.f32 1.442695, %v859_v12  ;;  %v3134_v15 = vpop.f32.mrb[8].mxu0  ;;  %v3160_v16 = vpop.f32.mrb[8].mxu1 }
 0x268   :  { %3654 = vpow2.f32 %v873_v13  ;;  %v862_v17 = vadd.f32 %v3160_v16, %v2685_v6  ;;  %v626_v18 = vpop.f32.mrb[9].mxu0  ;;  %v833_v19 = vpop.f32.mrb[9].mxu1  ;;  %v4220_v47 = vadd.f32 %v3134_v15, %v4209_v37 }
 0x269   :  { %3656 = vpow2.f32 %v871_v14  ;;  %v861_v20 = vadd.f32 %v2685_v6, %v833_v19  ;;  %v4225_v54 = vadd.f32 %v4209_v37, %v626_v18 }
 0x26a   :  { %v877_v21 = vmul.f32 1.442695, %v862_v17 }
 0x26b   :  { %v875_v22 = vmul.f32 1.442695, %v861_v20  ;;  %v4194_v23 = vpop.f32.mrb[10].mxu0  ;;  %v3163_v24 = vpop.f32.mrb[10].mxu1 }
 0x26c   :  { %3658 = vpow2.f32 %v877_v21  ;;  %v864_v25 = vadd.f32 %v3163_v24, %v2685_v6  ;;  %v4196_v26 = vpop.f32.mrb[11].mxu0  ;;  %v843_v27 = vpop.f32.mrb[11].mxu1  ;;  %v870_v24 = vld [vmem:[%s4619_s10 + $0x28] sm:$0xff] }
 0x26d   :  { %3660 = vpow2.f32 %v875_v22  ;;  %v863_v28 = vadd.f32 %v2685_v6, %v843_v27 }
 0x26e   :  { %v881_v29 = vmul.f32 1.442695, %v864_v25 }
 0x26f   :  { %v879_v30 = vmul.f32 1.442695, %v863_v28 }
 0x270   :  { %3662 = vpow2.f32 %v881_v29 }
 0x271   :  { %3664 = vpow2.f32 %v879_v30  ;;  %v869_v30 = vld [vmem:[%s4619_s10 + $0x20] sm:$0xff] }
 0x272   :  { %v3655_v31 = vpop.eup %3654 }
 0x273   :  { %v3657_v33 = vpop.eup %3656  ;;  %3666 = vrsqrt.f32 %v3655_v31  ;;  %vm892_vm2 = vcmp.eq.f32.partialorder %v3655_v31, inf  ;;  %v895_v57 = vand.u32 2147483648, %v3655_v31  ;;  %vm894_vm4 = vcmp.eq.f32.partialorder %v3655_v31, 0.0 }
 0x274   :  { %3668 = vrsqrt.f32 %v3657_v33  ;;  %vm885_vm3 = vcmp.eq.f32.partialorder %v3657_v33, inf  ;;  %v888_v62 = vand.u32 2147483648, %v3657_v33  ;;  %vm887_vm5 = vcmp.eq.f32.partialorder %v3657_v33, 0.0 }
 0x276   :  { %v4198_v34 = vpop.eup %3658 }
 0x277   :  { %v4200_v35 = vpop.eup %3660  ;;  %3670 = vrsqrt.f32 %v4198_v34  ;;  %vm906_vm6 = vcmp.eq.f32.partialorder %v4198_v34, inf  ;;  %vm908_vm7 = vcmp.eq.f32.partialorder %v4198_v34, 0.0 }
 0x278   :  { %3672 = vrsqrt.f32 %v4200_v35  ;;  %vm899_vm8 = vcmp.eq.f32.partialorder %v4200_v35, inf  ;;  %vm901_vm9 = vcmp.eq.f32.partialorder %v4200_v35, 0.0  ;;  %v902_v10 = vand.u32 2147483648, %v4200_v35 }
 0x27a   :  { %v4204_v36 = vpop.eup %3662 }
 0x27b   :  { %v4211_v38 = vpop.eup %3664  ;;  %v3223_v39 = vpop.f32.mrb[12].mxu1  ;;  %3674 = vrsqrt.f32 %v4204_v36  ;;  %vm920_vm10 = vcmp.eq.f32.partialorder %v4204_v36, inf  ;;  %vm922_vm11 = vcmp.eq.f32.partialorder %v4204_v36, 0.0  ;;  %v923_v27 = vand.u32 2147483648, %v4204_v36 }
 0x27c   :  { %v1260_v40 = vpop.f32.mrb[13].mxu1  ;;  %3676 = vrsqrt.f32 %v4211_v38  ;;  %vm913_vm12 = vcmp.eq.f32.partialorder %v4211_v38, inf  ;;  %vm915_vm13 = vcmp.eq.f32.partialorder %v4211_v38, 0.0 }
 0x27d   :  { %v3667_v41 = vpop.eup %3666  ;;  %3234 = vmatprep.mubr.msk.f32.mxu0 %vm418_vm1, %v1260_v40  ;;  %3260 = vmatprep.mubr.msk.f32.mxu1 %vm418_vm1, %v1260_v40  ;;  %v657_v40 = vadd.f32 %v4194_v23, %v4209_v37 }
 0x27e   :  { %v3669_v43 = vpop.eup %3668  ;;  %3235 = vmatmul.mubr.msk.f32.vlgmr.msra.gmra.mrb[18].mxu0 %vm418_vm1, %v3223_v39  ;;  %3261 = vmatmul.mubr.msk.f32.vlgmr.msra.gmra.mrb[18].mxu1 %vm418_vm1, %v3223_v39  ;;  %v891_v48 = vmul.f32 %v3667_v41, %v3655_v31 }
 0x27f   :  { %v3226_v53 = vpop.f32.mrb[14].mxu1  ;;  %3544 = vmatpush3.bf16.msra.mxu1 %v4182_v2  ;;  %v4228_v55 = vpop.f32.mrb[12].mxu0  ;;  %3536 = vmatpush3.bf16.msra.mxu0 %v3533_v5  ;;  %v884_v49 = vmul.f32 %v3669_v43, %v3657_v33  ;;  %v909_v5 = vand.u32 2147483648, %v4198_v34  ;;  %v656_v43 = vadd.f32 %v4209_v37, %v4196_v26  ;;  %v4313_v26 = vld [vmem:[%s4621_s12] sm:$0xff] }
 0x280   :  { %v1270_v58 = vpop.f32.mrb[15].mxu1  ;;  %v1165_v59 = vpop.f32.mrb[13].mxu0  ;;  %v893_v63 = vsel %vm892_vm2, %v3655_v31, %v891_v48  ;;  %v916_v31 = vand.u32 2147483648, %v4211_v38  ;;  %v2119_v37 = vld [vmem:[%s4624_s15] sm:$0xff]  ;;  %v2120_v48 = vld [vmem:[%s4624_s15 + $0x8] sm:$0xff] }
 0x281   :  { %v3671_v32 = vpop.eup %3670  ;;  %3237 = vmatprep.mubr.msk.f32.mxu0 %vm418_vm1, %v1270_v58  ;;  %3263 = vmatprep.mubr.msk.f32.mxu1 %vm418_vm1, %v1270_v58  ;;  %v886_v45 = vsel %vm885_vm3, %v3657_v33, %v884_v49  ;;  %v896_v46 = vsel %vm894_vm4, %v895_v57, %v893_v63  ;;  %v2773_v49 = vld [vmem:[%s4618_s9 + $0x1] ss:$0 sm:$0xff] }
 0x282   :  { %v3673_v60 = vpop.eup %3672  ;;  %3238 = vmatmul.mubr.msk.f32.gmra.mrb[20].mxu0 %vm418_vm1, %v3226_v53  ;;  %3264 = vmatmul.mubr.msk.f32.gmra.mrb[20].mxu1 %vm418_vm1, %v3226_v53  ;;  %v889_v0 = vsel %vm887_vm5, %v888_v62, %v886_v45  ;;  %v926_v50 = vmul.f32 %v896_v46, %v866_v56  ;;  %v905_v51 = vmul.f32 %v3671_v32, %v4198_v34 }
 0x283   :  { %v3229_v52 = vpop.f32.mrb[16].mxu1  ;;  %v3193_v1 = vpop.f32.mrb[14].mxu0  ;;  %v925_v2 = vmul.f32 %v889_v0, %v865_v61  ;;  %v898_v4 = vmul.f32 %v3673_v60, %v4200_v35  ;;  %v3569_v53 = vpack.c.bf16 %v2120_v48, %v2119_v37 }
 0x284   :  { %v1280_v6 = vpop.f32.mrb[17].mxu1  ;;  %v1175_v7 = vpop.f32.mrb[15].mxu0  ;;  %v932_v8 = vadd.f32 %v926_v50, %v653_v42  ;;  %v907_v11 = vsel %vm906_vm6, %v4198_v34, %v905_v51 }
 0x285   :  { %v3675_v12 = vpop.eup %3674  ;;  %3240 = vmatprep.mubr.msk.f32.mxu0 %vm418_vm1, %v1280_v6  ;;  %3266 = vmatprep.mubr.msk.f32.mxu1 %vm418_vm1, %v1280_v6  ;;  %v931_v13 = vadd.f32 %v925_v2, %v652_v44  ;;  %v900_v14 = vsel %vm899_vm8, %v4200_v35, %v898_v4  ;;  %v910_v15 = vsel %vm908_vm7, %v909_v5, %v907_v11 }
 0x286   :  { %v3677_v16 = vpop.eup %3676  ;;  %3241 = vmatmul.mubr.msk.f32.gmra.mrb[22].mxu0 %vm418_vm1, %v3229_v52  ;;  %3267 = vmatmul.mubr.msk.f32.gmra.mrb[22].mxu1 %vm418_vm1, %v3229_v52  ;;  %v903_v17 = vsel %vm901_vm9, %v902_v10, %v900_v14  ;;  %v928_v18 = vmul.f32 %v910_v15, %v868_v3  ;;  %v919_v19 = vmul.f32 %v3675_v12, %v4204_v36 }
 0x287   :  { %3247 = vmatprep.mubr.msk.f32.mxu0 %vm418_vm1, %v1165_v59  ;;  %3273 = vmatprep.mubr.msk.f32.mxu1 %vm418_vm1, %v1165_v59  ;;  %v3196_v20 = vpop.f32.mrb[16].mxu0  ;;  %v4269_v21 = vpack.c.bf16 %v932_v8, %v931_v13  ;;  %v927_v22 = vmul.f32 %v903_v17, %v867_v9  ;;  %v912_v25 = vmul.f32 %v3677_v16, %v4211_v38  ;;  %v4343_v17 = vld [vmem:[%s4617_s8 + $0x1] ss:$0 sm:$0xff] }
 0x288   :  { %v1185_v28 = vpop.f32.mrb[17].mxu0  ;;  %v934_v29 = vadd.f32 %v928_v18, %v4220_v47  ;;  %v921_v33 = vsel %vm920_vm10, %v4204_v36, %v919_v19  ;;  %3570 = vmatprep.subr.bf16.mxu1 %v3569_v53 }
 0x289   :  { %v933_v34 = vadd.f32 %v927_v22, %v4225_v54  ;;  %v914_v35 = vsel %vm913_vm12, %v4211_v38, %v912_v25  ;;  %v924_v39 = vsel %vm922_vm11, %v923_v27, %v921_v33  ;;  %v2121_v54 = vld [vmem:[%s4624_s15 + $0x10] sm:$0xff] }
 0x28a   :  { %3248 = vmatmul.mubr.msk.f32.vlgmr.msra.gmra.mrb[18].mxu0 %vm418_vm1, %v4228_v55  ;;  %3274 = vmatmul.mubr.msk.f32.vlgmr.msra.gmra.mrb[18].mxu1 %vm418_vm1, %v4228_v55  ;;  %v917_v41 = vsel %vm915_vm13, %v916_v31, %v914_v35  ;;  %v930_v42 = vmul.f32 %v924_v39, %v870_v24  ;;  %v2122_v55 = vld [vmem:[%s4624_s15 + $0x18] sm:$0xff]  ;;  %v2774_v31 = vld [vmem:[%s4619_s10 + $0x30] sm:$0xff]  ;;  %vm2123_vm13 = vcmask 261120  }
 0x28b   :  { %3250 = vmatprep.mubr.msk.f32.mxu0 %vm418_vm1, %v1175_v7  ;;  %3276 = vmatprep.mubr.msk.f32.mxu1 %vm418_vm1, %v1175_v7  ;;  %v4300_v36 = vpack.c.bf16 %v934_v29, %v933_v34  ;;  %v929_v38 = vmul.f32 %v917_v41, %v869_v30  ;;  %v3573_v56 = vpack.c.bf16 %v2122_v55, %v2121_v54 }
 0x28c   :  { %v936_v44 = vadd.f32 %v930_v42, %v657_v40  ;;  %3572 = vmatpush3.bf16.msra.mxu1 %v3569_v53  ;;  %v2776_v53 = vld [vmem:[%s4619_s10 + $0x40] sm:$0xff] }
 0x28d   :  { %v935_v23 = vadd.f32 %v929_v38, %v656_v43  ;;  %3574 = vmatprep.subr.bf16.mxu1 %v3573_v56 }
 0x28e   :  { %3251 = vmatmul.mubr.msk.f32.gmra.mrb[20].mxu0 %vm418_vm1, %v3193_v1  ;;  %3277 = vmatmul.mubr.msk.f32.gmra.mrb[20].mxu1 %vm418_vm1, %v3193_v1 }
 0x28f   :  { %3253 = vmatprep.mubr.msk.f32.mxu0 %vm418_vm1, %v1185_v28  ;;  %3279 = vmatprep.mubr.msk.f32.mxu1 %vm418_vm1, %v1185_v28  ;;  %v4306_v47 = vpack.c.bf16 %v936_v44, %v935_v23  ;;  %v2775_v28 = vld [vmem:[%s4619_s10 + $0x38] sm:$0xff]  ;;  %v2777_v23 = vld [vmem:[%s4619_s10 + $0x48] sm:$0xff] }
 0x290   :  { %3576 = vmatpush3.bf16.msra.mxu1 %v3573_v56 }
 0x292   :  { %3254 = vmatmul.mubr.msk.f32.gmra.mrb[22].mxu0 %vm418_vm1, %v3196_v20  ;;  %3280 = vmatmul.mubr.msk.f32.gmra.mrb[22].mxu1 %vm418_vm1, %v3196_v20 }
 0x293   :  { %3294 = vmatprep.mubr.msk.f32.mxu0 %vm1830_vm14, %v4313_v26 }
 0x35d   :  { %v3249_v57 = vpop.f32.mrb[18].mxu0  ;;  %v3275_v58 = vpop.f32.mrb[18].mxu1 }
 0x35e   :  { %v1740_v59 = vadd.f32 %v3275_v58, %v2773_v49  ;;  %v1492_v61 = vpop.f32.mrb[19].mxu0  ;;  %v1702_v62 = vpop.f32.mrb[19].mxu1  ;;  %v1530_v20 = vadd.f32 %v3249_v57, %v4343_v17 }
 0x35f   :  { %v1739_v63 = vadd.f32 %v2773_v49, %v1702_v62  ;;  %v1529_v22 = vadd.f32 %v4343_v17, %v1492_v61 }
 0x360   :  { %v1754_v32 = vmul.f32 1.442695, %v1740_v59 }
 0x361   :  { %v1752_v45 = vmul.f32 1.442695, %v1739_v63  ;;  %v3252_v46 = vpop.f32.mrb[20].mxu0  ;;  %v3278_v60 = vpop.f32.mrb[20].mxu1 }
 0x362   :  { %3678 = vpow2.f32 %v1754_v32  ;;  %v1742_v0 = vadd.f32 %v3278_v60, %v2773_v49  ;;  %v1502_v50 = vpop.f32.mrb[21].mxu0  ;;  %v1712_v51 = vpop.f32.mrb[21].mxu1  ;;  %v1532_v24 = vadd.f32 %v3252_v46, %v4343_v17  ;;  %v2779_v60 = vld [vmem:[%s4619_s10 + $0x58] sm:$0xff] }
 0x363   :  { %3680 = vpow2.f32 %v1752_v45  ;;  %v1741_v52 = vadd.f32 %v2773_v49, %v1712_v51  ;;  %v1531_v27 = vadd.f32 %v4343_v17, %v1502_v50 }
 0x364   :  { %v1758_v1 = vmul.f32 1.442695, %v1742_v0 }
 0x365   :  { %v1756_v2 = vmul.f32 1.442695, %v1741_v52  ;;  %v4332_v3 = vpop.f32.mrb[22].mxu0  ;;  %v3281_v4 = vpop.f32.mrb[22].mxu1  ;;  %v2778_v52 = vld [vmem:[%s4619_s10 + $0x50] sm:$0xff] }
 0x366   :  { %3682 = vpow2.f32 %v1758_v1  ;;  %v1744_v5 = vadd.f32 %v3281_v4, %v2773_v49  ;;  %v4334_v6 = vpop.f32.mrb[23].mxu0  ;;  %v1722_v7 = vpop.f32.mrb[23].mxu1 }
 0x367   :  { %3684 = vpow2.f32 %v1756_v2  ;;  %v1743_v8 = vadd.f32 %v2773_v49, %v1722_v7 }
 0x368   :  { %v1762_v9 = vmul.f32 1.442695, %v1744_v5 }
 0x369   :  { %v1760_v10 = vmul.f32 1.442695, %v1743_v8  ;;  %v1534_v8 = vadd.f32 %v4332_v3, %v4343_v17  ;;  %v951_v3 = vld [vmem:[%s4621_s12 + $0x10] sm:$0xff] }
 0x36a   :  { %3686 = vpow2.f32 %v1762_v9 }
 0x36b   :  { %3688 = vpow2.f32 %v1760_v10 }
 0x36c   :  { %v3679_v11 = vpop.eup %3678 }
 0x36d   :  { %v3681_v12 = vpop.eup %3680  ;;  %3690 = vrsqrt.f32 %v3679_v11  ;;  %vm1773_vm15 = vcmp.eq.f32.partialorder %v3679_v11, inf  ;;  %v1776_v30 = vand.u32 2147483648, %v3679_v11  ;;  %vm1775_vm3 = vcmp.eq.f32.partialorder %v3679_v11, 0.0 }
 0x36e   :  { %3692 = vrsqrt.f32 %v3681_v12  ;;  %vm1766_vm2 = vcmp.eq.f32.partialorder %v3681_v12, inf  ;;  %v1769_v33 = vand.u32 2147483648, %v3681_v12  ;;  %vm1768_vm4 = vcmp.eq.f32.partialorder %v3681_v12, 0.0 }
 0x370   :  { %v3683_v13 = vpop.eup %3682 }
 0x371   :  { %v3685_v14 = vpop.eup %3684  ;;  %3694 = vrsqrt.f32 %v3683_v13  ;;  %vm1787_vm5 = vcmp.eq.f32.partialorder %v3683_v13, inf  ;;  %vm1789_vm6 = vcmp.eq.f32.partialorder %v3683_v13, 0.0  ;;  %v1790_v48 = vand.u32 2147483648, %v3683_v13 }
 0x372   :  { %3696 = vrsqrt.f32 %v3685_v14  ;;  %vm1780_vm7 = vcmp.eq.f32.partialorder %v3685_v14, inf  ;;  %vm1782_vm8 = vcmp.eq.f32.partialorder %v3685_v14, 0.0  ;;  %v1783_v55 = vand.u32 2147483648, %v3685_v14 }
 0x374   :  { %v4336_v15 = vpop.eup %3686 }
 0x375   :  { %v4338_v16 = vpop.eup %3688  ;;  %3698 = vrsqrt.f32 %v4336_v15  ;;  %vm1801_vm9 = vcmp.eq.f32.partialorder %v4336_v15, inf  ;;  %vm1803_vm10 = vcmp.eq.f32.partialorder %v4336_v15, 0.0  ;;  %v1804_v50 = vand.u32 2147483648, %v4336_v15 }
 0x376   :  { %3700 = vrsqrt.f32 %v4338_v16  ;;  %vm1794_vm11 = vcmp.eq.f32.partialorder %v4338_v16, inf  ;;  %v1797_v1 = vand.u32 2147483648, %v4338_v16  ;;  %vm1796_vm12 = vcmp.eq.f32.partialorder %v4338_v16, 0.0 }
 0x377   :  { %v3691_v18 = vpop.eup %3690 }
 0x378   :  { %v3693_v19 = vpop.eup %3692  ;;  %v1772_v25 = vmul.f32 %v3691_v18, %v3679_v11 }
 0x379   :  { %v1765_v29 = vmul.f32 %v3693_v19, %v3681_v12  ;;  %v955_v19 = vld [vmem:[%s4621_s12 + $0x30] sm:$0xff] }
 0x37a   :  { %v1774_v34 = vsel %vm1773_vm15, %v3679_v11, %v1772_v25  ;;  %v1533_v11 = vadd.f32 %v4343_v17, %v4334_v6  ;;  %v952_v6 = vld [vmem:[%s4621_s12 + $0x18] sm:$0xff]  ;;  %v953_v17 = vld [vmem:[%s4621_s12 + $0x20] sm:$0xff]  ;;  %v2118_v25 = vld [vmem:[%s4623_s14 + $0x8] sm:$0xff] }
 0x37b   :  { %v3695_v35 = vpop.eup %3694  ;;  %v1767_v39 = vsel %vm1766_vm2, %v3681_v12, %v1765_v29  ;;  %v1777_v40 = vsel %vm1775_vm3, %v1776_v30, %v1774_v34 }
 0x37c   :  { %v3697_v41 = vpop.eup %3696  ;;  %v1770_v42 = vsel %vm1768_vm4, %v1769_v33, %v1767_v39  ;;  %v1807_v43 = vmul.f32 %v2775_v28, %v1777_v40  ;;  %v1786_v38 = vmul.f32 %v3695_v35, %v3683_v13 }
 0x37d   :  { %v1806_v44 = vmul.f32 %v2774_v31, %v1770_v42  ;;  %v1779_v37 = vmul.f32 %v3697_v41, %v3685_v14  ;;  %v77_v42 = vld [vmem:[%s4638_s28 + $0x60] sm:$0xff] }
 0x37e   :  { %v1813_v54 = vadd.f32 %v1807_v43, %v1530_v20  ;;  %v1788_v56 = vsel %vm1787_vm5, %v3683_v13, %v1786_v38  ;;  %v957_v20 = vld [vmem:[%s4621_s12 + $0x40] sm:$0xff] }
 0x37f   :  { %v3699_v49 = vpop.eup %3698  ;;  %v1812_v57 = vadd.f32 %v1806_v44, %v1529_v22  ;;  %v1781_v58 = vsel %vm1780_vm7, %v3685_v14, %v1779_v37  ;;  %v1791_v59 = vsel %vm1789_vm6, %v1790_v48, %v1788_v56  ;;  %v958_v22 = vld [vmem:[%s4621_s12 + $0x48] sm:$0xff]  ;;  %v2698_v43 = vld [vmem:[%s4638_s28 + $0x120] sm:$0xff] }
 0x380   :  { %v3701_v61 = vpop.eup %3700  ;;  %v1784_v62 = vsel %vm1782_vm8, %v1783_v55, %v1781_v58  ;;  %v1809_v63 = vmul.f32 %v2777_v23, %v1791_v59  ;;  %v1800_v32 = vmul.f32 %v3699_v49, %v4336_v15  ;;  %v1818_v44 = vadd.f32 %v2698_v43, %v77_v42  ;;  %v78_v23 = vld [vmem:[%s4638_s28 + $0x68] sm:$0xff]  ;;  %v80_v49 = vld [vmem:[%s4638_s28 + $0x78] sm:$0xff]  ;;  %v81_v58 = vld [vmem:[%s4638_s28 + $0x80] sm:$0xff] }
 0x381   :  { %v3545_v45 = vpack.c.bf16 %v1813_v54, %v1812_v57  ;;  %v1808_v46 = vmul.f32 %v2776_v53, %v1784_v62  ;;  %v1793_v0 = vmul.f32 %v3701_v61, %v4338_v16  ;;  %v2699_v37 = vld [vmem:[%s4638_s28 + $0x128] sm:$0xff]  ;;  %v79_v54 = vld [vmem:[%s4638_s28 + $0x70] sm:$0xff]  ;;  %v2701_v57 = vld [vmem:[%s4638_s28 + $0x138] sm:$0xff]  ;;  %v3729_v42 = vmov 0.0  }
 0x382   :  { %v1815_v51 = vadd.f32 %v1809_v63, %v1532_v24  ;;  %v1802_v2 = vsel %vm1801_vm9, %v4336_v15, %v1800_v32  ;;  %v960_v24 = vld [vmem:[%s4621_s12 + $0x58] sm:$0xff]  ;;  %v2700_v53 = vld [vmem:[%s4638_s28 + $0x130] sm:$0xff]  ;;  %v1819_v55 = vadd.f32 %v2699_v37, %v78_v23  ;;  %v2702_v59 = vld [vmem:[%s4638_s28 + $0x140] sm:$0xff]  ;;  %v1821_v61 = vadd.f32 %v2701_v57, %v80_v49 }
 0x383   :  { %3546 = vmatprep.subr.bf16.mxu0 %v3545_v45  ;;  %v1814_v4 = vadd.f32 %v1808_v46, %v1531_v27  ;;  %v1795_v5 = vsel %vm1794_vm11, %v4338_v16, %v1793_v0  ;;  %v1805_v7 = vsel %vm1803_vm10, %v1804_v50, %v1802_v2  ;;  %v950_v16 = vld [vmem:[%s4621_s12 + $0x8] sm:$0xff]  ;;  %v1820_v56 = vadd.f32 %v2700_v53, %v79_v54  ;;  %v2704_v46 = vld [vmem:[%s4638_s28 + $0x150] sm:$0xff]  ;;  %v84_v50 = vld [vmem:[%s4638_s28 + $0x98] sm:$0xff] }
 0x384   :  { %3548 = vmatpush3.bf16.msra.mxu0 %v3545_v45  ;;  %v1798_v9 = vsel %vm1796_vm12, %v1797_v1, %v1795_v5  ;;  %v1811_v10 = vmul.f32 %v2779_v60, %v1805_v7  ;;  %v1822_v62 = vadd.f32 %v2702_v59, %v81_v58  ;;  %v82_v63 = vld [vmem:[%s4638_s28 + $0x88] sm:$0xff]  ;;  %v83_v45 = vld [vmem:[%s4638_s28 + $0x90] sm:$0xff]  ;;  %v2706_v1 = vld [vmem:[%s4638_s28 + $0x160] sm:$0xff] }
 0x385   :  { %v3549_v12 = vpack.c.bf16 %v1815_v51, %v1814_v4  ;;  %v1810_v13 = vmul.f32 %v2778_v52, %v1798_v9  ;;  %v2703_v32 = vld [vmem:[%s4638_s28 + $0x148] sm:$0xff]  ;;  %v1824_v0 = vadd.f32 %v2704_v46, %v83_v45  ;;  %v2705_v51 = vld [vmem:[%s4638_s28 + $0x158] sm:$0xff]  ;;  %v85_v52 = vld [vmem:[%s4638_s28 + $0xa0] sm:$0xff] }
 0x386   :  { %v1817_v14 = vadd.f32 %v1811_v10, %v1534_v8  ;;  %v1823_v60 = vadd.f32 %v2703_v32, %v82_v63  ;;  %v1825_v2 = vadd.f32 %v2705_v51, %v84_v50  ;;  %v1826_v4 = vadd.f32 %v2706_v1, %v85_v52  ;;  %v86_v5 = vld [vmem:[%s4638_s28 + $0xa8] sm:$0xff]  ;;  %v87_v8 = vld [vmem:[%s4638_s28 + $0xb0] sm:$0xff]  ;;  %v2469_v54 = vld [vmem:[%s4626_s17 + $0x18] sm:$0xff] }
 0x387   :  { %3550 = vmatprep.subr.bf16.mxu0 %v3549_v12  ;;  %v1816_v15 = vadd.f32 %v1810_v13, %v1533_v11  ;;  %v2707_v7 = vld [vmem:[%s4638_s28 + $0x168] sm:$0xff]  ;;  %v2708_v9 = vld [vmem:[%s4638_s28 + $0x170] sm:$0xff]  ;;  %v2709_v13 = vld [vmem:[%s4638_s28 + $0x178] sm:$0xff] }
 0x388   :  { %3552 = vmatpush3.bf16.msra.mxu0 %v3549_v12  ;;  %v1827_v10 = vadd.f32 %v2707_v7, %v86_v5  ;;  %v1828_v11 = vadd.f32 %v2708_v9, %v87_v8  ;;  %v88_v12 = vld [vmem:[%s4638_s28 + $0xb8] sm:$0xff]  ;;  %v2467_v43 = vld [vmem:[%s4626_s17 + $0x8] sm:$0xff]  ;;  %v2468_v53 = vld [vmem:[%s4626_s17 + $0x10] sm:$0xff] }
 0x389   :  { %v3553_v18 = vpack.c.bf16 %v1817_v14, %v1816_v15  ;;  %v1829_v14 = vadd.f32 %v2709_v13, %v88_v12  ;;  %v2828_v15 = vld [vmem:[#allocation2] ss:$0 sm:$0xff]  ;;  %v2471_v59 = vld [vmem:[%s4626_s17 + $0x28] sm:$0xff]  ;;  %v2477_v12 = vld [vmem:[%s4626_s17 + $0x58] sm:$0xff] }
 0x38a   :  { %v2474_v5 = vld [vmem:[%s4626_s17 + $0x40] sm:$0xff]  ;;  %v2476_v13 = vld [vmem:[%s4626_s17 + $0x50] sm:$0xff] }
 0x38b   :  { %3554 = vmatprep.subr.bf16.mxu0 %v3553_v18 }
 0x38c   :  { %3556 = vmatpush3.bf16.msra.mxu0 %v3553_v18 }
 0x38d   :  { %3558 = vmatprep.subr.bf16.mxu0 %v4269_v21 }
 0x38f   :  { %3295 = vmatmul.mubr.msk.f32.vlgmr.msra.gmra.mrb[24].mxu0 %vm1830_vm14, %v950_v16 }
 0x390   :  { %3560 = vmatpush3.bf16.msra.mxu0 %v4269_v21  ;;  %3297 = vmatprep.mubr.msk.f32.mxu0 %vm1830_vm14, %v951_v3  ;;  %v954_v21 = vld [vmem:[%s4621_s12 + $0x28] sm:$0xff] }
 0x391   :  { %3562 = vmatprep.subr.bf16.mxu0 %v4300_v36 }
 0x393   :  { %3298 = vmatmul.mubr.msk.f32.gmra.mrb[26].mxu0 %vm1830_vm14, %v952_v6 }
 0x394   :  { %3564 = vmatpush3.bf16.msra.mxu0 %v4300_v36  ;;  %3300 = vmatprep.mubr.msk.f32.mxu0 %vm1830_vm14, %v953_v17  ;;  %v956_v36 = vld [vmem:[%s4621_s12 + $0x38] sm:$0xff] }
 0x395   :  { %3566 = vmatprep.subr.bf16.mxu0 %v4306_v47 }
 0x397   :  { %3301 = vmatmul.mubr.msk.f32.gmra.mrb[28].mxu0 %vm1830_vm14, %v954_v21 }
 0x398   :  { %3568 = vmatpush3.bf16.msra.mxu0 %v4306_v47  ;;  %3303 = vmatprep.mubr.msk.f32.mxu0 %vm1830_vm14, %v955_v19  ;;  %v959_v47 = vld [vmem:[%s4621_s12 + $0x50] sm:$0xff] }
 0x39b   :  { %3304 = vmatmul.mubr.msk.f32.gmra.mrb[30].mxu0 %vm1830_vm14, %v956_v36 }
 0x39c   :  { %3306 = vmatprep.mubr.msk.f32.mxu0 %vm1830_vm14, %v957_v20 }
 0x39f   :  { %3307 = vmatmul.mubr.msk.f32.gmra.mrb[32].mxu0 %vm1830_vm14, %v958_v22 }
 0x3a0   :  { %3309 = vmatprep.mubr.msk.f32.mxu0 %vm1830_vm14, %v959_v47 }
 0x3a3   :  { %3310 = vmatmul.mubr.msk.f32.gmra.mrb[34].mxu0 %vm1830_vm14, %v960_v24 }
 0x3a4   :  { %3324 = vmatprep.mubr.msk.f32.mxu0 %vm1830_vm14, %v4313_v26  ;;  %v2117_v26 = vld [vmem:[%s4623_s14] sm:$0xff] }
 0x3a5   :  { %v3577_v27 = vpack.c.bf16 %v2118_v25, %v2117_v26 }
 0x3a7   :  { %3325 = vmatmul.mubr.msk.f32.vlgmr.msra.gmra.mrb[24].mxu0 %vm1830_vm14, %v950_v16  ;;  %3578 = vmatprep.subr.bf16.mxu1 %v3577_v27 }
 0x3a8   :  { %3327 = vmatprep.mubr.msk.f32.mxu0 %vm1830_vm14, %v951_v3 }
 0x3ab   :  { %3328 = vmatmul.mubr.msk.f32.gmra.mrb[26].mxu0 %vm1830_vm14, %v952_v6 }
 0x3ac   :  { %3330 = vmatprep.mubr.msk.f32.mxu0 %vm1830_vm14, %v953_v17 }
 0x3af   :  { %3331 = vmatmul.mubr.msk.f32.gmra.mrb[28].mxu0 %vm1830_vm14, %v954_v21 }
 0x3b0   :  { %3333 = vmatprep.mubr.msk.f32.mxu0 %vm1830_vm14, %v955_v19 }
 0x3b3   :  { %3334 = vmatmul.mubr.msk.f32.gmra.mrb[30].mxu0 %vm1830_vm14, %v956_v36 }
 0x3b4   :  { %3336 = vmatprep.mubr.msk.f32.mxu0 %vm1830_vm14, %v957_v20  ;;  %v3727_v20 = vmov 0.0|0.0  }
 0x3b5   :  { %3581 = vmatprep.subr.bf16.mxu0 %v3727_v20 }
 0x3b7   :  { %3337 = vmatmul.mubr.msk.f32.gmra.mrb[32].mxu0 %vm1830_vm14, %v958_v22 }
 0x3b8   :  { %3339 = vmatprep.mubr.msk.f32.mxu0 %vm1830_vm14, %v959_v47 }
 0x3bb   :  { %3340 = vmatmul.mubr.msk.f32.gmra.mrb[34].mxu0 %vm1830_vm14, %v960_v24  ;;  %vm2630_vm14 = vcmask 60416  }
 0x47a   :  { %v3326_v28 = vpop.f32.mrb[24].mxu0 }
 0x47b   :  { %v2058_v29 = vpop.f32.mrb[25].mxu0 }
 0x47c   :  { %3350 = vmatprep.mubr.msk.f32.mxu1 %vm2123_vm13, %v2058_v29 }
 0x47d   :  { %3351 = vmatmul.mubr.msk.f32.vlgmr.msra.gmra.mrb[24].mxu1 %vm2123_vm13, %v3326_v28 }
 0x47e   :  { %v3329_v30 = vpop.f32.mrb[26].mxu0  ;;  %3580 = vmatpush3.bf16.msra.mxu1 %v3577_v27 }
 0x47f   :  { %v2068_v31 = vpop.f32.mrb[27].mxu0 }
 0x480   :  { %3353 = vmatprep.mubr.msk.f32.mxu1 %vm2123_vm13, %v2068_v31 }
 0x481   :  { %3354 = vmatmul.mubr.msk.f32.gmra.mrb[26].mxu1 %vm2123_vm13, %v3329_v30 }
 0x482   :  { %v3332_v33 = vpop.f32.mrb[28].mxu0 }
 0x483   :  { %v2078_v34 = vpop.f32.mrb[29].mxu0 }
 0x484   :  { %3356 = vmatprep.mubr.msk.f32.mxu1 %vm2123_vm13, %v2078_v34 }
 0x485   :  { %3357 = vmatmul.mubr.msk.f32.gmra.mrb[28].mxu1 %vm2123_vm13, %v3332_v33 }
 0x486   :  { %v3335_v35 = vpop.f32.mrb[30].mxu0 }
 0x487   :  { %v2088_v39 = vpop.f32.mrb[31].mxu0 }
 0x488   :  { %3359 = vmatprep.mubr.msk.f32.mxu1 %vm2123_vm13, %v2088_v39 }
 0x489   :  { %3360 = vmatmul.mubr.msk.f32.gmra.mrb[30].mxu1 %vm2123_vm13, %v3335_v35 }
 0x48a   :  { %v3338_v40 = vpop.f32.mrb[32].mxu0 }
 0x48b   :  { %v2098_v41 = vpop.f32.mrb[33].mxu0 }
 0x48c   :  { %3362 = vmatprep.mubr.msk.f32.mxu1 %vm2123_vm13, %v2098_v41 }
 0x48d   :  { %3363 = vmatmul.mubr.msk.f32.gmra.mrb[32].mxu1 %vm2123_vm13, %v3338_v40 }
 0x48e   :  { %v3341_v38 = vpop.f32.mrb[34].mxu0 }
 0x48f   :  { %v2108_v48 = vpop.f32.mrb[35].mxu0 }
 0x490   :  { %3365 = vmatprep.mubr.msk.f32.mxu1 %vm2123_vm13, %v2108_v48 }
 0x491   :  { %3366 = vmatmul.mubr.msk.f32.gmra.mrb[34].mxu1 %vm2123_vm13, %v3341_v38  ;;  %v2466_v38 = vld [vmem:[%s4626_s17] sm:$0xff] }
 0x492   :  { %3372 = vmatprep.mubr.msk.f32.mxu1 %vm418_vm1, %v1818_v44 }
 0x495   :  { %3373 = vmatmul.mubr.msk.f32.vlgmr.msra.gmra.mrb[24].mxu1 %vm418_vm1, %v1819_v55 }
 0x496   :  { %3375 = vmatprep.mubr.msk.f32.mxu1 %vm418_vm1, %v1820_v56 }
 0x499   :  { %3376 = vmatmul.mubr.msk.f32.gmra.mrb[26].mxu1 %vm418_vm1, %v1821_v61  ;;  %v2470_v61 = vld [vmem:[%s4626_s17 + $0x20] sm:$0xff] }
 0x49a   :  { %3378 = vmatprep.mubr.msk.f32.mxu1 %vm418_vm1, %v1822_v62 }
 0x49d   :  { %3379 = vmatmul.mubr.msk.f32.gmra.mrb[28].mxu1 %vm418_vm1, %v1823_v60  ;;  %v2473_v60 = vld [vmem:[%s4626_s17 + $0x38] sm:$0xff] }
 0x49e   :  { %3381 = vmatprep.mubr.msk.f32.mxu1 %vm418_vm1, %v1824_v0  ;;  %v2472_v0 = vld [vmem:[%s4626_s17 + $0x30] sm:$0xff] }
 0x4a1   :  { %3382 = vmatmul.mubr.msk.f32.gmra.mrb[30].mxu1 %vm418_vm1, %v1825_v2 }
 0x4a2   :  { %3384 = vmatprep.mubr.msk.f32.mxu1 %vm418_vm1, %v1826_v4  ;;  %v2475_v4 = vld [vmem:[%s4626_s17 + $0x48] sm:$0xff]  ;;  %s3730_s17 = smov [#allocation3]  }
 0x4a3   :  { %s2638_s12 = sshll.u32 %s3730_s17, 4  ;;  %s2639_s12 = int_to_ptr.vmem [resolvable:$true] %s2638_s12 }
 0x4a4   :  { %s3702_s23 = scalar_lea.vmem %s2639_s12, 64  ;;  %p3707_p1 = scmp.lt.s32.totalorder %s2639_s12, %s2639_s12 }
 0x4a5   :  { %3385 = vmatmul.mubr.msk.f32.gmra.mrb[32].mxu1 %vm418_vm1, %v1827_v10  ;;  %p3703_p0 = scmp.ne.s32.totalorder %s2639_s12, %s3702_s23  ;;  %p3708_p2 = scmp.lt.s32.totalorder %s3702_s23, %s3702_s23 }
 0x4a6   :  { %3387 = vmatprep.mubr.msk.f32.mxu1 %vm418_vm1, %v1828_v11 }
 0x4a7   :  { %p3709_p3 = por %p3708_p2, %p3707_p1 }
 0x4a9   :  { %3388 = vmatmul.mubr.msk.f32.gmra.mrb[34].mxu1 %vm418_vm1, %v1829_v14  ;;  %vm3728_vm1 = vmmov 0   ;;  %p3710_p4 = pnand %p3709_p3, %p3703_p0 }
 0x4aa   :  { %3414 = vmatprep.mubr.msk.f32.mxu0 %vm3728_vm1, %v3729_v42 }
 0x568   :  { %v3374_v18 = vpop.f32.mrb[24].mxu1 }
 0x569   :  { %v2454_v16 = vadd.f32 %v3374_v18, %v2828_v15  ;;  %v2387_v3 = vpop.f32.mrb[25].mxu1 }
 0x56a   :  { %v2453_v6 = vadd.f32 %v2828_v15, %v2387_v3 }
 0x56b   :  { %2485 = vperm.xlu1 %3653, %v2454_v16  }
 0x56c   :  { %2480 = vperm.xlu0 %3652, %v2453_v6   ;;  %v3377_v17 = vpop.f32.mrb[26].mxu1 }
 0x56d   :  { %v2456_v21 = vadd.f32 %v3377_v17, %v2828_v15  ;;  %v2397_v19 = vpop.f32.mrb[27].mxu1  ;;  %v2465_v17 = vld [vmem:[%s4622_s13] sm:$0xf] }
 0x56e   :  { %v2455_v36 = vadd.f32 %v2828_v15, %v2397_v19 }
 0x56f   :  { %2495 = vperm.xlu1 %3653, %v2456_v21   ;;  %v2829_v21 = vld [vmem:[%s4627_s18] ss:$0 sm:$0xff] }
 0x570   :  { %2490 = vperm.xlu0 %3652, %v2455_v36   ;;  %v3380_v22 = vpop.f32.mrb[28].mxu1 }
 0x571   :  { %v2458_v47 = vadd.f32 %v3380_v22, %v2828_v15  ;;  %v2407_v24 = vpop.f32.mrb[29].mxu1 }
 0x572   :  { %v2457_v26 = vadd.f32 %v2828_v15, %v2407_v24 }
 0x573   :  { %2505 = vperm.xlu1 %3653, %v2458_v47  }
 0x574   :  { %2500 = vperm.xlu0 %3652, %v2457_v26   ;;  %v3383_v25 = vpop.f32.mrb[30].mxu1 }
 0x575   :  { %v2460_v27 = vadd.f32 %v3383_v25, %v2828_v15  ;;  %v2417_v28 = vpop.f32.mrb[31].mxu1 }
 0x576   :  { %v2459_v29 = vadd.f32 %v2828_v15, %v2417_v28 }
 0x577   :  { %2515 = vperm.xlu1 %3653, %v2460_v27  }
 0x578   :  { %2510 = vperm.xlu0 %3652, %v2459_v29   ;;  %v3386_v30 = vpop.f32.mrb[32].mxu1 }
 0x579   :  { %v2462_v31 = vadd.f32 %v3386_v30, %v2828_v15  ;;  %v2427_v33 = vpop.f32.mrb[33].mxu1 }
 0x57a   :  { %v2461_v34 = vadd.f32 %v2828_v15, %v2427_v33 }
 0x57b   :  { %2525 = vperm.xlu1 %3653, %v2462_v31  }
 0x57c   :  { %2520 = vperm.xlu0 %3652, %v2461_v34   ;;  %v3389_v35 = vpop.f32.mrb[34].mxu1 }
 0x57d   :  { %v2464_v39 = vadd.f32 %v3389_v35, %v2828_v15  ;;  %v2437_v40 = vpop.f32.mrb[35].mxu1 }
 0x57e   :  { %v2463_v41 = vadd.f32 %v2828_v15, %v2437_v40 }
 0x57f   :  { %2535 = vperm.xlu1 %3653, %v2464_v39  }
 0x580   :  { %2530 = vperm.xlu0 %3652, %v2463_v41  }
 0x5ea   :  { %v2486_v44 = vpop.permute.xlu1 %2485 }
 0x5eb   :  { %v2539_v23 = vmul.f32 %v2486_v44, %v2467_v43  ;;  %v2481_v37 = vpop.permute.xlu0 %2480 }
 0x5ec   :  { %v2538_v48 = vmul.f32 %v2481_v37, %v2466_v38 }
 0x5ee   :  { %v3582_v55 = vpack.c.bf16 %v2539_v23, %v2538_v48  ;;  %v2496_v56 = vpop.permute.xlu1 %2495 }
 0x5ef   :  { %v2541_v49 = vmul.f32 %v2496_v56, %v2469_v54  ;;  %v2491_v57 = vpop.permute.xlu0 %2490 }
 0x5f0   :  { %v2540_v58 = vmul.f32 %v2491_v57, %v2468_v53  ;;  %3583 = vmatpush3.bf16.msra.mxu0 %v3582_v55 }
 0x5f1   :  { %3584 = vmatprep.subr.bf16.mxu0 %v3727_v20 }
 0x5f2   :  { %v3585_v62 = vpack.c.bf16 %v2541_v49, %v2540_v58  ;;  %v2506_v63 = vpop.permute.xlu1 %2505 }
 0x5f3   :  { %v2543_v32 = vmul.f32 %v2506_v63, %v2471_v59  ;;  %v2501_v45 = vpop.permute.xlu0 %2500 }
 0x5f4   :  { %v2542_v46 = vmul.f32 %v2501_v45, %v2470_v61  ;;  %3586 = vmatpush3.bf16.msra.mxu0 %v3585_v62 }
 0x5f5   :  { %3587 = vmatprep.subr.bf16.mxu0 %v3727_v20 }
 0x5f6   :  { %v3588_v50 = vpack.c.bf16 %v2543_v32, %v2542_v46  ;;  %v2516_v51 = vpop.permute.xlu1 %2515 }
 0x5f7   :  { %v2545_v52 = vmul.f32 %v2516_v51, %v2473_v60  ;;  %v2511_v1 = vpop.permute.xlu0 %2510 }
 0x5f8   :  { %v2544_v2 = vmul.f32 %v2511_v1, %v2472_v0  ;;  %3589 = vmatpush3.bf16.msra.mxu0 %v3588_v50 }
 0x5f9   :  { %3590 = vmatprep.subr.bf16.mxu0 %v3727_v20 }
 0x5fa   :  { %v3591_v7 = vpack.c.bf16 %v2545_v52, %v2544_v2  ;;  %v2526_v8 = vpop.permute.xlu1 %2525 }
 0x5fb   :  { %v2547_v9 = vmul.f32 %v2526_v8, %v2475_v4  ;;  %v2521_v10 = vpop.permute.xlu0 %2520 }
 0x5fc   :  { %v2546_v11 = vmul.f32 %v2521_v10, %v2474_v5  ;;  %3592 = vmatpush3.bf16.msra.mxu0 %v3591_v7 }
 0x5fd   :  { %3593 = vmatprep.subr.bf16.mxu0 %v3727_v20 }
 0x5fe   :  { %v3594_v14 = vpack.c.bf16 %v2547_v9, %v2546_v11  ;;  %v2536_v15 = vpop.permute.xlu1 %2535 }
 0x5ff   :  { %v2549_v18 = vmul.f32 %v2536_v15, %v2477_v12  ;;  %v2531_v16 = vpop.permute.xlu0 %2530 }
 0x600   :  { %v2548_v3 = vmul.f32 %v2531_v16, %v2476_v13  ;;  %3595 = vmatpush3.bf16.msra.mxu0 %v3594_v14 }
 0x601   :  { %3596 = vmatprep.subr.bf16.mxu0 %v3727_v20 }
 0x602   :  { %v3597_v6 = vpack.c.bf16 %v2549_v18, %v2548_v3 }
 0x604   :  { %3598 = vmatpush3.bf16.msra.mxu0 %v3597_v6 }
 0x607   :  { %3415 = vmatmul.mubr.msk.f32.vlgmr.msra.gmra.mrb[36].mxu0 %vm205_vm0, %v2465_v17 }
 0x6da   :  { %v2626_v19 = vpop.f32.mrb[36].mxu0 }
 0x6db   :  { %v2627_v36 = vadd.f32 %v2829_v21, %v2626_v19  ;;  %v3416_v22 = vpop.f32.mrb[37].mxu0 }
 0x6dd   :  { %2631 = vst.msk [vmem:[#allocation3] sm:$0xf] %vm2630_vm14, %v2627_v36 }
 0x6de   :  { %3713 = shalt.err (!%p3710_p4)
}
 0x6df   :  { %s3714_s10 = scalar_lea.hbm %s4628_s19, 64 }
 0x6e0   :  { %p3715_p5 = scmp.ne.s32.totalorder %s4628_s19, %s3714_s10  ;;  %p3718_p6 = scmp.lt.u32.totalorder %s3714_s10, %s4628_s19 }
 0x6e2   :  { %p3720_p7 = pnand %p3718_p6, %p3715_p5 }
 0x6e4   :  { %3723 = shalt.err (!%p3720_p7)
}
 0x6e5   :  { %2641 = dma.vmem_to_hbm [thread:$0]  %s2639_s12, 64, %s4628_s19, [#allocation4]  }
 0x6e6   :  { %3724 = dma.done.wait [#allocation4], 64  }
 0x6e7   :  { %3725 = vsyncadd [#allocation4], 4294967232 }
 0x6e8   :  { %2645 = vsyncpa [#allocation4], 1 }

</bundles_post_ra>
